<compile_context>
chip_gen: v7x
topology: tpu7x:2x2x1
jax: 0.10.0
libtpu: 0.0.40
codegen_flags: <defaults>
</compile_context>

<pallas_src>
import functools

import jax
import jax.numpy as jnp
import numpy as np
from jax import lax
from jax.experimental import pallas as pl
from jax.experimental.pallas import tpu as pltpu

_LN_EPS = 1e-5
_HEAD_SIZE = 3     # 'longitudinal' classifier LSTM hidden size (cell(h_last, 3))
_HEAD_PAD = 128    # lane-dense padded head width: stores & output DMA are full vregs
_MAX_UNROLL = 8    # bounded unroll of the time recurrence


# ----------------------------------------------------------------------------
# Fused kernel builder
# ----------------------------------------------------------------------------
def _make_fused_kernel(T, Bp, hidden_sizes, head_pad):
    L = len(hidden_sizes)
    unroll = int(min(T, _MAX_UNROLL))

    def kernel(*refs):
        it = iter(refs)
        x_ref = next(it)                                          # (T*Bp, F)
        layer_refs = [tuple(next(it) for _ in range(5)) for _ in range(L)]
        wo_ih, wo_hh, bo = (next(it) for _ in range(3))           # head params (padded)
        mask_ref = next(it)                                       # (T*Bp, 1) int32
        out_ref = next(it)                                        # (T*Bp, head_pad)
        act_a = next(it)                                          # (T*Bp, maxH) scratch
        act_b = next(it)                                          # (T*Bp, maxH) scratch
        xp_ref = next(it)                                         # (T*Bp, 4*maxW) scratch
        acts = (act_a, act_b)

        def run_lstm(load_x, whh_ref, H, store_fn):
            """Serial time recurrence. Input projection already materialized; LN hoisted."""
            def body(t, carry):
                h, c = carry
                row = pl.multiple_of(t * Bp, Bp)
                # whh streamed from VMEM each step (not pinned in vregs).
                gates = load_x(row) + jnp.dot(h, whh_ref[...],
                                              preferred_element_type=jnp.float32)
                i_g = jax.nn.sigmoid(gates[:, 0 * H:1 * H])
                f_g = jax.nn.sigmoid(gates[:, 1 * H:2 * H])
                g_g = jnp.tanh(gates[:, 2 * H:3 * H])
                o_g = jax.nn.sigmoid(gates[:, 3 * H:4 * H])
                c_new = f_g * c + i_g * g_g
                h_new = o_g * jnp.tanh(c_new)
                store_fn(row, h_new)
                return (h_new, c_new)

            z = jnp.zeros((Bp, H), jnp.float32)
            lax.fori_loop(0, T, body, (z, z), unroll=unroll)

        # ---- stacked LSTM + TimeDistributed(LayerNorm) layers ----
        for l in range(L):
            wih, whh, b, gamma, beta = layer_refs[l]
            H = hidden_sizes[l]
            act = acts[l % 2]
            if l == 0:
                cur = x_ref[...]
            else:
                cur = acts[(l - 1) % 2][:, :hidden_sizes[l - 1]]

            # Hoisted time-independent input projection: one (T*Bp, Fin)@(Fin, 4H) matmul.
            xp_ref[:, :4 * H] = (jnp.dot(cur, wih[...],
                                         preferred_element_type=jnp.float32) + b[...])

            def load_x(row, W=4 * H):
                return xp_ref[pl.ds(row, Bp), :W]

            def store_raw(row, h, act=act, H=H):
                act[pl.ds(row, Bp), :H] = h

            run_lstm(load_x, whh, H, store_raw)

            # TimeDistributed(LayerNorm): single dense whole-array pass (off serial path).
            hs = act[:, :H]
            mean = jnp.mean(hs, axis=-1, keepdims=True)
            var = jnp.mean((hs - mean) ** 2, axis=-1, keepdims=True)
            act[:, :H] = ((hs - mean) * lax.rsqrt(var + _LN_EPS)) * gamma[...] + beta[...]

        # ---- 'longitudinal' classifier head (LSTM hidden 3, lane-padded to 128) ----
        cur = acts[(L - 1) % 2][:, :hidden_sizes[-1]]
        xp_ref[:, :4 * head_pad] = (jnp.dot(cur, wo_ih[...],
                                            preferred_element_type=jnp.float32) + bo[...])

        def load_xo(row, W=4 * head_pad):
            return xp_ref[pl.ds(row, Bp), :W]

        def store_masked(row, h):
            # pad_packed_sequence(padding_value=-inf) folded into the per-step store.
            m = mask_ref[pl.ds(row, Bp), :] != 0
            out_ref[pl.ds(row, Bp), :] = jnp.where(m, h, -jnp.inf)

        run_lstm(load_xo, wo_hh, head_pad, store_masked)

    return kernel


# ----------------------------------------------------------------------------
# Wrapper
# ----------------------------------------------------------------------------
def _round_up(n, m):
    return -(-n // m) * m


@functools.partial(jax.jit, static_argnames=("hidden_sizes",))
def longitudinal_stacker_forward(x, lengths, params, hidden_sizes):
    """x: (B, T, F) float, lengths: (B,) int. Returns (B, T, 3) with -inf padding."""
    B, T, F = x.shape
    Bp = _round_up(B, 8)                                    # full sublane tiles
    max_h = max(hidden_sizes)
    max_w = max(max_h, _HEAD_PAD)
    n = T * Bp

    xt = jnp.transpose(x, (1, 0, 2)).astype(jnp.float32)    # (T, B, F)
    xt = jnp.pad(xt, ((0, 0), (0, Bp - B), (0, 0)))         # (T, Bp, F)
    x2d = xt.reshape(n, F)

    len_p = jnp.zeros((Bp,), jnp.int32).at[:B].set(lengths.astype(jnp.int32))
    valid = jnp.arange(T, dtype=jnp.int32)[:, None] < len_p[None, :]   # (T, Bp)
    mask = valid.astype(jnp.int32).reshape(n, 1)

    flat_inputs = [x2d]
    for layer in params["layers"]:
        flat_inputs.extend(layer)
    flat_inputs.extend(params["out"])
    flat_inputs.append(mask)

    scratch = [pltpu.VMEM((n, max_h), jnp.float32),          # act (ping)
               pltpu.VMEM((n, max_h), jnp.float32),          # act (pong)
               pltpu.VMEM((n, 4 * max_w), jnp.float32)]      # shared xproj (layers + head)

    # Explicit scoped-VMEM budget (defaults: 16 MiB v5e / 32 MiB v6e,v7x).
    param_bytes = sum(int(np.prod(p.shape)) for p in flat_inputs[1:]) * 4
    io_bytes = (n * F + n * _HEAD_PAD) * 4
    scratch_bytes = (2 * n * max_h + n * 4 * max_w) * 4
    needed = int(1.25 * (param_bytes + io_bytes + scratch_bytes)) + (2 << 20)
    vmem_limit = int(min(max(needed, 32 << 20), 100 << 20))

    kernel = _make_fused_kernel(T, Bp, tuple(hidden_sizes), _HEAD_PAD)
    out2d = pl.pallas_call(
        kernel,
        out_shape=jax.ShapeDtypeStruct((n, _HEAD_PAD), jnp.float32),
        scratch_shapes=scratch,
        compiler_params=pltpu.CompilerParams(vmem_limit_bytes=vmem_limit),
    )(*flat_inputs)

    out = out2d.reshape(T, Bp, _HEAD_PAD)[:, :B, :_HEAD_SIZE]
    return jnp.transpose(out, (1, 0, 2))                     # (B, T, 3)


# ----------------------------------------------------------------------------
# Parameter init (PyTorch-style LSTM init, gate order i, f, g, o)
# ----------------------------------------------------------------------------
def init_lstm_params(key, in_size, hidden):
    k1, k2, k3, k4 = jax.random.split(key, 4)
    s = 1.0 / np.sqrt(hidden)
    w_ih = jax.random.uniform(k1, (4 * hidden, in_size), jnp.float32, -s, s)
    w_hh = jax.random.uniform(k2, (4 * hidden, hidden), jnp.float32, -s, s)
    b_ih = jax.random.uniform(k3, (4 * hidden,), jnp.float32, -s, s)
    b_hh = jax.random.uniform(k4, (4 * hidden,), jnp.float32, -s, s)
    # pre-transposed + fused biases: kernel computes x @ W_ih^T + h @ W_hh^T + b
    return w_ih.T, w_hh.T, (b_ih + b_hh).reshape(1, -1)


def _pad_head_params(wih_t, whh_t, b, h, hp):
    """Embed a size-h LSTM into a size-hp one (zero-padded) so 4*hp is lane-dense.

    Padded gate columns/rows are zero -> padded hidden channels stay exactly 0 and
    the first h channels run the exact same recurrence as the unpadded LSTM.
    """
    fin = wih_t.shape[0]
    wih_p = jnp.zeros((fin, 4 * hp), jnp.float32)
    whh_p = jnp.zeros((hp, 4 * hp), jnp.float32)
    b_p = jnp.zeros((1, 4 * hp), jnp.float32)
    for k in range(4):
        wih_p = wih_p.at[:, k * hp:k * hp + h].set(wih_t[:, k * h:(k + 1) * h])
        whh_p = whh_p.at[:h, k * hp:k * hp + h].set(whh_t[:, k * h:(k + 1) * h])
        b_p = b_p.at[:, k * hp:k * hp + h].set(b[:, k * h:(k + 1) * h])
    return wih_p, whh_p, b_p


def init_longitudinal_stacker(key, input_size, hidden_sizes):
    params = {"layers": [], "out": None, "out_raw": None}
    keys = jax.random.split(key, len(hidden_sizes) + 1)
    prev = input_size
    for i, h in enumerate(hidden_sizes):
        wih_t, whh_t, b = init_lstm_params(keys[i], prev, h)
        gamma = jnp.ones((1, h), jnp.float32)    # nn.LayerNorm default weight
        beta = jnp.zeros((1, h), jnp.float32)    # nn.LayerNorm default bias
        params["layers"].append((wih_t, whh_t, b, gamma, beta))
        prev = h
    wih_t, whh_t, b = init_lstm_params(keys[-1], prev, _HEAD_SIZE)
    params["out_raw"] = (wih_t, whh_t, b)                       # reference only
    params["out"] = _pad_head_params(wih_t, whh_t, b, _HEAD_SIZE, _HEAD_PAD)
    return params


# ----------------------------------------------------------------------------
# Pure-JAX reference (for correctness checking only)
# ----------------------------------------------------------------------------
def _ref_lstm(x_seq, wih_t, whh_t, b, H):
    Bsz = x_seq.shape[1]
    prec = jax.lax.Precision.HIGHEST

    def step(carry, x_t):
        h, c = carry
        g = (jnp.dot(x_t, wih_t, precision=prec)
             + jnp.dot(h, whh_t, precision=prec) + b)
        i = jax.nn.sigmoid(g[:, 0 * H:1 * H])
        f = jax.nn.sigmoid(g[:, 1 * H:2 * H])
        gg = jnp.tanh(g[:, 2 * H:3 * H])
        o = jax.nn.sigmoid(g[:, 3 * H:4 * H])
        c = f * c + i * gg
        h = o * jnp.tanh(c)
        return (h, c), h

    z = jnp.zeros((Bsz, H), jnp.float32)
    _, hs = lax.scan(step, (z, z), x_seq)
    return hs   # (T, B, H)


def _reference_forward(x, lengths, params, hidden_sizes):
    B, T, _ = x.shape
    xt = jnp.transpose(x, (1, 0, 2)).astype(jnp.float32)
    for (wih_t, whh_t, b, gamma, beta), H in zip(params["layers"], hidden_sizes):
        hs = _ref_lstm(xt, wih_t, whh_t, b, H)
        mean = jnp.mean(hs, axis=-1, keepdims=True)
        var = jnp.mean((hs - mean) ** 2, axis=-1, keepdims=True)
        xt = (hs - mean) * lax.rsqrt(var + _LN_EPS) * gamma + beta
    wih_t, whh_t, b = params["out_raw"]
    hs = _ref_lstm(xt, wih_t, whh_t, b, _HEAD_SIZE)
    out = jnp.transpose(hs, (1, 0, 2))                       # (B, T, 3)
    valid = jnp.arange(T)[None, :, None] < lengths[:, None, None]
    return jnp.where(valid, out, -jnp.inf)


# ----------------------------------------------------------------------------
if __name__ == "__main__":
    key = jax.random.PRNGKey(0)
    k_par, k_x = jax.random.split(key)

    B, T, F = 4, 8, 16
    hidden_sizes = (32, 32)

    params = init_longitudinal_stacker(k_par, F, hidden_sizes)
    x = jax.random.normal(k_x, (B, T, F), jnp.float32)
    lengths = jnp.array([8, 6, 5, 3], jnp.int32)   # max length == T

    out = longitudinal_stacker_forward(x, lengths, params, hidden_sizes)
    out = jax.block_until_ready(out)

    assert out.shape == (B, T, 3), out.shape
    out_np = np.asarray(out)
    for b in range(B):
        Lb = int(lengths[b])
        assert np.all(np.isfinite(out_np[b, :Lb])), "valid timesteps must be finite"
        if Lb < T:
            assert np.all(np.isneginf(out_np[b, Lb:])), "padding must be -inf"

    ref = np.asarray(_reference_forward(x, lengths, params, hidden_sizes))
    np.testing.assert_allclose(out_np, ref, rtol=5e-3, atol=5e-3)

    print("KERNEL_OK")
</pallas_src>

<mosaic_0001>
module attributes {stable_mosaic.version = 11 : i64} {
  func.func @kernel(%arg0: memref<64x16xf32, #tpu.memory_space<vmem>>, %arg1: memref<16x128xf32, #tpu.memory_space<vmem>>, %arg2: memref<32x128xf32, #tpu.memory_space<vmem>>, %arg3: memref<1x128xf32, #tpu.memory_space<vmem>>, %arg4: memref<1x32xf32, #tpu.memory_space<vmem>>, %arg5: memref<1x32xf32, #tpu.memory_space<vmem>>, %arg6: memref<32x128xf32, #tpu.memory_space<vmem>>, %arg7: memref<32x128xf32, #tpu.memory_space<vmem>>, %arg8: memref<1x128xf32, #tpu.memory_space<vmem>>, %arg9: memref<1x32xf32, #tpu.memory_space<vmem>>, %arg10: memref<1x32xf32, #tpu.memory_space<vmem>>, %arg11: memref<32x512xf32, #tpu.memory_space<vmem>>, %arg12: memref<128x512xf32, #tpu.memory_space<vmem>>, %arg13: memref<1x512xf32, #tpu.memory_space<vmem>>, %arg14: memref<64x1xi32, #tpu.memory_space<vmem>>, %arg15: memref<64x128xf32, #tpu.memory_space<vmem>>, %arg16: memref<64x32xf32, #tpu.memory_space<vmem>>, %arg17: memref<64x32xf32, #tpu.memory_space<vmem>>, %arg18: memref<64x512xf32, #tpu.memory_space<vmem>>) attributes {dimension_semantics = [], scalar_prefetch = 0 : i64, scratch_operands = 3 : i64, tpu.core_type = #tpu.core_type<tc>} {
    %c0 = arith.constant 0 : index
    %c0_0 = arith.constant 0 : index
    %0 = vector.load %arg0[%c0, %c0_0] : memref<64x16xf32, #tpu.memory_space<vmem>>, vector<64x16xf32>
    %c0_1 = arith.constant 0 : index
    %c0_2 = arith.constant 0 : index
    %1 = vector.load %arg1[%c0_1, %c0_2] : memref<16x128xf32, #tpu.memory_space<vmem>>, vector<16x128xf32>
    %cst = arith.constant dense<0.000000e+00> : vector<64x128xf32>
    %2 = tpu.matmul %0, %1, %cst {dimension_numbers = #tpu.dot_dimension_numbers<[1], [0], [0], [1], [0, 0, 1, 1], [], []>} : vector<64x16xf32>, vector<16x128xf32>, vector<64x128xf32> -> vector<64x128xf32>
    %c0_3 = arith.constant 0 : index
    %c0_4 = arith.constant 0 : index
    %3 = vector.load %arg3[%c0_3, %c0_4] : memref<1x128xf32, #tpu.memory_space<vmem>>, vector<1x128xf32>
    %4 = vector.broadcast %3 : vector<1x128xf32> to vector<64x128xf32>
    %5 = arith.addf %2, %4 : vector<64x128xf32>
    %c0_5 = arith.constant 0 : index
    %c0_6 = arith.constant 0 : index
    %6 = vector.load %arg18[%c0_5, %c0_6] : memref<64x512xf32, #tpu.memory_space<vmem>>, vector<64x128xf32>
    tpu.vector_store %arg18[%c0_5, %c0_6], %5 {strides = array<i32>} : memref<64x512xf32, #tpu.memory_space<vmem>>, vector<64x128xf32>,
    %cst_7 = arith.constant 0.000000e+00 : f32
    %7 = vector.broadcast %cst_7 : f32 to vector<8x32xf32>
    %c0_i32 = arith.constant 0 : i32
    %c8_i32 = arith.constant 8 : i32
    %8 = arith.muli %c0_i32, %c8_i32 : i32
    %9 = tpu.assume_multiple %8, 8 : i32
    %10 = arith.index_cast %9 : i32 to index
    %c0_8 = arith.constant 0 : index
    %11 = vector.load %arg18[%10, %c0_8] : memref<64x512xf32, #tpu.memory_space<vmem>>, vector<8x128xf32>
    %c0_9 = arith.constant 0 : index
    %c0_10 = arith.constant 0 : index
    %12 = vector.load %arg2[%c0_9, %c0_10] : memref<32x128xf32, #tpu.memory_space<vmem>>, vector<32x128xf32>
    %cst_11 = arith.constant dense<0.000000e+00> : vector<8x128xf32>
    %13 = tpu.matmul %7, %12, %cst_11 {dimension_numbers = #tpu.dot_dimension_numbers<[1], [0], [0], [1], [0, 0, 1, 1], [], []>} : vector<8x32xf32>, vector<32x128xf32>, vector<8x128xf32> -> vector<8x128xf32>
    %14 = arith.addf %11, %13 : vector<8x128xf32>
    %15 = vector.extract_strided_slice %14 {offsets = [0, 0], sizes = [8, 32], strides = [1, 1]} : vector<8x128xf32> to vector<8x32xf32>
    %16 = arith.negf %15 : vector<8x32xf32>
    %17 = math.exp %16 : vector<8x32xf32>
    %cst_12 = arith.constant 1.000000e+00 : f32
    %18 = vector.broadcast %cst_12 : f32 to vector<8x32xf32>
    %19 = arith.addf %18, %17 : vector<8x32xf32>
    %20 = arith.divf %18, %19 : vector<8x32xf32>
    %21 = vector.extract_strided_slice %14 {offsets = [0, 32], sizes = [8, 32], strides = [1, 1]} : vector<8x128xf32> to vector<8x32xf32>
    %22 = arith.negf %21 : vector<8x32xf32>
    %23 = math.exp %22 : vector<8x32xf32>
    %cst_13 = arith.constant 1.000000e+00 : f32
    %24 = vector.broadcast %cst_13 : f32 to vector<8x32xf32>
    %25 = arith.addf %24, %23 : vector<8x32xf32>
    %26 = arith.divf %24, %25 : vector<8x32xf32>
    %27 = vector.extract_strided_slice %14 {offsets = [0, 64], sizes = [8, 32], strides = [1, 1]} : vector<8x128xf32> to vector<8x32xf32>
    %28 = math.tanh %27 : vector<8x32xf32>
    %29 = vector.extract_strided_slice %14 {offsets = [0, 96], sizes = [8, 32], strides = [1, 1]} : vector<8x128xf32> to vector<8x32xf32>
    %30 = arith.negf %29 : vector<8x32xf32>
    %31 = math.exp %30 : vector<8x32xf32>
    %cst_14 = arith.constant 1.000000e+00 : f32
    %32 = vector.broadcast %cst_14 : f32 to vector<8x32xf32>
    %33 = arith.addf %32, %31 : vector<8x32xf32>
    %34 = arith.divf %32, %33 : vector<8x32xf32>
    %35 = arith.mulf %26, %7 : vector<8x32xf32>
    %36 = arith.mulf %20, %28 : vector<8x32xf32>
    %37 = arith.addf %35, %36 : vector<8x32xf32>
    %38 = math.tanh %37 : vector<8x32xf32>
    %39 = arith.mulf %34, %38 : vector<8x32xf32>
    %40 = arith.index_cast %9 : i32 to index
    %c0_15 = arith.constant 0 : index
    %41 = vector.load %arg16[%40, %c0_15] : memref<64x32xf32, #tpu.memory_space<vmem>>, vector<8x32xf32>
    tpu.vector_store %arg16[%40, %c0_15], %39 {strides = array<i32>} : memref<64x32xf32, #tpu.memory_space<vmem>>, vector<8x32xf32>,
    %c1_i32 = arith.constant 1 : i32
    %c8_i32_16 = arith.constant 8 : i32
    %42 = arith.muli %c1_i32, %c8_i32_16 : i32
    %43 = tpu.assume_multiple %42, 8 : i32
    %44 = arith.index_cast %43 : i32 to index
    %c0_17 = arith.constant 0 : index
    %45 = vector.load %arg18[%44, %c0_17] : memref<64x512xf32, #tpu.memory_space<vmem>>, vector<8x128xf32>
    %c0_18 = arith.constant 0 : index
    %c0_19 = arith.constant 0 : index
    %46 = vector.load %arg2[%c0_18, %c0_19] : memref<32x128xf32, #tpu.memory_space<vmem>>, vector<32x128xf32>
    %cst_20 = arith.constant dense<0.000000e+00> : vector<8x128xf32>
    %47 = tpu.matmul %39, %46, %cst_20 {dimension_numbers = #tpu.dot_dimension_numbers<[1], [0], [0], [1], [0, 0, 1, 1], [], []>} : vector<8x32xf32>, vector<32x128xf32>, vector<8x128xf32> -> vector<8x128xf32>
    %48 = arith.addf %45, %47 : vector<8x128xf32>
    %49 = vector.extract_strided_slice %48 {offsets = [0, 0], sizes = [8, 32], strides = [1, 1]} : vector<8x128xf32> to vector<8x32xf32>
    %50 = arith.negf %49 : vector<8x32xf32>
    %51 = math.exp %50 : vector<8x32xf32>
    %cst_21 = arith.constant 1.000000e+00 : f32
    %52 = vector.broadcast %cst_21 : f32 to vector<8x32xf32>
    %53 = arith.addf %52, %51 : vector<8x32xf32>
    %54 = arith.divf %52, %53 : vector<8x32xf32>
    %55 = vector.extract_strided_slice %48 {offsets = [0, 32], sizes = [8, 32], strides = [1, 1]} : vector<8x128xf32> to vector<8x32xf32>
    %56 = arith.negf %55 : vector<8x32xf32>
    %57 = math.exp %56 : vector<8x32xf32>
    %cst_22 = arith.constant 1.000000e+00 : f32
    %58 = vector.broadcast %cst_22 : f32 to vector<8x32xf32>
    %59 = arith.addf %58, %57 : vector<8x32xf32>
    %60 = arith.divf %58, %59 : vector<8x32xf32>
    %61 = vector.extract_strided_slice %48 {offsets = [0, 64], sizes = [8, 32], strides = [1, 1]} : vector<8x128xf32> to vector<8x32xf32>
    %62 = math.tanh %61 : vector<8x32xf32>
    %63 = vector.extract_strided_slice %48 {offsets = [0, 96], sizes = [8, 32], strides = [1, 1]} : vector<8x128xf32> to vector<8x32xf32>
    %64 = arith.negf %63 : vector<8x32xf32>
    %65 = math.exp %64 : vector<8x32xf32>
    %cst_23 = arith.constant 1.000000e+00 : f32
    %66 = vector.broadcast %cst_23 : f32 to vector<8x32xf32>
    %67 = arith.addf %66, %65 : vector<8x32xf32>
    %68 = arith.divf %66, %67 : vector<8x32xf32>
    %69 = arith.mulf %60, %37 : vector<8x32xf32>
    %70 = arith.mulf %54, %62 : vector<8x32xf32>
    %71 = arith.addf %69, %70 : vector<8x32xf32>
    %72 = math.tanh %71 : vector<8x32xf32>
    %73 = arith.mulf %68, %72 : vector<8x32xf32>
    %74 = arith.index_cast %43 : i32 to index
    %c0_24 = arith.constant 0 : index
    %75 = vector.load %arg16[%74, %c0_24] : memref<64x32xf32, #tpu.memory_space<vmem>>, vector<8x32xf32>
    tpu.vector_store %arg16[%74, %c0_24], %73 {strides = array<i32>} : memref<64x32xf32, #tpu.memory_space<vmem>>, vector<8x32xf32>,
    %c2_i32 = arith.constant 2 : i32
    %c8_i32_25 = arith.constant 8 : i32
    %76 = arith.muli %c2_i32, %c8_i32_25 : i32
    %77 = tpu.assume_multiple %76, 8 : i32
    %78 = arith.index_cast %77 : i32 to index
    %c0_26 = arith.constant 0 : index
    %79 = vector.load %arg18[%78, %c0_26] : memref<64x512xf32, #tpu.memory_space<vmem>>, vector<8x128xf32>
    %c0_27 = arith.constant 0 : index
    %c0_28 = arith.constant 0 : index
    %80 = vector.load %arg2[%c0_27, %c0_28] : memref<32x128xf32, #tpu.memory_space<vmem>>, vector<32x128xf32>
    %cst_29 = arith.constant dense<0.000000e+00> : vector<8x128xf32>
    %81 = tpu.matmul %73, %80, %cst_29 {dimension_numbers = #tpu.dot_dimension_numbers<[1], [0], [0], [1], [0, 0, 1, 1], [], []>} : vector<8x32xf32>, vector<32x128xf32>, vector<8x128xf32> -> vector<8x128xf32>
    %82 = arith.addf %79, %81 : vector<8x128xf32>
    %83 = vector.extract_strided_slice %82 {offsets = [0, 0], sizes = [8, 32], strides = [1, 1]} : vector<8x128xf32> to vector<8x32xf32>
    %84 = arith.negf %83 : vector<8x32xf32>
    %85 = math.exp %84 : vector<8x32xf32>
    %cst_30 = arith.constant 1.000000e+00 : f32
    %86 = vector.broadcast %cst_30 : f32 to vector<8x32xf32>
    %87 = arith.addf %86, %85 : vector<8x32xf32>
    %88 = arith.divf %86, %87 : vector<8x32xf32>
    %89 = vector.extract_strided_slice %82 {offsets = [0, 32], sizes = [8, 32], strides = [1, 1]} : vector<8x128xf32> to vector<8x32xf32>
    %90 = arith.negf %89 : vector<8x32xf32>
    %91 = math.exp %90 : vector<8x32xf32>
    %cst_31 = arith.constant 1.000000e+00 : f32
    %92 = vector.broadcast %cst_31 : f32 to vector<8x32xf32>
    %93 = arith.addf %92, %91 : vector<8x32xf32>
    %94 = arith.divf %92, %93 : vector<8x32xf32>
    %95 = vector.extract_strided_slice %82 {offsets = [0, 64], sizes = [8, 32], strides = [1, 1]} : vector<8x128xf32> to vector<8x32xf32>
    %96 = math.tanh %95 : vector<8x32xf32>
    %97 = vector.extract_strided_slice %82 {offsets = [0, 96], sizes = [8, 32], strides = [1, 1]} : vector<8x128xf32> to vector<8x32xf32>
    %98 = arith.negf %97 : vector<8x32xf32>
    %99 = math.exp %98 : vector<8x32xf32>
    %cst_32 = arith.constant 1.000000e+00 : f32
    %100 = vector.broadcast %cst_32 : f32 to vector<8x32xf32>
    %101 = arith.addf %100, %99 : vector<8x32xf32>
    %102 = arith.divf %100, %101 : vector<8x32xf32>
    %103 = arith.mulf %94, %71 : vector<8x32xf32>
    %104 = arith.mulf %88, %96 : vector<8x32xf32>
    %105 = arith.addf %103, %104 : vector<8x32xf32>
    %106 = math.tanh %105 : vector<8x32xf32>
    %107 = arith.mulf %102, %106 : vector<8x32xf32>
    %108 = arith.index_cast %77 : i32 to index
    %c0_33 = arith.constant 0 : index
    %109 = vector.load %arg16[%108, %c0_33] : memref<64x32xf32, #tpu.memory_space<vmem>>, vector<8x32xf32>
    tpu.vector_store %arg16[%108, %c0_33], %107 {strides = array<i32>} : memref<64x32xf32, #tpu.memory_space<vmem>>, vector<8x32xf32>,
    %c3_i32 = arith.constant 3 : i32
    %c8_i32_34 = arith.constant 8 : i32
    %110 = arith.muli %c3_i32, %c8_i32_34 : i32
    %111 = tpu.assume_multiple %110, 8 : i32
    %112 = arith.index_cast %111 : i32 to index
    %c0_35 = arith.constant 0 : index
    %113 = vector.load %arg18[%112, %c0_35] : memref<64x512xf32, #tpu.memory_space<vmem>>, vector<8x128xf32>
    %c0_36 = arith.constant 0 : index
    %c0_37 = arith.constant 0 : index
    %114 = vector.load %arg2[%c0_36, %c0_37] : memref<32x128xf32, #tpu.memory_space<vmem>>, vector<32x128xf32>
    %cst_38 = arith.constant dense<0.000000e+00> : vector<8x128xf32>
    %115 = tpu.matmul %107, %114, %cst_38 {dimension_numbers = #tpu.dot_dimension_numbers<[1], [0], [0], [1], [0, 0, 1, 1], [], []>} : vector<8x32xf32>, vector<32x128xf32>, vector<8x128xf32> -> vector<8x128xf32>
    %116 = arith.addf %113, %115 : vector<8x128xf32>
    %117 = vector.extract_strided_slice %116 {offsets = [0, 0], sizes = [8, 32], strides = [1, 1]} : vector<8x128xf32> to vector<8x32xf32>
    %118 = arith.negf %117 : vector<8x32xf32>
    %119 = math.exp %118 : vector<8x32xf32>
    %cst_39 = arith.constant 1.000000e+00 : f32
    %120 = vector.broadcast %cst_39 : f32 to vector<8x32xf32>
    %121 = arith.addf %120, %119 : vector<8x32xf32>
    %122 = arith.divf %120, %121 : vector<8x32xf32>
    %123 = vector.extract_strided_slice %116 {offsets = [0, 32], sizes = [8, 32], strides = [1, 1]} : vector<8x128xf32> to vector<8x32xf32>
    %124 = arith.negf %123 : vector<8x32xf32>
    %125 = math.exp %124 : vector<8x32xf32>
    %cst_40 = arith.constant 1.000000e+00 : f32
    %126 = vector.broadcast %cst_40 : f32 to vector<8x32xf32>
    %127 = arith.addf %126, %125 : vector<8x32xf32>
    %128 = arith.divf %126, %127 : vector<8x32xf32>
    %129 = vector.extract_strided_slice %116 {offsets = [0, 64], sizes = [8, 32], strides = [1, 1]} : vector<8x128xf32> to vector<8x32xf32>
    %130 = math.tanh %129 : vector<8x32xf32>
    %131 = vector.extract_strided_slice %116 {offsets = [0, 96], sizes = [8, 32], strides = [1, 1]} : vector<8x128xf32> to vector<8x32xf32>
    %132 = arith.negf %131 : vector<8x32xf32>
    %133 = math.exp %132 : vector<8x32xf32>
    %cst_41 = arith.constant 1.000000e+00 : f32
    %134 = vector.broadcast %cst_41 : f32 to vector<8x32xf32>
    %135 = arith.addf %134, %133 : vector<8x32xf32>
    %136 = arith.divf %134, %135 : vector<8x32xf32>
    %137 = arith.mulf %128, %105 : vector<8x32xf32>
    %138 = arith.mulf %122, %130 : vector<8x32xf32>
    %139 = arith.addf %137, %138 : vector<8x32xf32>
    %140 = math.tanh %139 : vector<8x32xf32>
    %141 = arith.mulf %136, %140 : vector<8x32xf32>
    %142 = arith.index_cast %111 : i32 to index
    %c0_42 = arith.constant 0 : index
    %143 = vector.load %arg16[%142, %c0_42] : memref<64x32xf32, #tpu.memory_space<vmem>>, vector<8x32xf32>
    tpu.vector_store %arg16[%142, %c0_42], %141 {strides = array<i32>} : memref<64x32xf32, #tpu.memory_space<vmem>>, vector<8x32xf32>,
    %c4_i32 = arith.constant 4 : i32
    %c8_i32_43 = arith.constant 8 : i32
    %144 = arith.muli %c4_i32, %c8_i32_43 : i32
    %145 = tpu.assume_multiple %144, 8 : i32
    %146 = arith.index_cast %145 : i32 to index
    %c0_44 = arith.constant 0 : index
    %147 = vector.load %arg18[%146, %c0_44] : memref<64x512xf32, #tpu.memory_space<vmem>>, vector<8x128xf32>
    %c0_45 = arith.constant 0 : index
    %c0_46 = arith.constant 0 : index
    %148 = vector.load %arg2[%c0_45, %c0_46] : memref<32x128xf32, #tpu.memory_space<vmem>>, vector<32x128xf32>
    %cst_47 = arith.constant dense<0.000000e+00> : vector<8x128xf32>
    %149 = tpu.matmul %141, %148, %cst_47 {dimension_numbers = #tpu.dot_dimension_numbers<[1], [0], [0], [1], [0, 0, 1, 1], [], []>} : vector<8x32xf32>, vector<32x128xf32>, vector<8x128xf32> -> vector<8x128xf32>
    %150 = arith.addf %147, %149 : vector<8x128xf32>
    %151 = vector.extract_strided_slice %150 {offsets = [0, 0], sizes = [8, 32], strides = [1, 1]} : vector<8x128xf32> to vector<8x32xf32>
    %152 = arith.negf %151 : vector<8x32xf32>
    %153 = math.exp %152 : vector<8x32xf32>
    %cst_48 = arith.constant 1.000000e+00 : f32
    %154 = vector.broadcast %cst_48 : f32 to vector<8x32xf32>
    %155 = arith.addf %154, %153 : vector<8x32xf32>
    %156 = arith.divf %154, %155 : vector<8x32xf32>
    %157 = vector.extract_strided_slice %150 {offsets = [0, 32], sizes = [8, 32], strides = [1, 1]} : vector<8x128xf32> to vector<8x32xf32>
    %158 = arith.negf %157 : vector<8x32xf32>
    %159 = math.exp %158 : vector<8x32xf32>
    %cst_49 = arith.constant 1.000000e+00 : f32
    %160 = vector.broadcast %cst_49 : f32 to vector<8x32xf32>
    %161 = arith.addf %160, %159 : vector<8x32xf32>
    %162 = arith.divf %160, %161 : vector<8x32xf32>
    %163 = vector.extract_strided_slice %150 {offsets = [0, 64], sizes = [8, 32], strides = [1, 1]} : vector<8x128xf32> to vector<8x32xf32>
    %164 = math.tanh %163 : vector<8x32xf32>
    %165 = vector.extract_strided_slice %150 {offsets = [0, 96], sizes = [8, 32], strides = [1, 1]} : vector<8x128xf32> to vector<8x32xf32>
    %166 = arith.negf %165 : vector<8x32xf32>
    %167 = math.exp %166 : vector<8x32xf32>
    %cst_50 = arith.constant 1.000000e+00 : f32
    %168 = vector.broadcast %cst_50 : f32 to vector<8x32xf32>
    %169 = arith.addf %168, %167 : vector<8x32xf32>
    %170 = arith.divf %168, %169 : vector<8x32xf32>
    %171 = arith.mulf %162, %139 : vector<8x32xf32>
    %172 = arith.mulf %156, %164 : vector<8x32xf32>
    %173 = arith.addf %171, %172 : vector<8x32xf32>
    %174 = math.tanh %173 : vector<8x32xf32>
    %175 = arith.mulf %170, %174 : vector<8x32xf32>
    %176 = arith.index_cast %145 : i32 to index
    %c0_51 = arith.constant 0 : index
    %177 = vector.load %arg16[%176, %c0_51] : memref<64x32xf32, #tpu.memory_space<vmem>>, vector<8x32xf32>
    tpu.vector_store %arg16[%176, %c0_51], %175 {strides = array<i32>} : memref<64x32xf32, #tpu.memory_space<vmem>>, vector<8x32xf32>,
    %c5_i32 = arith.constant 5 : i32
    %c8_i32_52 = arith.constant 8 : i32
    %178 = arith.muli %c5_i32, %c8_i32_52 : i32
    %179 = tpu.assume_multiple %178, 8 : i32
    %180 = arith.index_cast %179 : i32 to index
    %c0_53 = arith.constant 0 : index
    %181 = vector.load %arg18[%180, %c0_53] : memref<64x512xf32, #tpu.memory_space<vmem>>, vector<8x128xf32>
    %c0_54 = arith.constant 0 : index
    %c0_55 = arith.constant 0 : index
    %182 = vector.load %arg2[%c0_54, %c0_55] : memref<32x128xf32, #tpu.memory_space<vmem>>, vector<32x128xf32>
    %cst_56 = arith.constant dense<0.000000e+00> : vector<8x128xf32>
    %183 = tpu.matmul %175, %182, %cst_56 {dimension_numbers = #tpu.dot_dimension_numbers<[1], [0], [0], [1], [0, 0, 1, 1], [], []>} : vector<8x32xf32>, vector<32x128xf32>, vector<8x128xf32> -> vector<8x128xf32>
    %184 = arith.addf %181, %183 : vector<8x128xf32>
    %185 = vector.extract_strided_slice %184 {offsets = [0, 0], sizes = [8, 32], strides = [1, 1]} : vector<8x128xf32> to vector<8x32xf32>
    %186 = arith.negf %185 : vector<8x32xf32>
    %187 = math.exp %186 : vector<8x32xf32>
    %cst_57 = arith.constant 1.000000e+00 : f32
    %188 = vector.broadcast %cst_57 : f32 to vector<8x32xf32>
    %189 = arith.addf %188, %187 : vector<8x32xf32>
    %190 = arith.divf %188, %189 : vector<8x32xf32>
    %191 = vector.extract_strided_slice %184 {offsets = [0, 32], sizes = [8, 32], strides = [1, 1]} : vector<8x128xf32> to vector<8x32xf32>
    %192 = arith.negf %191 : vector<8x32xf32>
    %193 = math.exp %192 : vector<8x32xf32>
    %cst_58 = arith.constant 1.000000e+00 : f32
    %194 = vector.broadcast %cst_58 : f32 to vector<8x32xf32>
    %195 = arith.addf %194, %193 : vector<8x32xf32>
    %196 = arith.divf %194, %195 : vector<8x32xf32>
    %197 = vector.extract_strided_slice %184 {offsets = [0, 64], sizes = [8, 32], strides = [1, 1]} : vector<8x128xf32> to vector<8x32xf32>
    %198 = math.tanh %197 : vector<8x32xf32>
    %199 = vector.extract_strided_slice %184 {offsets = [0, 96], sizes = [8, 32], strides = [1, 1]} : vector<8x128xf32> to vector<8x32xf32>
    %200 = arith.negf %199 : vector<8x32xf32>
    %201 = math.exp %200 : vector<8x32xf32>
    %cst_59 = arith.constant 1.000000e+00 : f32
    %202 = vector.broadcast %cst_59 : f32 to vector<8x32xf32>
    %203 = arith.addf %202, %201 : vector<8x32xf32>
    %204 = arith.divf %202, %203 : vector<8x32xf32>
    %205 = arith.mulf %196, %173 : vector<8x32xf32>
    %206 = arith.mulf %190, %198 : vector<8x32xf32>
    %207 = arith.addf %205, %206 : vector<8x32xf32>
    %208 = math.tanh %207 : vector<8x32xf32>
    %209 = arith.mulf %204, %208 : vector<8x32xf32>
    %210 = arith.index_cast %179 : i32 to index
    %c0_60 = arith.constant 0 : index
    %211 = vector.load %arg16[%210, %c0_60] : memref<64x32xf32, #tpu.memory_space<vmem>>, vector<8x32xf32>
    tpu.vector_store %arg16[%210, %c0_60], %209 {strides = array<i32>} : memref<64x32xf32, #tpu.memory_space<vmem>>, vector<8x32xf32>,
    %c6_i32 = arith.constant 6 : i32
    %c8_i32_61 = arith.constant 8 : i32
    %212 = arith.muli %c6_i32, %c8_i32_61 : i32
    %213 = tpu.assume_multiple %212, 8 : i32
    %214 = arith.index_cast %213 : i32 to index
    %c0_62 = arith.constant 0 : index
    %215 = vector.load %arg18[%214, %c0_62] : memref<64x512xf32, #tpu.memory_space<vmem>>, vector<8x128xf32>
    %c0_63 = arith.constant 0 : index
    %c0_64 = arith.constant 0 : index
    %216 = vector.load %arg2[%c0_63, %c0_64] : memref<32x128xf32, #tpu.memory_space<vmem>>, vector<32x128xf32>
    %cst_65 = arith.constant dense<0.000000e+00> : vector<8x128xf32>
    %217 = tpu.matmul %209, %216, %cst_65 {dimension_numbers = #tpu.dot_dimension_numbers<[1], [0], [0], [1], [0, 0, 1, 1], [], []>} : vector<8x32xf32>, vector<32x128xf32>, vector<8x128xf32> -> vector<8x128xf32>
    %218 = arith.addf %215, %217 : vector<8x128xf32>
    %219 = vector.extract_strided_slice %218 {offsets = [0, 0], sizes = [8, 32], strides = [1, 1]} : vector<8x128xf32> to vector<8x32xf32>
    %220 = arith.negf %219 : vector<8x32xf32>
    %221 = math.exp %220 : vector<8x32xf32>
    %cst_66 = arith.constant 1.000000e+00 : f32
    %222 = vector.broadcast %cst_66 : f32 to vector<8x32xf32>
    %223 = arith.addf %222, %221 : vector<8x32xf32>
    %224 = arith.divf %222, %223 : vector<8x32xf32>
    %225 = vector.extract_strided_slice %218 {offsets = [0, 32], sizes = [8, 32], strides = [1, 1]} : vector<8x128xf32> to vector<8x32xf32>
    %226 = arith.negf %225 : vector<8x32xf32>
    %227 = math.exp %226 : vector<8x32xf32>
    %cst_67 = arith.constant 1.000000e+00 : f32
    %228 = vector.broadcast %cst_67 : f32 to vector<8x32xf32>
    %229 = arith.addf %228, %227 : vector<8x32xf32>
    %230 = arith.divf %228, %229 : vector<8x32xf32>
    %231 = vector.extract_strided_slice %218 {offsets = [0, 64], sizes = [8, 32], strides = [1, 1]} : vector<8x128xf32> to vector<8x32xf32>
    %232 = math.tanh %231 : vector<8x32xf32>
    %233 = vector.extract_strided_slice %218 {offsets = [0, 96], sizes = [8, 32], strides = [1, 1]} : vector<8x128xf32> to vector<8x32xf32>
    %234 = arith.negf %233 : vector<8x32xf32>
    %235 = math.exp %234 : vector<8x32xf32>
    %cst_68 = arith.constant 1.000000e+00 : f32
    %236 = vector.broadcast %cst_68 : f32 to vector<8x32xf32>
    %237 = arith.addf %236, %235 : vector<8x32xf32>
    %238 = arith.divf %236, %237 : vector<8x32xf32>
    %239 = arith.mulf %230, %207 : vector<8x32xf32>
    %240 = arith.mulf %224, %232 : vector<8x32xf32>
    %241 = arith.addf %239, %240 : vector<8x32xf32>
    %242 = math.tanh %241 : vector<8x32xf32>
    %243 = arith.mulf %238, %242 : vector<8x32xf32>
    %244 = arith.index_cast %213 : i32 to index
    %c0_69 = arith.constant 0 : index
    %245 = vector.load %arg16[%244, %c0_69] : memref<64x32xf32, #tpu.memory_space<vmem>>, vector<8x32xf32>
    tpu.vector_store %arg16[%244, %c0_69], %243 {strides = array<i32>} : memref<64x32xf32, #tpu.memory_space<vmem>>, vector<8x32xf32>,
    %c7_i32 = arith.constant 7 : i32
    %c8_i32_70 = arith.constant 8 : i32
    %246 = arith.muli %c7_i32, %c8_i32_70 : i32
    %247 = tpu.assume_multiple %246, 8 : i32
    %248 = arith.index_cast %247 : i32 to index
    %c0_71 = arith.constant 0 : index
    %249 = vector.load %arg18[%248, %c0_71] : memref<64x512xf32, #tpu.memory_space<vmem>>, vector<8x128xf32>
    %c0_72 = arith.constant 0 : index
    %c0_73 = arith.constant 0 : index
    %250 = vector.load %arg2[%c0_72, %c0_73] : memref<32x128xf32, #tpu.memory_space<vmem>>, vector<32x128xf32>
    %cst_74 = arith.constant dense<0.000000e+00> : vector<8x128xf32>
    %251 = tpu.matmul %243, %250, %cst_74 {dimension_numbers = #tpu.dot_dimension_numbers<[1], [0], [0], [1], [0, 0, 1, 1], [], []>} : vector<8x32xf32>, vector<32x128xf32>, vector<8x128xf32> -> vector<8x128xf32>
    %252 = arith.addf %249, %251 : vector<8x128xf32>
    %253 = vector.extract_strided_slice %252 {offsets = [0, 0], sizes = [8, 32], strides = [1, 1]} : vector<8x128xf32> to vector<8x32xf32>
    %254 = arith.negf %253 : vector<8x32xf32>
    %255 = math.exp %254 : vector<8x32xf32>
    %cst_75 = arith.constant 1.000000e+00 : f32
    %256 = vector.broadcast %cst_75 : f32 to vector<8x32xf32>
    %257 = arith.addf %256, %255 : vector<8x32xf32>
    %258 = arith.divf %256, %257 : vector<8x32xf32>
    %259 = vector.extract_strided_slice %252 {offsets = [0, 32], sizes = [8, 32], strides = [1, 1]} : vector<8x128xf32> to vector<8x32xf32>
    %260 = arith.negf %259 : vector<8x32xf32>
    %261 = math.exp %260 : vector<8x32xf32>
    %cst_76 = arith.constant 1.000000e+00 : f32
    %262 = vector.broadcast %cst_76 : f32 to vector<8x32xf32>
    %263 = arith.addf %262, %261 : vector<8x32xf32>
    %264 = arith.divf %262, %263 : vector<8x32xf32>
    %265 = vector.extract_strided_slice %252 {offsets = [0, 64], sizes = [8, 32], strides = [1, 1]} : vector<8x128xf32> to vector<8x32xf32>
    %266 = math.tanh %265 : vector<8x32xf32>
    %267 = vector.extract_strided_slice %252 {offsets = [0, 96], sizes = [8, 32], strides = [1, 1]} : vector<8x128xf32> to vector<8x32xf32>
    %268 = arith.negf %267 : vector<8x32xf32>
    %269 = math.exp %268 : vector<8x32xf32>
    %cst_77 = arith.constant 1.000000e+00 : f32
    %270 = vector.broadcast %cst_77 : f32 to vector<8x32xf32>
    %271 = arith.addf %270, %269 : vector<8x32xf32>
    %272 = arith.divf %270, %271 : vector<8x32xf32>
    %273 = arith.mulf %264, %241 : vector<8x32xf32>
    %274 = arith.mulf %258, %266 : vector<8x32xf32>
    %275 = arith.addf %273, %274 : vector<8x32xf32>
    %276 = math.tanh %275 : vector<8x32xf32>
    %277 = arith.mulf %272, %276 : vector<8x32xf32>
    %278 = arith.index_cast %247 : i32 to index
    %c0_78 = arith.constant 0 : index
    %279 = vector.load %arg16[%278, %c0_78] : memref<64x32xf32, #tpu.memory_space<vmem>>, vector<8x32xf32>
    tpu.vector_store %arg16[%278, %c0_78], %277 {strides = array<i32>} : memref<64x32xf32, #tpu.memory_space<vmem>>, vector<8x32xf32>,
    %c8_i32_79 = arith.constant 8 : i32
    %c0_80 = arith.constant 0 : index
    %c0_81 = arith.constant 0 : index
    %280 = vector.load %arg16[%c0_80, %c0_81] : memref<64x32xf32, #tpu.memory_space<vmem>>, vector<64x32xf32>
    %cst_82 = arith.constant dense<0.000000e+00> : vector<64xf32>
    %281 = vector.multi_reduction <add>, %280, %cst_82 [1] : vector<64x32xf32> to vector<64xf32>
    %282 = vector.shape_cast %281 : vector<64xf32> to vector<64x1xf32>
    %cst_83 = arith.constant 3.200000e+01 : f32
    %283 = vector.broadcast %cst_83 : f32 to vector<64x1xf32>
    %284 = arith.divf %282, %283 : vector<64x1xf32>
    %285 = vector.broadcast %284 : vector<64x1xf32> to vector<64x32xf32>
    %286 = arith.subf %280, %285 : vector<64x32xf32>
    %287 = arith.mulf %286, %286 : vector<64x32xf32>
    %cst_84 = arith.constant dense<0.000000e+00> : vector<64xf32>
    %288 = vector.multi_reduction <add>, %287, %cst_84 [1] : vector<64x32xf32> to vector<64xf32>
    %289 = vector.shape_cast %288 : vector<64xf32> to vector<64x1xf32>
    %cst_85 = arith.constant 3.200000e+01 : f32
    %290 = vector.broadcast %cst_85 : f32 to vector<64x1xf32>
    %291 = arith.divf %289, %290 : vector<64x1xf32>
    %292 = vector.broadcast %284 : vector<64x1xf32> to vector<64x32xf32>
    %293 = arith.subf %280, %292 : vector<64x32xf32>
    %cst_86 = arith.constant 9.99999974E-6 : f32
    %294 = vector.broadcast %cst_86 : f32 to vector<64x1xf32>
    %295 = arith.addf %291, %294 : vector<64x1xf32>
    %296 = math.rsqrt %295 : vector<64x1xf32>
    %297 = vector.broadcast %296 : vector<64x1xf32> to vector<64x32xf32>
    %298 = arith.mulf %293, %297 : vector<64x32xf32>
    %c0_87 = arith.constant 0 : index
    %c0_88 = arith.constant 0 : index
    %299 = vector.load %arg4[%c0_87, %c0_88] : memref<1x32xf32, #tpu.memory_space<vmem>>, vector<1x32xf32>
    %300 = vector.broadcast %299 : vector<1x32xf32> to vector<64x32xf32>
    %301 = arith.mulf %298, %300 : vector<64x32xf32>
    %c0_89 = arith.constant 0 : index
    %c0_90 = arith.constant 0 : index
    %302 = vector.load %arg5[%c0_89, %c0_90] : memref<1x32xf32, #tpu.memory_space<vmem>>, vector<1x32xf32>
    %303 = vector.broadcast %302 : vector<1x32xf32> to vector<64x32xf32>
    %304 = arith.addf %301, %303 : vector<64x32xf32>
    %c0_91 = arith.constant 0 : index
    %c0_92 = arith.constant 0 : index
    %305 = vector.load %arg16[%c0_91, %c0_92] : memref<64x32xf32, #tpu.memory_space<vmem>>, vector<64x32xf32>
    tpu.vector_store %arg16[%c0_91, %c0_92], %304 {strides = array<i32>} : memref<64x32xf32, #tpu.memory_space<vmem>>, vector<64x32xf32>,
    %c0_93 = arith.constant 0 : index
    %c0_94 = arith.constant 0 : index
    %306 = vector.load %arg16[%c0_93, %c0_94] : memref<64x32xf32, #tpu.memory_space<vmem>>, vector<64x32xf32>
    %c0_95 = arith.constant 0 : index
    %c0_96 = arith.constant 0 : index
    %307 = vector.load %arg6[%c0_95, %c0_96] : memref<32x128xf32, #tpu.memory_space<vmem>>, vector<32x128xf32>
    %cst_97 = arith.constant dense<0.000000e+00> : vector<64x128xf32>
    %308 = tpu.matmul %306, %307, %cst_97 {dimension_numbers = #tpu.dot_dimension_numbers<[1], [0], [0], [1], [0, 0, 1, 1], [], []>} : vector<64x32xf32>, vector<32x128xf32>, vector<64x128xf32> -> vector<64x128xf32>
    %c0_98 = arith.constant 0 : index
    %c0_99 = arith.constant 0 : index
    %309 = vector.load %arg8[%c0_98, %c0_99] : memref<1x128xf32, #tpu.memory_space<vmem>>, vector<1x128xf32>
    %310 = vector.broadcast %309 : vector<1x128xf32> to vector<64x128xf32>
    %311 = arith.addf %308, %310 : vector<64x128xf32>
    %c0_100 = arith.constant 0 : index
    %c0_101 = arith.constant 0 : index
    %312 = vector.load %arg18[%c0_100, %c0_101] : memref<64x512xf32, #tpu.memory_space<vmem>>, vector<64x128xf32>
    tpu.vector_store %arg18[%c0_100, %c0_101], %311 {strides = array<i32>} : memref<64x512xf32, #tpu.memory_space<vmem>>, vector<64x128xf32>,
    %cst_102 = arith.constant 0.000000e+00 : f32
    %313 = vector.broadcast %cst_102 : f32 to vector<8x32xf32>
    %c0_i32_103 = arith.constant 0 : i32
    %c8_i32_104 = arith.constant 8 : i32
    %314 = arith.muli %c0_i32_103, %c8_i32_104 : i32
    %315 = tpu.assume_multiple %314, 8 : i32
    %316 = arith.index_cast %315 : i32 to index
    %c0_105 = arith.constant 0 : index
    %317 = vector.load %arg18[%316, %c0_105] : memref<64x512xf32, #tpu.memory_space<vmem>>, vector<8x128xf32>
    %c0_106 = arith.constant 0 : index
    %c0_107 = arith.constant 0 : index
    %318 = vector.load %arg7[%c0_106, %c0_107] : memref<32x128xf32, #tpu.memory_space<vmem>>, vector<32x128xf32>
    %cst_108 = arith.constant dense<0.000000e+00> : vector<8x128xf32>
    %319 = tpu.matmul %313, %318, %cst_108 {dimension_numbers = #tpu.dot_dimension_numbers<[1], [0], [0], [1], [0, 0, 1, 1], [], []>} : vector<8x32xf32>, vector<32x128xf32>, vector<8x128xf32> -> vector<8x128xf32>
    %320 = arith.addf %317, %319 : vector<8x128xf32>
    %321 = vector.extract_strided_slice %320 {offsets = [0, 0], sizes = [8, 32], strides = [1, 1]} : vector<8x128xf32> to vector<8x32xf32>
    %322 = arith.negf %321 : vector<8x32xf32>
    %323 = math.exp %322 : vector<8x32xf32>
    %cst_109 = arith.constant 1.000000e+00 : f32
    %324 = vector.broadcast %cst_109 : f32 to vector<8x32xf32>
    %325 = arith.addf %324, %323 : vector<8x32xf32>
    %326 = arith.divf %324, %325 : vector<8x32xf32>
    %327 = vector.extract_strided_slice %320 {offsets = [0, 32], sizes = [8, 32], strides = [1, 1]} : vector<8x128xf32> to vector<8x32xf32>
    %328 = arith.negf %327 : vector<8x32xf32>
    %329 = math.exp %328 : vector<8x32xf32>
    %cst_110 = arith.constant 1.000000e+00 : f32
    %330 = vector.broadcast %cst_110 : f32 to vector<8x32xf32>
    %331 = arith.addf %330, %329 : vector<8x32xf32>
    %332 = arith.divf %330, %331 : vector<8x32xf32>
    %333 = vector.extract_strided_slice %320 {offsets = [0, 64], sizes = [8, 32], strides = [1, 1]} : vector<8x128xf32> to vector<8x32xf32>
    %334 = math.tanh %333 : vector<8x32xf32>
    %335 = vector.extract_strided_slice %320 {offsets = [0, 96], sizes = [8, 32], strides = [1, 1]} : vector<8x128xf32> to vector<8x32xf32>
    %336 = arith.negf %335 : vector<8x32xf32>
    %337 = math.exp %336 : vector<8x32xf32>
    %cst_111 = arith.constant 1.000000e+00 : f32
    %338 = vector.broadcast %cst_111 : f32 to vector<8x32xf32>
    %339 = arith.addf %338, %337 : vector<8x32xf32>
    %340 = arith.divf %338, %339 : vector<8x32xf32>
    %341 = arith.mulf %332, %313 : vector<8x32xf32>
    %342 = arith.mulf %326, %334 : vector<8x32xf32>
    %343 = arith.addf %341, %342 : vector<8x32xf32>
    %344 = math.tanh %343 : vector<8x32xf32>
    %345 = arith.mulf %340, %344 : vector<8x32xf32>
    %346 = arith.index_cast %315 : i32 to index
    %c0_112 = arith.constant 0 : index
    %347 = vector.load %arg17[%346, %c0_112] : memref<64x32xf32, #tpu.memory_space<vmem>>, vector<8x32xf32>
    tpu.vector_store %arg17[%346, %c0_112], %345 {strides = array<i32>} : memref<64x32xf32, #tpu.memory_space<vmem>>, vector<8x32xf32>,
    %c1_i32_113 = arith.constant 1 : i32
    %c8_i32_114 = arith.constant 8 : i32
    %348 = arith.muli %c1_i32_113, %c8_i32_114 : i32
    %349 = tpu.assume_multiple %348, 8 : i32
    %350 = arith.index_cast %349 : i32 to index
    %c0_115 = arith.constant 0 : index
    %351 = vector.load %arg18[%350, %c0_115] : memref<64x512xf32, #tpu.memory_space<vmem>>, vector<8x128xf32>
    %c0_116 = arith.constant 0 : index
    %c0_117 = arith.constant 0 : index
    %352 = vector.load %arg7[%c0_116, %c0_117] : memref<32x128xf32, #tpu.memory_space<vmem>>, vector<32x128xf32>
    %cst_118 = arith.constant dense<0.000000e+00> : vector<8x128xf32>
    %353 = tpu.matmul %345, %352, %cst_118 {dimension_numbers = #tpu.dot_dimension_numbers<[1], [0], [0], [1], [0, 0, 1, 1], [], []>} : vector<8x32xf32>, vector<32x128xf32>, vector<8x128xf32> -> vector<8x128xf32>
    %354 = arith.addf %351, %353 : vector<8x128xf32>
    %355 = vector.extract_strided_slice %354 {offsets = [0, 0], sizes = [8, 32], strides = [1, 1]} : vector<8x128xf32> to vector<8x32xf32>
    %356 = arith.negf %355 : vector<8x32xf32>
    %357 = math.exp %356 : vector<8x32xf32>
    %cst_119 = arith.constant 1.000000e+00 : f32
    %358 = vector.broadcast %cst_119 : f32 to vector<8x32xf32>
    %359 = arith.addf %358, %357 : vector<8x32xf32>
    %360 = arith.divf %358, %359 : vector<8x32xf32>
    %361 = vector.extract_strided_slice %354 {offsets = [0, 32], sizes = [8, 32], strides = [1, 1]} : vector<8x128xf32> to vector<8x32xf32>
    %362 = arith.negf %361 : vector<8x32xf32>
    %363 = math.exp %362 : vector<8x32xf32>
    %cst_120 = arith.constant 1.000000e+00 : f32
    %364 = vector.broadcast %cst_120 : f32 to vector<8x32xf32>
    %365 = arith.addf %364, %363 : vector<8x32xf32>
    %366 = arith.divf %364, %365 : vector<8x32xf32>
    %367 = vector.extract_strided_slice %354 {offsets = [0, 64], sizes = [8, 32], strides = [1, 1]} : vector<8x128xf32> to vector<8x32xf32>
    %368 = math.tanh %367 : vector<8x32xf32>
    %369 = vector.extract_strided_slice %354 {offsets = [0, 96], sizes = [8, 32], strides = [1, 1]} : vector<8x128xf32> to vector<8x32xf32>
    %370 = arith.negf %369 : vector<8x32xf32>
    %371 = math.exp %370 : vector<8x32xf32>
    %cst_121 = arith.constant 1.000000e+00 : f32
    %372 = vector.broadcast %cst_121 : f32 to vector<8x32xf32>
    %373 = arith.addf %372, %371 : vector<8x32xf32>
    %374 = arith.divf %372, %373 : vector<8x32xf32>
    %375 = arith.mulf %366, %343 : vector<8x32xf32>
    %376 = arith.mulf %360, %368 : vector<8x32xf32>
    %377 = arith.addf %375, %376 : vector<8x32xf32>
    %378 = math.tanh %377 : vector<8x32xf32>
    %379 = arith.mulf %374, %378 : vector<8x32xf32>
    %380 = arith.index_cast %349 : i32 to index
    %c0_122 = arith.constant 0 : index
    %381 = vector.load %arg17[%380, %c0_122] : memref<64x32xf32, #tpu.memory_space<vmem>>, vector<8x32xf32>
    tpu.vector_store %arg17[%380, %c0_122], %379 {strides = array<i32>} : memref<64x32xf32, #tpu.memory_space<vmem>>, vector<8x32xf32>,
    %c2_i32_123 = arith.constant 2 : i32
    %c8_i32_124 = arith.constant 8 : i32
    %382 = arith.muli %c2_i32_123, %c8_i32_124 : i32
    %383 = tpu.assume_multiple %382, 8 : i32
    %384 = arith.index_cast %383 : i32 to index
    %c0_125 = arith.constant 0 : index
    %385 = vector.load %arg18[%384, %c0_125] : memref<64x512xf32, #tpu.memory_space<vmem>>, vector<8x128xf32>
    %c0_126 = arith.constant 0 : index
    %c0_127 = arith.constant 0 : index
    %386 = vector.load %arg7[%c0_126, %c0_127] : memref<32x128xf32, #tpu.memory_space<vmem>>, vector<32x128xf32>
    %cst_128 = arith.constant dense<0.000000e+00> : vector<8x128xf32>
    %387 = tpu.matmul %379, %386, %cst_128 {dimension_numbers = #tpu.dot_dimension_numbers<[1], [0], [0], [1], [0, 0, 1, 1], [], []>} : vector<8x32xf32>, vector<32x128xf32>, vector<8x128xf32> -> vector<8x128xf32>
    %388 = arith.addf %385, %387 : vector<8x128xf32>
    %389 = vector.extract_strided_slice %388 {offsets = [0, 0], sizes = [8, 32], strides = [1, 1]} : vector<8x128xf32> to vector<8x32xf32>
    %390 = arith.negf %389 : vector<8x32xf32>
    %391 = math.exp %390 : vector<8x32xf32>
    %cst_129 = arith.constant 1.000000e+00 : f32
    %392 = vector.broadcast %cst_129 : f32 to vector<8x32xf32>
    %393 = arith.addf %392, %391 : vector<8x32xf32>
    %394 = arith.divf %392, %393 : vector<8x32xf32>
    %395 = vector.extract_strided_slice %388 {offsets = [0, 32], sizes = [8, 32], strides = [1, 1]} : vector<8x128xf32> to vector<8x32xf32>
    %396 = arith.negf %395 : vector<8x32xf32>
    %397 = math.exp %396 : vector<8x32xf32>
    %cst_130 = arith.constant 1.000000e+00 : f32
    %398 = vector.broadcast %cst_130 : f32 to vector<8x32xf32>
    %399 = arith.addf %398, %397 : vector<8x32xf32>
    %400 = arith.divf %398, %399 : vector<8x32xf32>
    %401 = vector.extract_strided_slice %388 {offsets = [0, 64], sizes = [8, 32], strides = [1, 1]} : vector<8x128xf32> to vector<8x32xf32>
    %402 = math.tanh %401 : vector<8x32xf32>
    %403 = vector.extract_strided_slice %388 {offsets = [0, 96], sizes = [8, 32], strides = [1, 1]} : vector<8x128xf32> to vector<8x32xf32>
    %404 = arith.negf %403 : vector<8x32xf32>
    %405 = math.exp %404 : vector<8x32xf32>
    %cst_131 = arith.constant 1.000000e+00 : f32
    %406 = vector.broadcast %cst_131 : f32 to vector<8x32xf32>
    %407 = arith.addf %406, %405 : vector<8x32xf32>
    %408 = arith.divf %406, %407 : vector<8x32xf32>
    %409 = arith.mulf %400, %377 : vector<8x32xf32>
    %410 = arith.mulf %394, %402 : vector<8x32xf32>
    %411 = arith.addf %409, %410 : vector<8x32xf32>
    %412 = math.tanh %411 : vector<8x32xf32>
    %413 = arith.mulf %408, %412 : vector<8x32xf32>
    %414 = arith.index_cast %383 : i32 to index
    %c0_132 = arith.constant 0 : index
    %415 = vector.load %arg17[%414, %c0_132] : memref<64x32xf32, #tpu.memory_space<vmem>>, vector<8x32xf32>
    tpu.vector_store %arg17[%414, %c0_132], %413 {strides = array<i32>} : memref<64x32xf32, #tpu.memory_space<vmem>>, vector<8x32xf32>,
    %c3_i32_133 = arith.constant 3 : i32
    %c8_i32_134 = arith.constant 8 : i32
    %416 = arith.muli %c3_i32_133, %c8_i32_134 : i32
    %417 = tpu.assume_multiple %416, 8 : i32
    %418 = arith.index_cast %417 : i32 to index
    %c0_135 = arith.constant 0 : index
    %419 = vector.load %arg18[%418, %c0_135] : memref<64x512xf32, #tpu.memory_space<vmem>>, vector<8x128xf32>
    %c0_136 = arith.constant 0 : index
    %c0_137 = arith.constant 0 : index
    %420 = vector.load %arg7[%c0_136, %c0_137] : memref<32x128xf32, #tpu.memory_space<vmem>>, vector<32x128xf32>
    %cst_138 = arith.constant dense<0.000000e+00> : vector<8x128xf32>
    %421 = tpu.matmul %413, %420, %cst_138 {dimension_numbers = #tpu.dot_dimension_numbers<[1], [0], [0], [1], [0, 0, 1, 1], [], []>} : vector<8x32xf32>, vector<32x128xf32>, vector<8x128xf32> -> vector<8x128xf32>
    %422 = arith.addf %419, %421 : vector<8x128xf32>
    %423 = vector.extract_strided_slice %422 {offsets = [0, 0], sizes = [8, 32], strides = [1, 1]} : vector<8x128xf32> to vector<8x32xf32>
    %424 = arith.negf %423 : vector<8x32xf32>
    %425 = math.exp %424 : vector<8x32xf32>
    %cst_139 = arith.constant 1.000000e+00 : f32
    %426 = vector.broadcast %cst_139 : f32 to vector<8x32xf32>
    %427 = arith.addf %426, %425 : vector<8x32xf32>
    %428 = arith.divf %426, %427 : vector<8x32xf32>
    %429 = vector.extract_strided_slice %422 {offsets = [0, 32], sizes = [8, 32], strides = [1, 1]} : vector<8x128xf32> to vector<8x32xf32>
    %430 = arith.negf %429 : vector<8x32xf32>
    %431 = math.exp %430 : vector<8x32xf32>
    %cst_140 = arith.constant 1.000000e+00 : f32
    %432 = vector.broadcast %cst_140 : f32 to vector<8x32xf32>
    %433 = arith.addf %432, %431 : vector<8x32xf32>
    %434 = arith.divf %432, %433 : vector<8x32xf32>
    %435 = vector.extract_strided_slice %422 {offsets = [0, 64], sizes = [8, 32], strides = [1, 1]} : vector<8x128xf32> to vector<8x32xf32>
    %436 = math.tanh %435 : vector<8x32xf32>
    %437 = vector.extract_strided_slice %422 {offsets = [0, 96], sizes = [8, 32], strides = [1, 1]} : vector<8x128xf32> to vector<8x32xf32>
    %438 = arith.negf %437 : vector<8x32xf32>
    %439 = math.exp %438 : vector<8x32xf32>
    %cst_141 = arith.constant 1.000000e+00 : f32
    %440 = vector.broadcast %cst_141 : f32 to vector<8x32xf32>
    %441 = arith.addf %440, %439 : vector<8x32xf32>
    %442 = arith.divf %440, %441 : vector<8x32xf32>
    %443 = arith.mulf %434, %411 : vector<8x32xf32>
    %444 = arith.mulf %428, %436 : vector<8x32xf32>
    %445 = arith.addf %443, %444 : vector<8x32xf32>
    %446 = math.tanh %445 : vector<8x32xf32>
    %447 = arith.mulf %442, %446 : vector<8x32xf32>
    %448 = arith.index_cast %417 : i32 to index
    %c0_142 = arith.constant 0 : index
    %449 = vector.load %arg17[%448, %c0_142] : memref<64x32xf32, #tpu.memory_space<vmem>>, vector<8x32xf32>
    tpu.vector_store %arg17[%448, %c0_142], %447 {strides = array<i32>} : memref<64x32xf32, #tpu.memory_space<vmem>>, vector<8x32xf32>,
    %c4_i32_143 = arith.constant 4 : i32
    %c8_i32_144 = arith.constant 8 : i32
    %450 = arith.muli %c4_i32_143, %c8_i32_144 : i32
    %451 = tpu.assume_multiple %450, 8 : i32
    %452 = arith.index_cast %451 : i32 to index
    %c0_145 = arith.constant 0 : index
    %453 = vector.load %arg18[%452, %c0_145] : memref<64x512xf32, #tpu.memory_space<vmem>>, vector<8x128xf32>
    %c0_146 = arith.constant 0 : index
    %c0_147 = arith.constant 0 : index
    %454 = vector.load %arg7[%c0_146, %c0_147] : memref<32x128xf32, #tpu.memory_space<vmem>>, vector<32x128xf32>
    %cst_148 = arith.constant dense<0.000000e+00> : vector<8x128xf32>
    %455 = tpu.matmul %447, %454, %cst_148 {dimension_numbers = #tpu.dot_dimension_numbers<[1], [0], [0], [1], [0, 0, 1, 1], [], []>} : vector<8x32xf32>, vector<32x128xf32>, vector<8x128xf32> -> vector<8x128xf32>
    %456 = arith.addf %453, %455 : vector<8x128xf32>
    %457 = vector.extract_strided_slice %456 {offsets = [0, 0], sizes = [8, 32], strides = [1, 1]} : vector<8x128xf32> to vector<8x32xf32>
    %458 = arith.negf %457 : vector<8x32xf32>
    %459 = math.exp %458 : vector<8x32xf32>
    %cst_149 = arith.constant 1.000000e+00 : f32
    %460 = vector.broadcast %cst_149 : f32 to vector<8x32xf32>
    %461 = arith.addf %460, %459 : vector<8x32xf32>
    %462 = arith.divf %460, %461 : vector<8x32xf32>
    %463 = vector.extract_strided_slice %456 {offsets = [0, 32], sizes = [8, 32], strides = [1, 1]} : vector<8x128xf32> to vector<8x32xf32>
    %464 = arith.negf %463 : vector<8x32xf32>
    %465 = math.exp %464 : vector<8x32xf32>
    %cst_150 = arith.constant 1.000000e+00 : f32
    %466 = vector.broadcast %cst_150 : f32 to vector<8x32xf32>
    %467 = arith.addf %466, %465 : vector<8x32xf32>
    %468 = arith.divf %466, %467 : vector<8x32xf32>
    %469 = vector.extract_strided_slice %456 {offsets = [0, 64], sizes = [8, 32], strides = [1, 1]} : vector<8x128xf32> to vector<8x32xf32>
    %470 = math.tanh %469 : vector<8x32xf32>
    %471 = vector.extract_strided_slice %456 {offsets = [0, 96], sizes = [8, 32], strides = [1, 1]} : vector<8x128xf32> to vector<8x32xf32>
    %472 = arith.negf %471 : vector<8x32xf32>
    %473 = math.exp %472 : vector<8x32xf32>
    %cst_151 = arith.constant 1.000000e+00 : f32
    %474 = vector.broadcast %cst_151 : f32 to vector<8x32xf32>
    %475 = arith.addf %474, %473 : vector<8x32xf32>
    %476 = arith.divf %474, %475 : vector<8x32xf32>
    %477 = arith.mulf %468, %445 : vector<8x32xf32>
    %478 = arith.mulf %462, %470 : vector<8x32xf32>
    %479 = arith.addf %477, %478 : vector<8x32xf32>
    %480 = math.tanh %479 : vector<8x32xf32>
    %481 = arith.mulf %476, %480 : vector<8x32xf32>
    %482 = arith.index_cast %451 : i32 to index
    %c0_152 = arith.constant 0 : index
    %483 = vector.load %arg17[%482, %c0_152] : memref<64x32xf32, #tpu.memory_space<vmem>>, vector<8x32xf32>
    tpu.vector_store %arg17[%482, %c0_152], %481 {strides = array<i32>} : memref<64x32xf32, #tpu.memory_space<vmem>>, vector<8x32xf32>,
    %c5_i32_153 = arith.constant 5 : i32
    %c8_i32_154 = arith.constant 8 : i32
    %484 = arith.muli %c5_i32_153, %c8_i32_154 : i32
    %485 = tpu.assume_multiple %484, 8 : i32
    %486 = arith.index_cast %485 : i32 to index
    %c0_155 = arith.constant 0 : index
    %487 = vector.load %arg18[%486, %c0_155] : memref<64x512xf32, #tpu.memory_space<vmem>>, vector<8x128xf32>
    %c0_156 = arith.constant 0 : index
    %c0_157 = arith.constant 0 : index
    %488 = vector.load %arg7[%c0_156, %c0_157] : memref<32x128xf32, #tpu.memory_space<vmem>>, vector<32x128xf32>
    %cst_158 = arith.constant dense<0.000000e+00> : vector<8x128xf32>
    %489 = tpu.matmul %481, %488, %cst_158 {dimension_numbers = #tpu.dot_dimension_numbers<[1], [0], [0], [1], [0, 0, 1, 1], [], []>} : vector<8x32xf32>, vector<32x128xf32>, vector<8x128xf32> -> vector<8x128xf32>
    %490 = arith.addf %487, %489 : vector<8x128xf32>
    %491 = vector.extract_strided_slice %490 {offsets = [0, 0], sizes = [8, 32], strides = [1, 1]} : vector<8x128xf32> to vector<8x32xf32>
    %492 = arith.negf %491 : vector<8x32xf32>
    %493 = math.exp %492 : vector<8x32xf32>
    %cst_159 = arith.constant 1.000000e+00 : f32
    %494 = vector.broadcast %cst_159 : f32 to vector<8x32xf32>
    %495 = arith.addf %494, %493 : vector<8x32xf32>
    %496 = arith.divf %494, %495 : vector<8x32xf32>
    %497 = vector.extract_strided_slice %490 {offsets = [0, 32], sizes = [8, 32], strides = [1, 1]} : vector<8x128xf32> to vector<8x32xf32>
    %498 = arith.negf %497 : vector<8x32xf32>
    %499 = math.exp %498 : vector<8x32xf32>
    %cst_160 = arith.constant 1.000000e+00 : f32
    %500 = vector.broadcast %cst_160 : f32 to vector<8x32xf32>
    %501 = arith.addf %500, %499 : vector<8x32xf32>
    %502 = arith.divf %500, %501 : vector<8x32xf32>
    %503 = vector.extract_strided_slice %490 {offsets = [0, 64], sizes = [8, 32], strides = [1, 1]} : vector<8x128xf32> to vector<8x32xf32>
    %504 = math.tanh %503 : vector<8x32xf32>
    %505 = vector.extract_strided_slice %490 {offsets = [0, 96], sizes = [8, 32], strides = [1, 1]} : vector<8x128xf32> to vector<8x32xf32>
    %506 = arith.negf %505 : vector<8x32xf32>
    %507 = math.exp %506 : vector<8x32xf32>
    %cst_161 = arith.constant 1.000000e+00 : f32
    %508 = vector.broadcast %cst_161 : f32 to vector<8x32xf32>
    %509 = arith.addf %508, %507 : vector<8x32xf32>
    %510 = arith.divf %508, %509 : vector<8x32xf32>
    %511 = arith.mulf %502, %479 : vector<8x32xf32>
    %512 = arith.mulf %496, %504 : vector<8x32xf32>
    %513 = arith.addf %511, %512 : vector<8x32xf32>
    %514 = math.tanh %513 : vector<8x32xf32>
    %515 = arith.mulf %510, %514 : vector<8x32xf32>
    %516 = arith.index_cast %485 : i32 to index
    %c0_162 = arith.constant 0 : index
    %517 = vector.load %arg17[%516, %c0_162] : memref<64x32xf32, #tpu.memory_space<vmem>>, vector<8x32xf32>
    tpu.vector_store %arg17[%516, %c0_162], %515 {strides = array<i32>} : memref<64x32xf32, #tpu.memory_space<vmem>>, vector<8x32xf32>,
    %c6_i32_163 = arith.constant 6 : i32
    %c8_i32_164 = arith.constant 8 : i32
    %518 = arith.muli %c6_i32_163, %c8_i32_164 : i32
    %519 = tpu.assume_multiple %518, 8 : i32
    %520 = arith.index_cast %519 : i32 to index
    %c0_165 = arith.constant 0 : index
    %521 = vector.load %arg18[%520, %c0_165] : memref<64x512xf32, #tpu.memory_space<vmem>>, vector<8x128xf32>
    %c0_166 = arith.constant 0 : index
    %c0_167 = arith.constant 0 : index
    %522 = vector.load %arg7[%c0_166, %c0_167] : memref<32x128xf32, #tpu.memory_space<vmem>>, vector<32x128xf32>
    %cst_168 = arith.constant dense<0.000000e+00> : vector<8x128xf32>
    %523 = tpu.matmul %515, %522, %cst_168 {dimension_numbers = #tpu.dot_dimension_numbers<[1], [0], [0], [1], [0, 0, 1, 1], [], []>} : vector<8x32xf32>, vector<32x128xf32>, vector<8x128xf32> -> vector<8x128xf32>
    %524 = arith.addf %521, %523 : vector<8x128xf32>
    %525 = vector.extract_strided_slice %524 {offsets = [0, 0], sizes = [8, 32], strides = [1, 1]} : vector<8x128xf32> to vector<8x32xf32>
    %526 = arith.negf %525 : vector<8x32xf32>
    %527 = math.exp %526 : vector<8x32xf32>
    %cst_169 = arith.constant 1.000000e+00 : f32
    %528 = vector.broadcast %cst_169 : f32 to vector<8x32xf32>
    %529 = arith.addf %528, %527 : vector<8x32xf32>
    %530 = arith.divf %528, %529 : vector<8x32xf32>
    %531 = vector.extract_strided_slice %524 {offsets = [0, 32], sizes = [8, 32], strides = [1, 1]} : vector<8x128xf32> to vector<8x32xf32>
    %532 = arith.negf %531 : vector<8x32xf32>
    %533 = math.exp %532 : vector<8x32xf32>
    %cst_170 = arith.constant 1.000000e+00 : f32
    %534 = vector.broadcast %cst_170 : f32 to vector<8x32xf32>
    %535 = arith.addf %534, %533 : vector<8x32xf32>
    %536 = arith.divf %534, %535 : vector<8x32xf32>
    %537 = vector.extract_strided_slice %524 {offsets = [0, 64], sizes = [8, 32], strides = [1, 1]} : vector<8x128xf32> to vector<8x32xf32>
    %538 = math.tanh %537 : vector<8x32xf32>
    %539 = vector.extract_strided_slice %524 {offsets = [0, 96], sizes = [8, 32], strides = [1, 1]} : vector<8x128xf32> to vector<8x32xf32>
    %540 = arith.negf %539 : vector<8x32xf32>
    %541 = math.exp %540 : vector<8x32xf32>
    %cst_171 = arith.constant 1.000000e+00 : f32
    %542 = vector.broadcast %cst_171 : f32 to vector<8x32xf32>
    %543 = arith.addf %542, %541 : vector<8x32xf32>
    %544 = arith.divf %542, %543 : vector<8x32xf32>
    %545 = arith.mulf %536, %513 : vector<8x32xf32>
    %546 = arith.mulf %530, %538 : vector<8x32xf32>
    %547 = arith.addf %545, %546 : vector<8x32xf32>
    %548 = math.tanh %547 : vector<8x32xf32>
    %549 = arith.mulf %544, %548 : vector<8x32xf32>
    %550 = arith.index_cast %519 : i32 to index
    %c0_172 = arith.constant 0 : index
    %551 = vector.load %arg17[%550, %c0_172] : memref<64x32xf32, #tpu.memory_space<vmem>>, vector<8x32xf32>
    tpu.vector_store %arg17[%550, %c0_172], %549 {strides = array<i32>} : memref<64x32xf32, #tpu.memory_space<vmem>>, vector<8x32xf32>,
    %c7_i32_173 = arith.constant 7 : i32
    %c8_i32_174 = arith.constant 8 : i32
    %552 = arith.muli %c7_i32_173, %c8_i32_174 : i32
    %553 = tpu.assume_multiple %552, 8 : i32
    %554 = arith.index_cast %553 : i32 to index
    %c0_175 = arith.constant 0 : index
    %555 = vector.load %arg18[%554, %c0_175] : memref<64x512xf32, #tpu.memory_space<vmem>>, vector<8x128xf32>
    %c0_176 = arith.constant 0 : index
    %c0_177 = arith.constant 0 : index
    %556 = vector.load %arg7[%c0_176, %c0_177] : memref<32x128xf32, #tpu.memory_space<vmem>>, vector<32x128xf32>
    %cst_178 = arith.constant dense<0.000000e+00> : vector<8x128xf32>
    %557 = tpu.matmul %549, %556, %cst_178 {dimension_numbers = #tpu.dot_dimension_numbers<[1], [0], [0], [1], [0, 0, 1, 1], [], []>} : vector<8x32xf32>, vector<32x128xf32>, vector<8x128xf32> -> vector<8x128xf32>
    %558 = arith.addf %555, %557 : vector<8x128xf32>
    %559 = vector.extract_strided_slice %558 {offsets = [0, 0], sizes = [8, 32], strides = [1, 1]} : vector<8x128xf32> to vector<8x32xf32>
    %560 = arith.negf %559 : vector<8x32xf32>
    %561 = math.exp %560 : vector<8x32xf32>
    %cst_179 = arith.constant 1.000000e+00 : f32
    %562 = vector.broadcast %cst_179 : f32 to vector<8x32xf32>
    %563 = arith.addf %562, %561 : vector<8x32xf32>
    %564 = arith.divf %562, %563 : vector<8x32xf32>
    %565 = vector.extract_strided_slice %558 {offsets = [0, 32], sizes = [8, 32], strides = [1, 1]} : vector<8x128xf32> to vector<8x32xf32>
    %566 = arith.negf %565 : vector<8x32xf32>
    %567 = math.exp %566 : vector<8x32xf32>
    %cst_180 = arith.constant 1.000000e+00 : f32
    %568 = vector.broadcast %cst_180 : f32 to vector<8x32xf32>
    %569 = arith.addf %568, %567 : vector<8x32xf32>
    %570 = arith.divf %568, %569 : vector<8x32xf32>
    %571 = vector.extract_strided_slice %558 {offsets = [0, 64], sizes = [8, 32], strides = [1, 1]} : vector<8x128xf32> to vector<8x32xf32>
    %572 = math.tanh %571 : vector<8x32xf32>
    %573 = vector.extract_strided_slice %558 {offsets = [0, 96], sizes = [8, 32], strides = [1, 1]} : vector<8x128xf32> to vector<8x32xf32>
    %574 = arith.negf %573 : vector<8x32xf32>
    %575 = math.exp %574 : vector<8x32xf32>
    %cst_181 = arith.constant 1.000000e+00 : f32
    %576 = vector.broadcast %cst_181 : f32 to vector<8x32xf32>
    %577 = arith.addf %576, %575 : vector<8x32xf32>
    %578 = arith.divf %576, %577 : vector<8x32xf32>
    %579 = arith.mulf %570, %547 : vector<8x32xf32>
    %580 = arith.mulf %564, %572 : vector<8x32xf32>
    %581 = arith.addf %579, %580 : vector<8x32xf32>
    %582 = math.tanh %581 : vector<8x32xf32>
    %583 = arith.mulf %578, %582 : vector<8x32xf32>
    %584 = arith.index_cast %553 : i32 to index
    %c0_182 = arith.constant 0 : index
    %585 = vector.load %arg17[%584, %c0_182] : memref<64x32xf32, #tpu.memory_space<vmem>>, vector<8x32xf32>
    tpu.vector_store %arg17[%584, %c0_182], %583 {strides = array<i32>} : memref<64x32xf32, #tpu.memory_space<vmem>>, vector<8x32xf32>,
    %c8_i32_183 = arith.constant 8 : i32
    %c0_184 = arith.constant 0 : index
    %c0_185 = arith.constant 0 : index
    %586 = vector.load %arg17[%c0_184, %c0_185] : memref<64x32xf32, #tpu.memory_space<vmem>>, vector<64x32xf32>
    %cst_186 = arith.constant dense<0.000000e+00> : vector<64xf32>
    %587 = vector.multi_reduction <add>, %586, %cst_186 [1] : vector<64x32xf32> to vector<64xf32>
    %588 = vector.shape_cast %587 : vector<64xf32> to vector<64x1xf32>
    %cst_187 = arith.constant 3.200000e+01 : f32
    %589 = vector.broadcast %cst_187 : f32 to vector<64x1xf32>
    %590 = arith.divf %588, %589 : vector<64x1xf32>
    %591 = vector.broadcast %590 : vector<64x1xf32> to vector<64x32xf32>
    %592 = arith.subf %586, %591 : vector<64x32xf32>
    %593 = arith.mulf %592, %592 : vector<64x32xf32>
    %cst_188 = arith.constant dense<0.000000e+00> : vector<64xf32>
    %594 = vector.multi_reduction <add>, %593, %cst_188 [1] : vector<64x32xf32> to vector<64xf32>
    %595 = vector.shape_cast %594 : vector<64xf32> to vector<64x1xf32>
    %cst_189 = arith.constant 3.200000e+01 : f32
    %596 = vector.broadcast %cst_189 : f32 to vector<64x1xf32>
    %597 = arith.divf %595, %596 : vector<64x1xf32>
    %598 = vector.broadcast %590 : vector<64x1xf32> to vector<64x32xf32>
    %599 = arith.subf %586, %598 : vector<64x32xf32>
    %cst_190 = arith.constant 9.99999974E-6 : f32
    %600 = vector.broadcast %cst_190 : f32 to vector<64x1xf32>
    %601 = arith.addf %597, %600 : vector<64x1xf32>
    %602 = math.rsqrt %601 : vector<64x1xf32>
    %603 = vector.broadcast %602 : vector<64x1xf32> to vector<64x32xf32>
    %604 = arith.mulf %599, %603 : vector<64x32xf32>
    %c0_191 = arith.constant 0 : index
    %c0_192 = arith.constant 0 : index
    %605 = vector.load %arg9[%c0_191, %c0_192] : memref<1x32xf32, #tpu.memory_space<vmem>>, vector<1x32xf32>
    %606 = vector.broadcast %605 : vector<1x32xf32> to vector<64x32xf32>
    %607 = arith.mulf %604, %606 : vector<64x32xf32>
    %c0_193 = arith.constant 0 : index
    %c0_194 = arith.constant 0 : index
    %608 = vector.load %arg10[%c0_193, %c0_194] : memref<1x32xf32, #tpu.memory_space<vmem>>, vector<1x32xf32>
    %609 = vector.broadcast %608 : vector<1x32xf32> to vector<64x32xf32>
    %610 = arith.addf %607, %609 : vector<64x32xf32>
    %c0_195 = arith.constant 0 : index
    %c0_196 = arith.constant 0 : index
    %611 = vector.load %arg17[%c0_195, %c0_196] : memref<64x32xf32, #tpu.memory_space<vmem>>, vector<64x32xf32>
    tpu.vector_store %arg17[%c0_195, %c0_196], %610 {strides = array<i32>} : memref<64x32xf32, #tpu.memory_space<vmem>>, vector<64x32xf32>,
    %c0_197 = arith.constant 0 : index
    %c0_198 = arith.constant 0 : index
    %612 = vector.load %arg17[%c0_197, %c0_198] : memref<64x32xf32, #tpu.memory_space<vmem>>, vector<64x32xf32>
    %c0_199 = arith.constant 0 : index
    %c0_200 = arith.constant 0 : index
    %613 = vector.load %arg11[%c0_199, %c0_200] : memref<32x512xf32, #tpu.memory_space<vmem>>, vector<32x512xf32>
    %cst_201 = arith.constant dense<0.000000e+00> : vector<64x512xf32>
    %614 = tpu.matmul %612, %613, %cst_201 {dimension_numbers = #tpu.dot_dimension_numbers<[1], [0], [0], [1], [0, 0, 1, 1], [], []>} : vector<64x32xf32>, vector<32x512xf32>, vector<64x512xf32> -> vector<64x512xf32>
    %c0_202 = arith.constant 0 : index
    %c0_203 = arith.constant 0 : index
    %615 = vector.load %arg13[%c0_202, %c0_203] : memref<1x512xf32, #tpu.memory_space<vmem>>, vector<1x512xf32>
    %616 = vector.broadcast %615 : vector<1x512xf32> to vector<64x512xf32>
    %617 = arith.addf %614, %616 : vector<64x512xf32>
    %c0_204 = arith.constant 0 : index
    %c0_205 = arith.constant 0 : index
    %618 = vector.load %arg18[%c0_204, %c0_205] : memref<64x512xf32, #tpu.memory_space<vmem>>, vector<64x512xf32>
    tpu.vector_store %arg18[%c0_204, %c0_205], %617 {strides = array<i32>} : memref<64x512xf32, #tpu.memory_space<vmem>>, vector<64x512xf32>,
    %cst_206 = arith.constant 0.000000e+00 : f32
    %619 = vector.broadcast %cst_206 : f32 to vector<8x128xf32>
    %c0_i32_207 = arith.constant 0 : i32
    %c8_i32_208 = arith.constant 8 : i32
    %620 = arith.muli %c0_i32_207, %c8_i32_208 : i32
    %621 = tpu.assume_multiple %620, 8 : i32
    %622 = arith.index_cast %621 : i32 to index
    %c0_209 = arith.constant 0 : index
    %623 = vector.load %arg18[%622, %c0_209] : memref<64x512xf32, #tpu.memory_space<vmem>>, vector<8x512xf32>
    %c0_210 = arith.constant 0 : index
    %c0_211 = arith.constant 0 : index
    %624 = vector.load %arg12[%c0_210, %c0_211] : memref<128x512xf32, #tpu.memory_space<vmem>>, vector<128x512xf32>
    %cst_212 = arith.constant dense<0.000000e+00> : vector<8x512xf32>
    %625 = tpu.matmul %619, %624, %cst_212 {dimension_numbers = #tpu.dot_dimension_numbers<[1], [0], [0], [1], [0, 0, 1, 1], [], []>} : vector<8x128xf32>, vector<128x512xf32>, vector<8x512xf32> -> vector<8x512xf32>
    %626 = arith.addf %623, %625 : vector<8x512xf32>
    %627 = vector.extract_strided_slice %626 {offsets = [0, 0], sizes = [8, 128], strides = [1, 1]} : vector<8x512xf32> to vector<8x128xf32>
    %628 = arith.negf %627 : vector<8x128xf32>
    %629 = math.exp %628 : vector<8x128xf32>
    %cst_213 = arith.constant 1.000000e+00 : f32
    %630 = vector.broadcast %cst_213 : f32 to vector<8x128xf32>
    %631 = arith.addf %630, %629 : vector<8x128xf32>
    %632 = arith.divf %630, %631 : vector<8x128xf32>
    %633 = vector.extract_strided_slice %626 {offsets = [0, 128], sizes = [8, 128], strides = [1, 1]} : vector<8x512xf32> to vector<8x128xf32>
    %634 = arith.negf %633 : vector<8x128xf32>
    %635 = math.exp %634 : vector<8x128xf32>
    %cst_214 = arith.constant 1.000000e+00 : f32
    %636 = vector.broadcast %cst_214 : f32 to vector<8x128xf32>
    %637 = arith.addf %636, %635 : vector<8x128xf32>
    %638 = arith.divf %636, %637 : vector<8x128xf32>
    %639 = vector.extract_strided_slice %626 {offsets = [0, 256], sizes = [8, 128], strides = [1, 1]} : vector<8x512xf32> to vector<8x128xf32>
    %640 = math.tanh %639 : vector<8x128xf32>
    %641 = vector.extract_strided_slice %626 {offsets = [0, 384], sizes = [8, 128], strides = [1, 1]} : vector<8x512xf32> to vector<8x128xf32>
    %642 = arith.negf %641 : vector<8x128xf32>
    %643 = math.exp %642 : vector<8x128xf32>
    %cst_215 = arith.constant 1.000000e+00 : f32
    %644 = vector.broadcast %cst_215 : f32 to vector<8x128xf32>
    %645 = arith.addf %644, %643 : vector<8x128xf32>
    %646 = arith.divf %644, %645 : vector<8x128xf32>
    %647 = arith.mulf %638, %619 : vector<8x128xf32>
    %648 = arith.mulf %632, %640 : vector<8x128xf32>
    %649 = arith.addf %647, %648 : vector<8x128xf32>
    %650 = math.tanh %649 : vector<8x128xf32>
    %651 = arith.mulf %646, %650 : vector<8x128xf32>
    %652 = arith.index_cast %621 : i32 to index
    %c0_216 = arith.constant 0 : index
    %653 = vector.load %arg14[%652, %c0_216] : memref<64x1xi32, #tpu.memory_space<vmem>>, vector<8x1xi32>
    %c0_i32_217 = arith.constant 0 : i32
    %654 = vector.broadcast %c0_i32_217 : i32 to vector<8x1xi32>
    %655 = arith.cmpi ne, %653, %654 : vector<8x1xi32>
    %cst_218 = arith.constant 0xFF800000 : f32
    %656 = vector.shape_cast %655 : vector<8x1xi1> to vector<8x1xi1>
    %657 = vector.broadcast %656 : vector<8x1xi1> to vector<8x128xi1>
    %658 = vector.broadcast %cst_218 : f32 to vector<8x128xf32>
    %659 = arith.select %657, %651, %658 : vector<8x128xi1>, vector<8x128xf32>
    %660 = arith.index_cast %621 : i32 to index
    %c0_219 = arith.constant 0 : index
    %661 = vector.load %arg15[%660, %c0_219] : memref<64x128xf32, #tpu.memory_space<vmem>>, vector<8x128xf32>
    tpu.vector_store %arg15[%660, %c0_219], %659 {strides = array<i32>} : memref<64x128xf32, #tpu.memory_space<vmem>>, vector<8x128xf32>,
    %c1_i32_220 = arith.constant 1 : i32
    %c8_i32_221 = arith.constant 8 : i32
    %662 = arith.muli %c1_i32_220, %c8_i32_221 : i32
    %663 = tpu.assume_multiple %662, 8 : i32
    %664 = arith.index_cast %663 : i32 to index
    %c0_222 = arith.constant 0 : index
    %665 = vector.load %arg18[%664, %c0_222] : memref<64x512xf32, #tpu.memory_space<vmem>>, vector<8x512xf32>
    %c0_223 = arith.constant 0 : index
    %c0_224 = arith.constant 0 : index
    %666 = vector.load %arg12[%c0_223, %c0_224] : memref<128x512xf32, #tpu.memory_space<vmem>>, vector<128x512xf32>
    %cst_225 = arith.constant dense<0.000000e+00> : vector<8x512xf32>
    %667 = tpu.matmul %651, %666, %cst_225 {dimension_numbers = #tpu.dot_dimension_numbers<[1], [0], [0], [1], [0, 0, 1, 1], [], []>} : vector<8x128xf32>, vector<128x512xf32>, vector<8x512xf32> -> vector<8x512xf32>
    %668 = arith.addf %665, %667 : vector<8x512xf32>
    %669 = vector.extract_strided_slice %668 {offsets = [0, 0], sizes = [8, 128], strides = [1, 1]} : vector<8x512xf32> to vector<8x128xf32>
    %670 = arith.negf %669 : vector<8x128xf32>
    %671 = math.exp %670 : vector<8x128xf32>
    %cst_226 = arith.constant 1.000000e+00 : f32
    %672 = vector.broadcast %cst_226 : f32 to vector<8x128xf32>
    %673 = arith.addf %672, %671 : vector<8x128xf32>
    %674 = arith.divf %672, %673 : vector<8x128xf32>
    %675 = vector.extract_strided_slice %668 {offsets = [0, 128], sizes = [8, 128], strides = [1, 1]} : vector<8x512xf32> to vector<8x128xf32>
    %676 = arith.negf %675 : vector<8x128xf32>
    %677 = math.exp %676 : vector<8x128xf32>
    %cst_227 = arith.constant 1.000000e+00 : f32
    %678 = vector.broadcast %cst_227 : f32 to vector<8x128xf32>
    %679 = arith.addf %678, %677 : vector<8x128xf32>
    %680 = arith.divf %678, %679 : vector<8x128xf32>
    %681 = vector.extract_strided_slice %668 {offsets = [0, 256], sizes = [8, 128], strides = [1, 1]} : vector<8x512xf32> to vector<8x128xf32>
    %682 = math.tanh %681 : vector<8x128xf32>
    %683 = vector.extract_strided_slice %668 {offsets = [0, 384], sizes = [8, 128], strides = [1, 1]} : vector<8x512xf32> to vector<8x128xf32>
    %684 = arith.negf %683 : vector<8x128xf32>
    %685 = math.exp %684 : vector<8x128xf32>
    %cst_228 = arith.constant 1.000000e+00 : f32
    %686 = vector.broadcast %cst_228 : f32 to vector<8x128xf32>
    %687 = arith.addf %686, %685 : vector<8x128xf32>
    %688 = arith.divf %686, %687 : vector<8x128xf32>
    %689 = arith.mulf %680, %649 : vector<8x128xf32>
    %690 = arith.mulf %674, %682 : vector<8x128xf32>
    %691 = arith.addf %689, %690 : vector<8x128xf32>
    %692 = math.tanh %691 : vector<8x128xf32>
    %693 = arith.mulf %688, %692 : vector<8x128xf32>
    %694 = arith.index_cast %663 : i32 to index
    %c0_229 = arith.constant 0 : index
    %695 = vector.load %arg14[%694, %c0_229] : memref<64x1xi32, #tpu.memory_space<vmem>>, vector<8x1xi32>
    %c0_i32_230 = arith.constant 0 : i32
    %696 = vector.broadcast %c0_i32_230 : i32 to vector<8x1xi32>
    %697 = arith.cmpi ne, %695, %696 : vector<8x1xi32>
    %cst_231 = arith.constant 0xFF800000 : f32
    %698 = vector.shape_cast %697 : vector<8x1xi1> to vector<8x1xi1>
    %699 = vector.broadcast %698 : vector<8x1xi1> to vector<8x128xi1>
    %700 = vector.broadcast %cst_231 : f32 to vector<8x128xf32>
    %701 = arith.select %699, %693, %700 : vector<8x128xi1>, vector<8x128xf32>
    %702 = arith.index_cast %663 : i32 to index
    %c0_232 = arith.constant 0 : index
    %703 = vector.load %arg15[%702, %c0_232] : memref<64x128xf32, #tpu.memory_space<vmem>>, vector<8x128xf32>
    tpu.vector_store %arg15[%702, %c0_232], %701 {strides = array<i32>} : memref<64x128xf32, #tpu.memory_space<vmem>>, vector<8x128xf32>,
    %c2_i32_233 = arith.constant 2 : i32
    %c8_i32_234 = arith.constant 8 : i32
    %704 = arith.muli %c2_i32_233, %c8_i32_234 : i32
    %705 = tpu.assume_multiple %704, 8 : i32
    %706 = arith.index_cast %705 : i32 to index
    %c0_235 = arith.constant 0 : index
    %707 = vector.load %arg18[%706, %c0_235] : memref<64x512xf32, #tpu.memory_space<vmem>>, vector<8x512xf32>
    %c0_236 = arith.constant 0 : index
    %c0_237 = arith.constant 0 : index
    %708 = vector.load %arg12[%c0_236, %c0_237] : memref<128x512xf32, #tpu.memory_space<vmem>>, vector<128x512xf32>
    %cst_238 = arith.constant dense<0.000000e+00> : vector<8x512xf32>
    %709 = tpu.matmul %693, %708, %cst_238 {dimension_numbers = #tpu.dot_dimension_numbers<[1], [0], [0], [1], [0, 0, 1, 1], [], []>} : vector<8x128xf32>, vector<128x512xf32>, vector<8x512xf32> -> vector<8x512xf32>
    %710 = arith.addf %707, %709 : vector<8x512xf32>
    %711 = vector.extract_strided_slice %710 {offsets = [0, 0], sizes = [8, 128], strides = [1, 1]} : vector<8x512xf32> to vector<8x128xf32>
    %712 = arith.negf %711 : vector<8x128xf32>
    %713 = math.exp %712 : vector<8x128xf32>
    %cst_239 = arith.constant 1.000000e+00 : f32
    %714 = vector.broadcast %cst_239 : f32 to vector<8x128xf32>
    %715 = arith.addf %714, %713 : vector<8x128xf32>
    %716 = arith.divf %714, %715 : vector<8x128xf32>
    %717 = vector.extract_strided_slice %710 {offsets = [0, 128], sizes = [8, 128], strides = [1, 1]} : vector<8x512xf32> to vector<8x128xf32>
    %718 = arith.negf %717 : vector<8x128xf32>
    %719 = math.exp %718 : vector<8x128xf32>
    %cst_240 = arith.constant 1.000000e+00 : f32
    %720 = vector.broadcast %cst_240 : f32 to vector<8x128xf32>
    %721 = arith.addf %720, %719 : vector<8x128xf32>
    %722 = arith.divf %720, %721 : vector<8x128xf32>
    %723 = vector.extract_strided_slice %710 {offsets = [0, 256], sizes = [8, 128], strides = [1, 1]} : vector<8x512xf32> to vector<8x128xf32>
    %724 = math.tanh %723 : vector<8x128xf32>
    %725 = vector.extract_strided_slice %710 {offsets = [0, 384], sizes = [8, 128], strides = [1, 1]} : vector<8x512xf32> to vector<8x128xf32>
    %726 = arith.negf %725 : vector<8x128xf32>
    %727 = math.exp %726 : vector<8x128xf32>
    %cst_241 = arith.constant 1.000000e+00 : f32
    %728 = vector.broadcast %cst_241 : f32 to vector<8x128xf32>
    %729 = arith.addf %728, %727 : vector<8x128xf32>
    %730 = arith.divf %728, %729 : vector<8x128xf32>
    %731 = arith.mulf %722, %691 : vector<8x128xf32>
    %732 = arith.mulf %716, %724 : vector<8x128xf32>
    %733 = arith.addf %731, %732 : vector<8x128xf32>
    %734 = math.tanh %733 : vector<8x128xf32>
    %735 = arith.mulf %730, %734 : vector<8x128xf32>
    %736 = arith.index_cast %705 : i32 to index
    %c0_242 = arith.constant 0 : index
    %737 = vector.load %arg14[%736, %c0_242] : memref<64x1xi32, #tpu.memory_space<vmem>>, vector<8x1xi32>
    %c0_i32_243 = arith.constant 0 : i32
    %738 = vector.broadcast %c0_i32_243 : i32 to vector<8x1xi32>
    %739 = arith.cmpi ne, %737, %738 : vector<8x1xi32>
    %cst_244 = arith.constant 0xFF800000 : f32
    %740 = vector.shape_cast %739 : vector<8x1xi1> to vector<8x1xi1>
    %741 = vector.broadcast %740 : vector<8x1xi1> to vector<8x128xi1>
    %742 = vector.broadcast %cst_244 : f32 to vector<8x128xf32>
    %743 = arith.select %741, %735, %742 : vector<8x128xi1>, vector<8x128xf32>
    %744 = arith.index_cast %705 : i32 to index
    %c0_245 = arith.constant 0 : index
    %745 = vector.load %arg15[%744, %c0_245] : memref<64x128xf32, #tpu.memory_space<vmem>>, vector<8x128xf32>
    tpu.vector_store %arg15[%744, %c0_245], %743 {strides = array<i32>} : memref<64x128xf32, #tpu.memory_space<vmem>>, vector<8x128xf32>,
    %c3_i32_246 = arith.constant 3 : i32
    %c8_i32_247 = arith.constant 8 : i32
    %746 = arith.muli %c3_i32_246, %c8_i32_247 : i32
    %747 = tpu.assume_multiple %746, 8 : i32
    %748 = arith.index_cast %747 : i32 to index
    %c0_248 = arith.constant 0 : index
    %749 = vector.load %arg18[%748, %c0_248] : memref<64x512xf32, #tpu.memory_space<vmem>>, vector<8x512xf32>
    %c0_249 = arith.constant 0 : index
    %c0_250 = arith.constant 0 : index
    %750 = vector.load %arg12[%c0_249, %c0_250] : memref<128x512xf32, #tpu.memory_space<vmem>>, vector<128x512xf32>
    %cst_251 = arith.constant dense<0.000000e+00> : vector<8x512xf32>
    %751 = tpu.matmul %735, %750, %cst_251 {dimension_numbers = #tpu.dot_dimension_numbers<[1], [0], [0], [1], [0, 0, 1, 1], [], []>} : vector<8x128xf32>, vector<128x512xf32>, vector<8x512xf32> -> vector<8x512xf32>
    %752 = arith.addf %749, %751 : vector<8x512xf32>
    %753 = vector.extract_strided_slice %752 {offsets = [0, 0], sizes = [8, 128], strides = [1, 1]} : vector<8x512xf32> to vector<8x128xf32>
    %754 = arith.negf %753 : vector<8x128xf32>
    %755 = math.exp %754 : vector<8x128xf32>
    %cst_252 = arith.constant 1.000000e+00 : f32
    %756 = vector.broadcast %cst_252 : f32 to vector<8x128xf32>
    %757 = arith.addf %756, %755 : vector<8x128xf32>
    %758 = arith.divf %756, %757 : vector<8x128xf32>
    %759 = vector.extract_strided_slice %752 {offsets = [0, 128], sizes = [8, 128], strides = [1, 1]} : vector<8x512xf32> to vector<8x128xf32>
    %760 = arith.negf %759 : vector<8x128xf32>
    %761 = math.exp %760 : vector<8x128xf32>
    %cst_253 = arith.constant 1.000000e+00 : f32
    %762 = vector.broadcast %cst_253 : f32 to vector<8x128xf32>
    %763 = arith.addf %762, %761 : vector<8x128xf32>
    %764 = arith.divf %762, %763 : vector<8x128xf32>
    %765 = vector.extract_strided_slice %752 {offsets = [0, 256], sizes = [8, 128], strides = [1, 1]} : vector<8x512xf32> to vector<8x128xf32>
    %766 = math.tanh %765 : vector<8x128xf32>
    %767 = vector.extract_strided_slice %752 {offsets = [0, 384], sizes = [8, 128], strides = [1, 1]} : vector<8x512xf32> to vector<8x128xf32>
    %768 = arith.negf %767 : vector<8x128xf32>
    %769 = math.exp %768 : vector<8x128xf32>
    %cst_254 = arith.constant 1.000000e+00 : f32
    %770 = vector.broadcast %cst_254 : f32 to vector<8x128xf32>
    %771 = arith.addf %770, %769 : vector<8x128xf32>
    %772 = arith.divf %770, %771 : vector<8x128xf32>
    %773 = arith.mulf %764, %733 : vector<8x128xf32>
    %774 = arith.mulf %758, %766 : vector<8x128xf32>
    %775 = arith.addf %773, %774 : vector<8x128xf32>
    %776 = math.tanh %775 : vector<8x128xf32>
    %777 = arith.mulf %772, %776 : vector<8x128xf32>
    %778 = arith.index_cast %747 : i32 to index
    %c0_255 = arith.constant 0 : index
    %779 = vector.load %arg14[%778, %c0_255] : memref<64x1xi32, #tpu.memory_space<vmem>>, vector<8x1xi32>
    %c0_i32_256 = arith.constant 0 : i32
    %780 = vector.broadcast %c0_i32_256 : i32 to vector<8x1xi32>
    %781 = arith.cmpi ne, %779, %780 : vector<8x1xi32>
    %cst_257 = arith.constant 0xFF800000 : f32
    %782 = vector.shape_cast %781 : vector<8x1xi1> to vector<8x1xi1>
    %783 = vector.broadcast %782 : vector<8x1xi1> to vector<8x128xi1>
    %784 = vector.broadcast %cst_257 : f32 to vector<8x128xf32>
    %785 = arith.select %783, %777, %784 : vector<8x128xi1>, vector<8x128xf32>
    %786 = arith.index_cast %747 : i32 to index
    %c0_258 = arith.constant 0 : index
    %787 = vector.load %arg15[%786, %c0_258] : memref<64x128xf32, #tpu.memory_space<vmem>>, vector<8x128xf32>
    tpu.vector_store %arg15[%786, %c0_258], %785 {strides = array<i32>} : memref<64x128xf32, #tpu.memory_space<vmem>>, vector<8x128xf32>,
    %c4_i32_259 = arith.constant 4 : i32
    %c8_i32_260 = arith.constant 8 : i32
    %788 = arith.muli %c4_i32_259, %c8_i32_260 : i32
    %789 = tpu.assume_multiple %788, 8 : i32
    %790 = arith.index_cast %789 : i32 to index
    %c0_261 = arith.constant 0 : index
    %791 = vector.load %arg18[%790, %c0_261] : memref<64x512xf32, #tpu.memory_space<vmem>>, vector<8x512xf32>
    %c0_262 = arith.constant 0 : index
    %c0_263 = arith.constant 0 : index
    %792 = vector.load %arg12[%c0_262, %c0_263] : memref<128x512xf32, #tpu.memory_space<vmem>>, vector<128x512xf32>
    %cst_264 = arith.constant dense<0.000000e+00> : vector<8x512xf32>
    %793 = tpu.matmul %777, %792, %cst_264 {dimension_numbers = #tpu.dot_dimension_numbers<[1], [0], [0], [1], [0, 0, 1, 1], [], []>} : vector<8x128xf32>, vector<128x512xf32>, vector<8x512xf32> -> vector<8x512xf32>
    %794 = arith.addf %791, %793 : vector<8x512xf32>
    %795 = vector.extract_strided_slice %794 {offsets = [0, 0], sizes = [8, 128], strides = [1, 1]} : vector<8x512xf32> to vector<8x128xf32>
    %796 = arith.negf %795 : vector<8x128xf32>
    %797 = math.exp %796 : vector<8x128xf32>
    %cst_265 = arith.constant 1.000000e+00 : f32
    %798 = vector.broadcast %cst_265 : f32 to vector<8x128xf32>
    %799 = arith.addf %798, %797 : vector<8x128xf32>
    %800 = arith.divf %798, %799 : vector<8x128xf32>
    %801 = vector.extract_strided_slice %794 {offsets = [0, 128], sizes = [8, 128], strides = [1, 1]} : vector<8x512xf32> to vector<8x128xf32>
    %802 = arith.negf %801 : vector<8x128xf32>
    %803 = math.exp %802 : vector<8x128xf32>
    %cst_266 = arith.constant 1.000000e+00 : f32
    %804 = vector.broadcast %cst_266 : f32 to vector<8x128xf32>
    %805 = arith.addf %804, %803 : vector<8x128xf32>
    %806 = arith.divf %804, %805 : vector<8x128xf32>
    %807 = vector.extract_strided_slice %794 {offsets = [0, 256], sizes = [8, 128], strides = [1, 1]} : vector<8x512xf32> to vector<8x128xf32>
    %808 = math.tanh %807 : vector<8x128xf32>
    %809 = vector.extract_strided_slice %794 {offsets = [0, 384], sizes = [8, 128], strides = [1, 1]} : vector<8x512xf32> to vector<8x128xf32>
    %810 = arith.negf %809 : vector<8x128xf32>
    %811 = math.exp %810 : vector<8x128xf32>
    %cst_267 = arith.constant 1.000000e+00 : f32
    %812 = vector.broadcast %cst_267 : f32 to vector<8x128xf32>
    %813 = arith.addf %812, %811 : vector<8x128xf32>
    %814 = arith.divf %812, %813 : vector<8x128xf32>
    %815 = arith.mulf %806, %775 : vector<8x128xf32>
    %816 = arith.mulf %800, %808 : vector<8x128xf32>
    %817 = arith.addf %815, %816 : vector<8x128xf32>
    %818 = math.tanh %817 : vector<8x128xf32>
    %819 = arith.mulf %814, %818 : vector<8x128xf32>
    %820 = arith.index_cast %789 : i32 to index
    %c0_268 = arith.constant 0 : index
    %821 = vector.load %arg14[%820, %c0_268] : memref<64x1xi32, #tpu.memory_space<vmem>>, vector<8x1xi32>
    %c0_i32_269 = arith.constant 0 : i32
    %822 = vector.broadcast %c0_i32_269 : i32 to vector<8x1xi32>
    %823 = arith.cmpi ne, %821, %822 : vector<8x1xi32>
    %cst_270 = arith.constant 0xFF800000 : f32
    %824 = vector.shape_cast %823 : vector<8x1xi1> to vector<8x1xi1>
    %825 = vector.broadcast %824 : vector<8x1xi1> to vector<8x128xi1>
    %826 = vector.broadcast %cst_270 : f32 to vector<8x128xf32>
    %827 = arith.select %825, %819, %826 : vector<8x128xi1>, vector<8x128xf32>
    %828 = arith.index_cast %789 : i32 to index
    %c0_271 = arith.constant 0 : index
    %829 = vector.load %arg15[%828, %c0_271] : memref<64x128xf32, #tpu.memory_space<vmem>>, vector<8x128xf32>
    tpu.vector_store %arg15[%828, %c0_271], %827 {strides = array<i32>} : memref<64x128xf32, #tpu.memory_space<vmem>>, vector<8x128xf32>,
    %c5_i32_272 = arith.constant 5 : i32
    %c8_i32_273 = arith.constant 8 : i32
    %830 = arith.muli %c5_i32_272, %c8_i32_273 : i32
    %831 = tpu.assume_multiple %830, 8 : i32
    %832 = arith.index_cast %831 : i32 to index
    %c0_274 = arith.constant 0 : index
    %833 = vector.load %arg18[%832, %c0_274] : memref<64x512xf32, #tpu.memory_space<vmem>>, vector<8x512xf32>
    %c0_275 = arith.constant 0 : index
    %c0_276 = arith.constant 0 : index
    %834 = vector.load %arg12[%c0_275, %c0_276] : memref<128x512xf32, #tpu.memory_space<vmem>>, vector<128x512xf32>
    %cst_277 = arith.constant dense<0.000000e+00> : vector<8x512xf32>
    %835 = tpu.matmul %819, %834, %cst_277 {dimension_numbers = #tpu.dot_dimension_numbers<[1], [0], [0], [1], [0, 0, 1, 1], [], []>} : vector<8x128xf32>, vector<128x512xf32>, vector<8x512xf32> -> vector<8x512xf32>
    %836 = arith.addf %833, %835 : vector<8x512xf32>
    %837 = vector.extract_strided_slice %836 {offsets = [0, 0], sizes = [8, 128], strides = [1, 1]} : vector<8x512xf32> to vector<8x128xf32>
    %838 = arith.negf %837 : vector<8x128xf32>
    %839 = math.exp %838 : vector<8x128xf32>
    %cst_278 = arith.constant 1.000000e+00 : f32
    %840 = vector.broadcast %cst_278 : f32 to vector<8x128xf32>
    %841 = arith.addf %840, %839 : vector<8x128xf32>
    %842 = arith.divf %840, %841 : vector<8x128xf32>
    %843 = vector.extract_strided_slice %836 {offsets = [0, 128], sizes = [8, 128], strides = [1, 1]} : vector<8x512xf32> to vector<8x128xf32>
    %844 = arith.negf %843 : vector<8x128xf32>
    %845 = math.exp %844 : vector<8x128xf32>
    %cst_279 = arith.constant 1.000000e+00 : f32
    %846 = vector.broadcast %cst_279 : f32 to vector<8x128xf32>
    %847 = arith.addf %846, %845 : vector<8x128xf32>
    %848 = arith.divf %846, %847 : vector<8x128xf32>
    %849 = vector.extract_strided_slice %836 {offsets = [0, 256], sizes = [8, 128], strides = [1, 1]} : vector<8x512xf32> to vector<8x128xf32>
    %850 = math.tanh %849 : vector<8x128xf32>
    %851 = vector.extract_strided_slice %836 {offsets = [0, 384], sizes = [8, 128], strides = [1, 1]} : vector<8x512xf32> to vector<8x128xf32>
    %852 = arith.negf %851 : vector<8x128xf32>
    %853 = math.exp %852 : vector<8x128xf32>
    %cst_280 = arith.constant 1.000000e+00 : f32
    %854 = vector.broadcast %cst_280 : f32 to vector<8x128xf32>
    %855 = arith.addf %854, %853 : vector<8x128xf32>
    %856 = arith.divf %854, %855 : vector<8x128xf32>
    %857 = arith.mulf %848, %817 : vector<8x128xf32>
    %858 = arith.mulf %842, %850 : vector<8x128xf32>
    %859 = arith.addf %857, %858 : vector<8x128xf32>
    %860 = math.tanh %859 : vector<8x128xf32>
    %861 = arith.mulf %856, %860 : vector<8x128xf32>
    %862 = arith.index_cast %831 : i32 to index
    %c0_281 = arith.constant 0 : index
    %863 = vector.load %arg14[%862, %c0_281] : memref<64x1xi32, #tpu.memory_space<vmem>>, vector<8x1xi32>
    %c0_i32_282 = arith.constant 0 : i32
    %864 = vector.broadcast %c0_i32_282 : i32 to vector<8x1xi32>
    %865 = arith.cmpi ne, %863, %864 : vector<8x1xi32>
    %cst_283 = arith.constant 0xFF800000 : f32
    %866 = vector.shape_cast %865 : vector<8x1xi1> to vector<8x1xi1>
    %867 = vector.broadcast %866 : vector<8x1xi1> to vector<8x128xi1>
    %868 = vector.broadcast %cst_283 : f32 to vector<8x128xf32>
    %869 = arith.select %867, %861, %868 : vector<8x128xi1>, vector<8x128xf32>
    %870 = arith.index_cast %831 : i32 to index
    %c0_284 = arith.constant 0 : index
    %871 = vector.load %arg15[%870, %c0_284] : memref<64x128xf32, #tpu.memory_space<vmem>>, vector<8x128xf32>
    tpu.vector_store %arg15[%870, %c0_284], %869 {strides = array<i32>} : memref<64x128xf32, #tpu.memory_space<vmem>>, vector<8x128xf32>,
    %c6_i32_285 = arith.constant 6 : i32
    %c8_i32_286 = arith.constant 8 : i32
    %872 = arith.muli %c6_i32_285, %c8_i32_286 : i32
    %873 = tpu.assume_multiple %872, 8 : i32
    %874 = arith.index_cast %873 : i32 to index
    %c0_287 = arith.constant 0 : index
    %875 = vector.load %arg18[%874, %c0_287] : memref<64x512xf32, #tpu.memory_space<vmem>>, vector<8x512xf32>
    %c0_288 = arith.constant 0 : index
    %c0_289 = arith.constant 0 : index
    %876 = vector.load %arg12[%c0_288, %c0_289] : memref<128x512xf32, #tpu.memory_space<vmem>>, vector<128x512xf32>
    %cst_290 = arith.constant dense<0.000000e+00> : vector<8x512xf32>
    %877 = tpu.matmul %861, %876, %cst_290 {dimension_numbers = #tpu.dot_dimension_numbers<[1], [0], [0], [1], [0, 0, 1, 1], [], []>} : vector<8x128xf32>, vector<128x512xf32>, vector<8x512xf32> -> vector<8x512xf32>
    %878 = arith.addf %875, %877 : vector<8x512xf32>
    %879 = vector.extract_strided_slice %878 {offsets = [0, 0], sizes = [8, 128], strides = [1, 1]} : vector<8x512xf32> to vector<8x128xf32>
    %880 = arith.negf %879 : vector<8x128xf32>
    %881 = math.exp %880 : vector<8x128xf32>
    %cst_291 = arith.constant 1.000000e+00 : f32
    %882 = vector.broadcast %cst_291 : f32 to vector<8x128xf32>
    %883 = arith.addf %882, %881 : vector<8x128xf32>
    %884 = arith.divf %882, %883 : vector<8x128xf32>
    %885 = vector.extract_strided_slice %878 {offsets = [0, 128], sizes = [8, 128], strides = [1, 1]} : vector<8x512xf32> to vector<8x128xf32>
    %886 = arith.negf %885 : vector<8x128xf32>
    %887 = math.exp %886 : vector<8x128xf32>
    %cst_292 = arith.constant 1.000000e+00 : f32
    %888 = vector.broadcast %cst_292 : f32 to vector<8x128xf32>
    %889 = arith.addf %888, %887 : vector<8x128xf32>
    %890 = arith.divf %888, %889 : vector<8x128xf32>
    %891 = vector.extract_strided_slice %878 {offsets = [0, 256], sizes = [8, 128], strides = [1, 1]} : vector<8x512xf32> to vector<8x128xf32>
    %892 = math.tanh %891 : vector<8x128xf32>
    %893 = vector.extract_strided_slice %878 {offsets = [0, 384], sizes = [8, 128], strides = [1, 1]} : vector<8x512xf32> to vector<8x128xf32>
    %894 = arith.negf %893 : vector<8x128xf32>
    %895 = math.exp %894 : vector<8x128xf32>
    %cst_293 = arith.constant 1.000000e+00 : f32
    %896 = vector.broadcast %cst_293 : f32 to vector<8x128xf32>
    %897 = arith.addf %896, %895 : vector<8x128xf32>
    %898 = arith.divf %896, %897 : vector<8x128xf32>
    %899 = arith.mulf %890, %859 : vector<8x128xf32>
    %900 = arith.mulf %884, %892 : vector<8x128xf32>
    %901 = arith.addf %899, %900 : vector<8x128xf32>
    %902 = math.tanh %901 : vector<8x128xf32>
    %903 = arith.mulf %898, %902 : vector<8x128xf32>
    %904 = arith.index_cast %873 : i32 to index
    %c0_294 = arith.constant 0 : index
    %905 = vector.load %arg14[%904, %c0_294] : memref<64x1xi32, #tpu.memory_space<vmem>>, vector<8x1xi32>
    %c0_i32_295 = arith.constant 0 : i32
    %906 = vector.broadcast %c0_i32_295 : i32 to vector<8x1xi32>
    %907 = arith.cmpi ne, %905, %906 : vector<8x1xi32>
    %cst_296 = arith.constant 0xFF800000 : f32
    %908 = vector.shape_cast %907 : vector<8x1xi1> to vector<8x1xi1>
    %909 = vector.broadcast %908 : vector<8x1xi1> to vector<8x128xi1>
    %910 = vector.broadcast %cst_296 : f32 to vector<8x128xf32>
    %911 = arith.select %909, %903, %910 : vector<8x128xi1>, vector<8x128xf32>
    %912 = arith.index_cast %873 : i32 to index
    %c0_297 = arith.constant 0 : index
    %913 = vector.load %arg15[%912, %c0_297] : memref<64x128xf32, #tpu.memory_space<vmem>>, vector<8x128xf32>
    tpu.vector_store %arg15[%912, %c0_297], %911 {strides = array<i32>} : memref<64x128xf32, #tpu.memory_space<vmem>>, vector<8x128xf32>,
    %c7_i32_298 = arith.constant 7 : i32
    %c8_i32_299 = arith.constant 8 : i32
    %914 = arith.muli %c7_i32_298, %c8_i32_299 : i32
    %915 = tpu.assume_multiple %914, 8 : i32
    %916 = arith.index_cast %915 : i32 to index
    %c0_300 = arith.constant 0 : index
    %917 = vector.load %arg18[%916, %c0_300] : memref<64x512xf32, #tpu.memory_space<vmem>>, vector<8x512xf32>
    %c0_301 = arith.constant 0 : index
    %c0_302 = arith.constant 0 : index
    %918 = vector.load %arg12[%c0_301, %c0_302] : memref<128x512xf32, #tpu.memory_space<vmem>>, vector<128x512xf32>
    %cst_303 = arith.constant dense<0.000000e+00> : vector<8x512xf32>
    %919 = tpu.matmul %903, %918, %cst_303 {dimension_numbers = #tpu.dot_dimension_numbers<[1], [0], [0], [1], [0, 0, 1, 1], [], []>} : vector<8x128xf32>, vector<128x512xf32>, vector<8x512xf32> -> vector<8x512xf32>
    %920 = arith.addf %917, %919 : vector<8x512xf32>
    %921 = vector.extract_strided_slice %920 {offsets = [0, 0], sizes = [8, 128], strides = [1, 1]} : vector<8x512xf32> to vector<8x128xf32>
    %922 = arith.negf %921 : vector<8x128xf32>
    %923 = math.exp %922 : vector<8x128xf32>
    %cst_304 = arith.constant 1.000000e+00 : f32
    %924 = vector.broadcast %cst_304 : f32 to vector<8x128xf32>
    %925 = arith.addf %924, %923 : vector<8x128xf32>
    %926 = arith.divf %924, %925 : vector<8x128xf32>
    %927 = vector.extract_strided_slice %920 {offsets = [0, 128], sizes = [8, 128], strides = [1, 1]} : vector<8x512xf32> to vector<8x128xf32>
    %928 = arith.negf %927 : vector<8x128xf32>
    %929 = math.exp %928 : vector<8x128xf32>
    %cst_305 = arith.constant 1.000000e+00 : f32
    %930 = vector.broadcast %cst_305 : f32 to vector<8x128xf32>
    %931 = arith.addf %930, %929 : vector<8x128xf32>
    %932 = arith.divf %930, %931 : vector<8x128xf32>
    %933 = vector.extract_strided_slice %920 {offsets = [0, 256], sizes = [8, 128], strides = [1, 1]} : vector<8x512xf32> to vector<8x128xf32>
    %934 = math.tanh %933 : vector<8x128xf32>
    %935 = vector.extract_strided_slice %920 {offsets = [0, 384], sizes = [8, 128], strides = [1, 1]} : vector<8x512xf32> to vector<8x128xf32>
    %936 = arith.negf %935 : vector<8x128xf32>
    %937 = math.exp %936 : vector<8x128xf32>
    %cst_306 = arith.constant 1.000000e+00 : f32
    %938 = vector.broadcast %cst_306 : f32 to vector<8x128xf32>
    %939 = arith.addf %938, %937 : vector<8x128xf32>
    %940 = arith.divf %938, %939 : vector<8x128xf32>
    %941 = arith.mulf %932, %901 : vector<8x128xf32>
    %942 = arith.mulf %926, %934 : vector<8x128xf32>
    %943 = arith.addf %941, %942 : vector<8x128xf32>
    %944 = math.tanh %943 : vector<8x128xf32>
    %945 = arith.mulf %940, %944 : vector<8x128xf32>
    %946 = arith.index_cast %915 : i32 to index
    %c0_307 = arith.constant 0 : index
    %947 = vector.load %arg14[%946, %c0_307] : memref<64x1xi32, #tpu.memory_space<vmem>>, vector<8x1xi32>
    %c0_i32_308 = arith.constant 0 : i32
    %948 = vector.broadcast %c0_i32_308 : i32 to vector<8x1xi32>
    %949 = arith.cmpi ne, %947, %948 : vector<8x1xi32>
    %cst_309 = arith.constant 0xFF800000 : f32
    %950 = vector.shape_cast %949 : vector<8x1xi1> to vector<8x1xi1>
    %951 = vector.broadcast %950 : vector<8x1xi1> to vector<8x128xi1>
    %952 = vector.broadcast %cst_309 : f32 to vector<8x128xf32>
    %953 = arith.select %951, %945, %952 : vector<8x128xi1>, vector<8x128xf32>
    %954 = arith.index_cast %915 : i32 to index
    %c0_310 = arith.constant 0 : index
    %955 = vector.load %arg15[%954, %c0_310] : memref<64x128xf32, #tpu.memory_space<vmem>>, vector<8x128xf32>
    tpu.vector_store %arg15[%954, %c0_310], %953 {strides = array<i32>} : memref<64x128xf32, #tpu.memory_space<vmem>>, vector<8x128xf32>,
    %c8_i32_311 = arith.constant 8 : i32
    return
  }
}

</mosaic_0001>

<bundles_post_ra>
// kernel: longitudinal_stacker_forward.1
= control target key start
LH: loop header
LB: loop body
LE: loop exit
PB: predicated region body
PF: predicated region fallthrough
CT: control target
= control target key end

     0   :  { %20 = vsyncpa [#allocation6], 0  ;;  %s6198_s18 = smov [#allocation5]   ;;  %s7411_s0 = inlined_call_operand.vmem [shape: f32[64,16], index: 0, kind: input, shape index: {}]   ;;  %s7412_s1 = inlined_call_operand.vmem [shape: f32[16,128], index: 1, kind: input, shape index: {}]   ;;  %s7413_s2 = inlined_call_operand.vmem [shape: f32[32,128], index: 2, kind: input, shape index: {}]   ;;  %s7414_s3 = inlined_call_operand.vmem [shape: f32[1,128], index: 3, kind: input, shape index: {}]   ;;  %s7415_s4 = inlined_call_operand.vmem [shape: f32[1,32], index: 4, kind: input, shape index: {}]   ;;  %s7416_s5 = inlined_call_operand.vmem [shape: f32[1,32], index: 5, kind: input, shape index: {}]   ;;  %s7417_s6 = inlined_call_operand.vmem [shape: f32[32,128], index: 6, kind: input, shape index: {}]   ;;  %s7418_s7 = inlined_call_operand.vmem [shape: f32[32,128], index: 7, kind: input, shape index: {}]   ;;  %s7419_s8 = inlined_call_operand.vmem [shape: f32[1,128], index: 8, kind: input, shape index: {}]   ;;  %s7420_s9 = inlined_call_operand.vmem [shape: f32[1,32], index: 9, kind: input, shape index: {}]   ;;  %s7421_s10 = inlined_call_operand.vmem [shape: f32[1,32], index: 10, kind: input, shape index: {}]   ;;  %s7422_s11 = inlined_call_operand.vmem [shape: f32[32,512], index: 11, kind: input, shape index: {}]   ;;  %s7423_s12 = inlined_call_operand.hbm [shape: f32[128,512], index: 12, kind: input, shape index: {}]   ;;  %s7424_s13 = inlined_call_operand.vmem [shape: f32[1,512], index: 13, kind: input, shape index: {}]   ;;  %s7425_s14 = inlined_call_operand.vmem [shape: s32[64,1], index: 14, kind: input, shape index: {}]   ;;  %s7426_s15 = inlined_call_operand.vmem [shape: f32[64,128], index: 15, kind: output, shape index: {}]  }
   0x1   :  { %s50_s19 = sshll.u32 %s6198_s18, 4  ;;  %s6174_s22 = scalar_lea.hbm %s7423_s12, 8192  ;;  %s51_s19 = int_to_ptr.vmem [resolvable:$true] %s50_s19 }
   0x2   :  { %p6175_p0 = scmp.ne.s32.totalorder %s7423_s12, %s6174_s22  ;;  %p6178_p1 = scmp.lt.u32.totalorder %s6174_s22, %s7423_s12 }
   0x4   :  { %p6180_p2 = pnand %p6178_p1, %p6175_p0 }
   0x6   :  { %6183 = shalt.err (!%p6180_p2)
}
   0x7   :  { %s6184_s27 = scalar_lea.vmem %s51_s19, 8192  ;;  %p6189_p4 = scmp.lt.s32.totalorder %s51_s19, %s51_s19 }
   0x8   :  { %p6185_p3 = scmp.ne.s32.totalorder %s51_s19, %s6184_s27  ;;  %p6190_p5 = scmp.lt.s32.totalorder %s6184_s27, %s6184_s27 }
   0xa   :  { %p6191_p6 = por %p6190_p5, %p6189_p4 }
   0xc   :  { %p6192_p7 = pnand %p6191_p6, %p6185_p3 }
   0xe   :  { %6195 = shalt.err (!%p6192_p7)
}
   0xf   :  { %s6199_s28 = smov 512   ;;  %s6200_s29 = smov 32  }
  0x10   :  { %56 = dma.hbm_to_vmem [thread:$0]  %s7423_s12, 8192, %s51_s19, [#allocation6], %s6199_s28, %s6199_s28, %s6200_s29  }
  0x11   :  { %6196 = dma.done.wait [#allocation6], 8192  }
  0x12   :  { %6197 = vsyncadd [#allocation6], 4294959104  ;;  %v6201_v0 = vmov 0.0|0.0   ;;  %vm6202_vm0 = vmmov 0   ;;  %v6203_v1 = vmov 0.0   ;;  %vm81_vm1 = vcmask 130048  }
  0x13   :  { %5180 = vmatprep.subr.bf16.mxu1 %v6201_v0  ;;  %4988 = vmatprep.mubr.msk.f32.mxu1 %vm6202_vm0, %v6203_v1  ;;  %v72_v2 = vld [vmem:[%s7412_s1] sm:$0xff]  ;;  %v73_v3 = vld [vmem:[%s7412_s1 + $0x8] sm:$0xff]  ;;  %v225_v9 = vld [vmem:[%s7413_s2 + $0x10] sm:$0xff]  ;;  %s6204_s18 = smov 64   ;;  %vm227_vm2 = vcmask 261120  }
  0x14   :  { %v223_v4 = vld [vmem:[%s7413_s2] sm:$0xff]  ;;  %v5176_v5 = vpack.c.bf16 %v73_v3, %v72_v2  ;;  %v224_v6 = vld [vmem:[%s7413_s2 + $0x8] sm:$0xff]  ;;  %v226_v10 = vld [vmem:[%s7413_s2 + $0x18] sm:$0xff] }
  0x15   :  { %v64_v7 = vld [vmem:[%s7411_s0] sm:$0xff]  ;;  %v6317_v8 = vpack.c.bf16 %v224_v6, %v223_v4  ;;  %v65_v11 = vld [vmem:[%s7411_s0 + $0x8] sm:$0xff]  ;;  %v6330_v12 = vpack.c.bf16 %v226_v10, %v225_v9  ;;  %v66_v48 = vld [vmem:[%s7411_s0 + $0x10] sm:$0xff] }
  0x16   :  { %4968 = vmatprep.mubr.msk.f32.mxu0 %vm81_vm1, %v64_v7  ;;  %5177 = vmatprep.subr.bf16.mxu0 %v5176_v5  ;;  %v6351_v13 = vld [vmem:[%s7414_s3] ss:$0 sm:$0xff]  ;;  %v67_v49 = vld [vmem:[%s7411_s0 + $0x18] sm:$0xff]  ;;  %v69_v51 = vld [vmem:[%s7411_s0 + $0x28] sm:$0xff] }
  0x17   :  { %5182 = vmatpush3.bf16.msra.mxu1 %v6317_v8  ;;  %5179 = vmatpush3.bf16.msra.mxu0 %v5176_v5  ;;  %v68_v50 = vld [vmem:[%s7411_s0 + $0x20] sm:$0xff]  ;;  %v70_v52 = vld [vmem:[%s7411_s0 + $0x30] sm:$0xff]  ;;  %v71_v53 = vld [vmem:[%s7411_s0 + $0x38] sm:$0xff] }
  0x18   :  { %5183 = vmatprep.subr.bf16.mxu1 %v6201_v0  ;;  %5192 = vmatprep.subr.bf16.mxu0 %v6201_v0 }
  0x1a   :  { %4969 = vmatmul.mubr.msk.f32.vlgmr.msra.gmra.mrb[0].mxu0 %vm81_vm1, %v65_v11 }
  0x1b   :  { %5185 = vmatpush3.bf16.msra.mxu1 %v6330_v12  ;;  %5194 = vmatpush3.bf16.msra.mxu0 %v6317_v8 }
  0x1c   :  { %5186 = vmatprep.subr.bf16.mxu1 %v6201_v0  ;;  %5195 = vmatprep.subr.bf16.mxu0 %v6201_v0 }
  0x1d   :  { %4971 = vmatprep.mubr.msk.f32.mxu0 %vm81_vm1, %v66_v48 }
  0x1e   :  { %4989 = vmatmul.mubr.f32.vlgmr.msra.gmra.mrb[0].mxu1 %v6203_v1  ;;  %4972 = vmatmul.mubr.msk.f32.gmra.mrb[2].mxu0 %vm81_vm1, %v67_v49 }
  0x1f   :  { %5188 = vmatpush3.bf16.msra.mxu1 %v6317_v8  ;;  %4999 = vmatprep.mubr.msk.f32.mxu1 %vm6202_vm0, %v6203_v1 }
  0x20   :  { %5189 = vmatprep.subr.bf16.mxu1 %v6201_v0  ;;  %5197 = vmatpush3.bf16.msra.mxu0 %v6330_v12 }
  0x21   :  { %5204 = vmatprep.subr.bf16.mxu0 %v6201_v0  ;;  %4974 = vmatprep.mubr.msk.f32.mxu0 %vm81_vm1, %v68_v50 }
  0x22   :  { %4975 = vmatmul.mubr.msk.f32.gmra.mrb[4].mxu0 %vm81_vm1, %v69_v51 }
  0x23   :  { %5191 = vmatpush3.bf16.msra.mxu1 %v6330_v12  ;;  %4977 = vmatprep.mubr.msk.f32.mxu0 %vm81_vm1, %v70_v52 }
  0x24   :  { %5198 = vmatprep.subr.bf16.mxu1 %v6201_v0 }
  0x26   :  { %4978 = vmatmul.mubr.msk.f32.gmra.mrb[6].mxu0 %vm81_vm1, %v71_v53 }
  0x27   :  { %5010 = vmatprep.mubr.msk.f32.mxu0 %vm6202_vm0, %v6203_v1 }
  0xed   :  { %v4970_v14 = vpop.f32.mrb[0].mxu0 }
  0xee   :  { %v172_v15 = vpop.f32.mrb[1].mxu0  ;;  %v178_v34 = vadd.f32 %v4970_v14, %v6351_v13 }
  0xef   :  { %v173_v16 = vadd.f32 %v6351_v13, %v172_v15 }
  0xf1   :  { %v297_v17 = vpop.f32.mrb[0].mxu1  ;;  %v4973_v57 = vpop.f32.mrb[2].mxu0 }
  0xf2   :  { %v301_v18 = vadd.f32 %v297_v17, %v173_v16  ;;  %v4990_v19 = vpop.f32.mrb[1].mxu1  ;;  %v182_v58 = vpop.f32.mrb[3].mxu0 }
  0xf3   :  { %v183_v2 = vadd.f32 %v6351_v13, %v182_v58 }
  0xf4   :  { %5886 = vtanh.f32 %v301_v18  ;;  %v4765_v21 = vmul.f32 -1.442695, %v301_v18 }
  0xf5   :  { %v6397_v59 = vpop.f32.mrb[4].mxu0 }
  0xf6   :  { %5888 = vpow2.f32 %v4765_v21  ;;  %v6399_v60 = vpop.f32.mrb[5].mxu0 }
  0xf9   :  { %v6401_v61 = vpop.f32.mrb[6].mxu0 }
  0xfa   :  { %v6403_v62 = vpop.f32.mrb[7].mxu0 }
  0xfe   :  { %v5887_v20 = vpop.eup %5886 }
  0xff   :  { %311 = vrot.lane.b32.xlu0 %v5887_v20, %s6204_s18 }
 0x100   :  { %v5889_v22 = vpop.eup %5888 }
 0x101   :  { %v305_v23 = vadd.f32 1.0, %v5889_v22 }
 0x103   :  { %5890 = vrcp.f32 %v305_v23  ;;  %v188_v23 = vadd.f32 %v4973_v57, %v6351_v13 }
 0x10d   :  { %v5891_v24 = vpop.eup %5890 }
 0x10e   :  { %v309_v27 = vmul.f32 0.0, %v5891_v24 }
 0x171   :  { %v312_v25 = vpop.permute.xlu0 %311 }
 0x172   :  { %v314_v26 = vmul.f32 %v5891_v24, %v312_v25 }
 0x174   :  { %316 = vrot.lane.b32.xlu0 %v314_v26, %s6200_s29 }
 0x1e6   :  { %v317_v28 = vpop.permute.xlu0 %316 }
 0x1e7   :  { %v319_v29 = vadd.f32 %v317_v28, %v309_v27 }
 0x1e9   :  { %5892 = vtanh.f32 %v319_v29 }
 0x1f3   :  { %v5893_v30 = vpop.eup %5892 }
 0x1f4   :  { %322 = vrot.lane.b32.xlu1 %v5893_v30, %s6204_s18 }
 0x266   :  { %v323_v31 = vpop.permute.xlu1 %322 }
 0x267   :  { %v325_v32 = vmul.f32 %v5891_v24, %v323_v31 }
 0x269   :  { %327 = vrot.lane.b32.xlu1 %v325_v32, %s6200_s29 }
 0x2db   :  { %v328_v33 = vpop.permute.xlu1 %327 }
 0x2dc   :  { %330 = vst.msk [vmem:[#allocation2] sm:$0xff] %vm227_vm2, %v328_v33  ;;  %5000 = vmatmul.mubr.msk.f32.vlgmr.msra.gmra.mrb[2].mxu1 %vm227_vm2, %v328_v33 }
 0x2dd   :  { %5200 = vmatpush3.bf16.msra.mxu1 %v6317_v8  ;;  %5021 = vmatprep.mubr.msk.f32.mxu1 %vm6202_vm0, %v6203_v1 }
 0x2de   :  { %5201 = vmatprep.subr.bf16.mxu1 %v6201_v0 }
 0x2e1   :  { %5203 = vmatpush3.bf16.msra.mxu1 %v6330_v12 }
 0x2e2   :  { %5210 = vmatprep.subr.bf16.mxu1 %v6201_v0 }
 0x3af   :  { %v407_v35 = vpop.f32.mrb[2].mxu1 }
 0x3b0   :  { %v411_v36 = vadd.f32 %v407_v35, %v178_v34  ;;  %v5001_v37 = vpop.f32.mrb[3].mxu1 }
 0x3b2   :  { %5894 = vtanh.f32 %v411_v36  ;;  %v4767_v39 = vmul.f32 -1.442695, %v411_v36 }
 0x3b4   :  { %5896 = vpow2.f32 %v4767_v39 }
 0x3bc   :  { %v5895_v38 = vpop.eup %5894 }
 0x3bd   :  { %421 = vrot.lane.b32.xlu0 %v5895_v38, %s6204_s18 }
 0x3be   :  { %v5897_v40 = vpop.eup %5896 }
 0x3bf   :  { %v415_v41 = vadd.f32 1.0, %v5897_v40 }
 0x3c1   :  { %5898 = vrcp.f32 %v415_v41  ;;  %v193_v41 = vadd.f32 %v6351_v13, %v6399_v60  ;;  %v198_v60 = vadd.f32 %v6397_v59, %v6351_v13 }
 0x3cb   :  { %v5899_v42 = vpop.eup %5898 }
 0x3cc   :  { %v419_v45 = vmul.f32 %v5899_v42, %v319_v29 }
 0x42f   :  { %v422_v43 = vpop.permute.xlu0 %421 }
 0x430   :  { %v424_v44 = vmul.f32 %v5899_v42, %v422_v43 }
 0x432   :  { %426 = vrot.lane.b32.xlu1 %v424_v44, %s6200_s29 }
 0x4a4   :  { %v427_v46 = vpop.permute.xlu1 %426 }
 0x4a5   :  { %v429_v47 = vadd.f32 %v427_v46, %v419_v45 }
 0x4a7   :  { %5900 = vtanh.f32 %v429_v47 }
 0x4b1   :  { %v5901_v54 = vpop.eup %5900 }
 0x4b2   :  { %432 = vrot.lane.b32.xlu0 %v5901_v54, %s6204_s18 }
 0x524   :  { %v433_v55 = vpop.permute.xlu0 %432 }
 0x525   :  { %v435_v56 = vmul.f32 %v5899_v42, %v433_v55 }
 0x527   :  { %437 = vrot.lane.b32.xlu1 %v435_v56, %s6200_s29 }
 0x599   :  { %v438_v63 = vpop.permute.xlu1 %437 }
 0x59a   :  { %441 = vst.msk [vmem:[#allocation2 + $0x8] sm:$0xff] %vm227_vm2, %v438_v63  ;;  %5011 = vmatmul.mubr.msk.f32.vlgmr.msra.gmra.mrb[8].mxu0 %vm227_vm2, %v438_v63 }
 0x59b   :  { %5206 = vmatpush3.bf16.msra.mxu0 %v6317_v8  ;;  %5032 = vmatprep.mubr.msk.f32.mxu0 %vm6202_vm0, %v6203_v1 }
 0x59c   :  { %5207 = vmatprep.subr.bf16.mxu0 %v6201_v0 }
 0x59f   :  { %5209 = vmatpush3.bf16.msra.mxu0 %v6330_v12 }
 0x5a0   :  { %5216 = vmatprep.subr.bf16.mxu0 %v6201_v0 }
 0x66d   :  { %v518_v3 = vpop.f32.mrb[8].mxu0 }
 0x66e   :  { %v522_v4 = vadd.f32 %v518_v3, %v183_v2  ;;  %v5012_v5 = vpop.f32.mrb[9].mxu0 }
 0x670   :  { %5902 = vtanh.f32 %v522_v4  ;;  %v4769_v7 = vmul.f32 -1.442695, %v522_v4 }
 0x672   :  { %5904 = vpow2.f32 %v4769_v7 }
 0x67a   :  { %v5903_v6 = vpop.eup %5902 }
 0x67b   :  { %532 = vrot.lane.b32.xlu0 %v5903_v6, %s6204_s18 }
 0x67c   :  { %v5905_v9 = vpop.eup %5904 }
 0x67d   :  { %v526_v10 = vadd.f32 1.0, %v5905_v9 }
 0x67f   :  { %5906 = vrcp.f32 %v526_v10 }
 0x689   :  { %v5907_v11 = vpop.eup %5906 }
 0x68a   :  { %v530_v16 = vmul.f32 %v5907_v11, %v429_v47 }
 0x6ed   :  { %v533_v14 = vpop.permute.xlu0 %532 }
 0x6ee   :  { %v535_v15 = vmul.f32 %v5907_v11, %v533_v14 }
 0x6f0   :  { %537 = vrot.lane.b32.xlu1 %v535_v15, %s6200_s29 }
 0x762   :  { %v538_v17 = vpop.permute.xlu1 %537 }
 0x763   :  { %v540_v18 = vadd.f32 %v538_v17, %v530_v16 }
 0x765   :  { %5908 = vtanh.f32 %v540_v18 }
 0x76f   :  { %v5909_v19 = vpop.eup %5908 }
 0x770   :  { %543 = vrot.lane.b32.xlu0 %v5909_v19, %s6204_s18 }
 0x7e2   :  { %v544_v20 = vpop.permute.xlu0 %543 }
 0x7e3   :  { %v546_v21 = vmul.f32 %v5907_v11, %v544_v20 }
 0x7e5   :  { %548 = vrot.lane.b32.xlu1 %v546_v21, %s6200_s29 }
 0x857   :  { %v549_v22 = vpop.permute.xlu1 %548 }
 0x858   :  { %552 = vst.msk [vmem:[#allocation2 + $0x10] sm:$0xff] %vm227_vm2, %v549_v22  ;;  %5022 = vmatmul.mubr.msk.f32.vlgmr.msra.gmra.mrb[4].mxu1 %vm227_vm2, %v549_v22 }
 0x859   :  { %5212 = vmatpush3.bf16.msra.mxu1 %v6317_v8  ;;  %5043 = vmatprep.mubr.msk.f32.mxu1 %vm6202_vm0, %v6203_v1 }
 0x85a   :  { %5213 = vmatprep.subr.bf16.mxu1 %v6201_v0 }
 0x85d   :  { %5215 = vmatpush3.bf16.msra.mxu1 %v6330_v12 }
 0x85e   :  { %5222 = vmatprep.subr.bf16.mxu1 %v6201_v0 }
 0x92b   :  { %v629_v24 = vpop.f32.mrb[4].mxu1 }
 0x92c   :  { %v633_v25 = vadd.f32 %v629_v24, %v188_v23  ;;  %v5023_v26 = vpop.f32.mrb[5].mxu1  ;;  %v1108_v23 = vld [vmem:[#allocation2] sm:$0xff] }
 0x92d   :  { %v1116_v24 = vsel %vm227_vm2, %v1108_v23, 0.0 }
 0x92e   :  { %5910 = vtanh.f32 %v633_v25  ;;  %v4771_v28 = vmul.f32 -1.442695, %v633_v25 }
 0x930   :  { %5912 = vpow2.f32 %v4771_v28 }
 0x938   :  { %v5911_v27 = vpop.eup %5910 }
 0x939   :  { %643 = vrot.lane.b32.xlu0 %v5911_v27, %s6204_s18 }
 0x93a   :  { %v5913_v29 = vpop.eup %5912 }
 0x93b   :  { %v637_v30 = vadd.f32 1.0, %v5913_v29 }
 0x93d   :  { %5914 = vrcp.f32 %v637_v30 }
 0x947   :  { %v5915_v31 = vpop.eup %5914 }
 0x948   :  { %v641_v34 = vmul.f32 %v5915_v31, %v540_v18  ;;  %v203_v18 = vadd.f32 %v6351_v13, %v6403_v62  ;;  %v1109_v62 = vld [vmem:[#allocation2 + $0x8] sm:$0xff] }
 0x9ab   :  { %v644_v32 = vpop.permute.xlu0 %643 }
 0x9ac   :  { %v646_v33 = vmul.f32 %v5915_v31, %v644_v32 }
 0x9ae   :  { %648 = vrot.lane.b32.xlu1 %v646_v33, %s6200_s29 }
 0xa20   :  { %v649_v35 = vpop.permute.xlu1 %648 }
 0xa21   :  { %v651_v36 = vadd.f32 %v649_v35, %v641_v34 }
 0xa23   :  { %5916 = vtanh.f32 %v651_v36 }
 0xa2d   :  { %v5917_v37 = vpop.eup %5916 }
 0xa2e   :  { %654 = vrot.lane.b32.xlu0 %v5917_v37, %s6204_s18 }
 0xaa0   :  { %v655_v38 = vpop.permute.xlu0 %654 }
 0xaa1   :  { %v657_v39 = vmul.f32 %v5915_v31, %v655_v38  ;;  %v1119_v31 = vsel %vm227_vm2, %v1109_v62, 0.0 }
 0xaa3   :  { %659 = vrot.lane.b32.xlu1 %v657_v39, %s6200_s29 }
 0xb15   :  { %v660_v40 = vpop.permute.xlu1 %659 }
 0xb16   :  { %663 = vst.msk [vmem:[#allocation2 + $0x18] sm:$0xff] %vm227_vm2, %v660_v40  ;;  %5033 = vmatmul.mubr.msk.f32.vlgmr.msra.gmra.mrb[10].mxu0 %vm227_vm2, %v660_v40 }
 0xb17   :  { %5218 = vmatpush3.bf16.msra.mxu0 %v6317_v8  ;;  %5054 = vmatprep.mubr.msk.f32.mxu0 %vm6202_vm0, %v6203_v1 }
 0xb18   :  { %5219 = vmatprep.subr.bf16.mxu0 %v6201_v0 }
 0xb1b   :  { %5221 = vmatpush3.bf16.msra.mxu0 %v6330_v12 }
 0xbe9   :  { %v740_v42 = vpop.f32.mrb[10].mxu0 }
 0xbea   :  { %v744_v43 = vadd.f32 %v740_v42, %v193_v41  ;;  %v5034_v44 = vpop.f32.mrb[11].mxu0 }
 0xbec   :  { %5918 = vtanh.f32 %v744_v43  ;;  %v4773_v46 = vmul.f32 -1.442695, %v744_v43 }
 0xbee   :  { %5920 = vpow2.f32 %v4773_v46 }
 0xbf6   :  { %v5919_v45 = vpop.eup %5918 }
 0xbf7   :  { %754 = vrot.lane.b32.xlu0 %v5919_v45, %s6204_s18 }
 0xbf8   :  { %v5921_v47 = vpop.eup %5920 }
 0xbf9   :  { %v748_v48 = vadd.f32 1.0, %v5921_v47 }
 0xbfb   :  { %5922 = vrcp.f32 %v748_v48 }
 0xc05   :  { %v5923_v49 = vpop.eup %5922 }
 0xc06   :  { %v752_v52 = vmul.f32 %v5923_v49, %v651_v36 }
 0xc69   :  { %v755_v50 = vpop.permute.xlu0 %754 }
 0xc6a   :  { %v757_v51 = vmul.f32 %v5923_v49, %v755_v50  ;;  %v1268_v50 = vld [vmem:[%s7417_s6 + $0x8] sm:$0xff] }
 0xc6c   :  { %759 = vrot.lane.b32.xlu1 %v757_v51, %s6200_s29 }
 0xcde   :  { %v760_v53 = vpop.permute.xlu1 %759 }
 0xcdf   :  { %v762_v54 = vadd.f32 %v760_v53, %v752_v52  ;;  %v6481_v53 = vld [vmem:[%s7415_s4] ss:$0 sm:$0xff] }
 0xce1   :  { %5924 = vtanh.f32 %v762_v54 }
 0xceb   :  { %v5925_v55 = vpop.eup %5924 }
 0xcec   :  { %765 = vrot.lane.b32.xlu0 %v5925_v55, %s6204_s18  ;;  %v1269_v55 = vld [vmem:[%s7417_s6 + $0x10] sm:$0xff] }
 0xd5e   :  { %v766_v56 = vpop.permute.xlu0 %765 }
 0xd5f   :  { %v768_v57 = vmul.f32 %v5923_v49, %v766_v56  ;;  %v1267_v49 = vld [vmem:[%s7417_s6] sm:$0xff]  ;;  %v1270_v56 = vld [vmem:[%s7417_s6 + $0x18] sm:$0xff] }
 0xd60   :  { %v5228_v51 = vpack.c.bf16 %v1268_v50, %v1267_v49 }
 0xd61   :  { %770 = vrot.lane.b32.xlu1 %v768_v57, %s6200_s29  ;;  %v6492_v57 = vld [vmem:[%s7416_s5] ss:$0 sm:$0xff] }
 0xd62   :  { %5229 = vmatprep.subr.bf16.mxu0 %v5228_v51 }
 0xdd3   :  { %v771_v58 = vpop.permute.xlu1 %770 }
 0xdd4   :  { %774 = vst.msk [vmem:[#allocation2 + $0x20] sm:$0xff] %vm227_vm2, %v771_v58  ;;  %5044 = vmatmul.mubr.msk.f32.vlgmr.msra.gmra.mrb[6].mxu1 %vm227_vm2, %v771_v58  ;;  %v5232_v58 = vpack.c.bf16 %v1270_v56, %v1269_v55 }
 0xdd5   :  { %5224 = vmatpush3.bf16.msra.mxu1 %v6317_v8  ;;  %5065 = vmatprep.mubr.msk.f32.mxu1 %vm6202_vm0, %v6203_v1 }
 0xdd6   :  { %5225 = vmatprep.subr.bf16.mxu1 %v6201_v0 }
 0xdd9   :  { %5227 = vmatpush3.bf16.msra.mxu1 %v6330_v12 }
 0xdda   :  { %5236 = vmatprep.subr.bf16.mxu1 %v6201_v0 }
 0xea7   :  { %v851_v63 = vpop.f32.mrb[6].mxu1 }
 0xea8   :  { %v855_v2 = vadd.f32 %v851_v63, %v198_v60  ;;  %v5045_v3 = vpop.f32.mrb[7].mxu1 }
 0xeaa   :  { %5926 = vtanh.f32 %v855_v2  ;;  %v4775_v8 = vmul.f32 -1.442695, %v855_v2 }
 0xeac   :  { %5928 = vpow2.f32 %v4775_v8 }
 0xeb4   :  { %v5927_v4 = vpop.eup %5926 }
 0xeb5   :  { %865 = vrot.lane.b32.xlu0 %v5927_v4, %s6204_s18 }
 0xeb6   :  { %v5929_v5 = vpop.eup %5928 }
 0xeb7   :  { %v859_v6 = vadd.f32 1.0, %v5929_v5 }
 0xeb9   :  { %5930 = vrcp.f32 %v859_v6 }
 0xec3   :  { %v5931_v7 = vpop.eup %5930 }
 0xec4   :  { %v863_v10 = vmul.f32 %v5931_v7, %v762_v54 }
 0xf27   :  { %v866_v9 = vpop.permute.xlu0 %865 }
 0xf28   :  { %v868_v12 = vmul.f32 %v5931_v7, %v866_v9 }
 0xf2a   :  { %870 = vrot.lane.b32.xlu1 %v868_v12, %s6200_s29 }
 0xf9c   :  { %v871_v11 = vpop.permute.xlu1 %870 }
 0xf9d   :  { %v873_v59 = vadd.f32 %v871_v11, %v863_v10  ;;  %v1416_v11 = vld [vmem:[%s7418_s7] sm:$0xff] }
 0xf9f   :  { %5932 = vtanh.f32 %v873_v59 }
 0xfa9   :  { %v5933_v14 = vpop.eup %5932 }
 0xfaa   :  { %876 = vrot.lane.b32.xlu0 %v5933_v14, %s6204_s18 }
0x101c   :  { %v877_v15 = vpop.permute.xlu0 %876 }
0x101d   :  { %v879_v16 = vmul.f32 %v5931_v7, %v877_v15 }
0x101f   :  { %881 = vrot.lane.b32.xlu1 %v879_v16, %s6200_s29  ;;  %v1418_v16 = vld [vmem:[%s7418_s7 + $0x10] sm:$0xff] }
0x1091   :  { %v882_v17 = vpop.permute.xlu1 %881 }
0x1092   :  { %885 = vst.msk [vmem:[#allocation2 + $0x28] sm:$0xff] %vm227_vm2, %v882_v17  ;;  %5055 = vmatmul.mubr.msk.f32.vlgmr.msra.gmra.mrb[12].mxu0 %vm227_vm2, %v882_v17  ;;  %v1419_v17 = vld [vmem:[%s7418_s7 + $0x18] sm:$0xff] }
0x1093   :  { %5231 = vmatpush3.bf16.msra.mxu0 %v5228_v51 }
0x1094   :  { %5233 = vmatprep.subr.bf16.mxu0 %v5232_v58 }
0x1097   :  { %5235 = vmatpush3.bf16.msra.mxu0 %v5232_v58  ;;  %v1110_v58 = vld [vmem:[#allocation2 + $0x10] sm:$0xff] }
0x1098   :  { %5248 = vmatprep.subr.bf16.mxu0 %v6201_v0 }
0x1165   :  { %v962_v19 = vpop.f32.mrb[12].mxu0 }
0x1166   :  { %v966_v20 = vadd.f32 %v962_v19, %v203_v18  ;;  %v5056_v21 = vpop.f32.mrb[13].mxu0  ;;  %v6522_v19 = vpack.c.bf16 %v1419_v17, %v1418_v16 }
0x1168   :  { %5934 = vtanh.f32 %v966_v20  ;;  %v4777_v25 = vmul.f32 -1.442695, %v966_v20 }
0x116a   :  { %5936 = vpow2.f32 %v4777_v25 }
0x1172   :  { %v5935_v22 = vpop.eup %5934 }
0x1173   :  { %976 = vrot.lane.b32.xlu0 %v5935_v22, %s6204_s18  ;;  %v208_v22 = vadd.f32 %v6401_v61, %v6351_v13 }
0x1174   :  { %v5937_v26 = vpop.eup %5936 }
0x1175   :  { %v970_v27 = vadd.f32 1.0, %v5937_v26  ;;  %v6546_v26 = vld [vmem:[%s7419_s8] ss:$0 sm:$0xff] }
0x1177   :  { %5938 = vrcp.f32 %v970_v27 }
0x1181   :  { %v5939_v28 = vpop.eup %5938 }
0x1182   :  { %v974_v37 = vmul.f32 %v5939_v28, %v873_v59  ;;  %v1417_v59 = vld [vmem:[%s7418_s7 + $0x8] sm:$0xff] }
0x1183   :  { %v6509_v15 = vpack.c.bf16 %v1417_v59, %v1416_v11 }
0x1192   :  { %1117 = vadd.xlane.f32.xlu0 %v1116_v24 }
0x11e5   :  { %v977_v29 = vpop.permute.xlu0 %976 }
0x11e6   :  { %v979_v30 = vmul.f32 %v5939_v28, %v977_v29 }
0x11e8   :  { %981 = vrot.lane.b32.xlu1 %v979_v30, %s6200_s29 }
0x120c   :  { %1120 = vadd.xlane.f32.xlu1 %v1119_v31 }
0x121f   :  { %v1118_v32 = vpop.xlane.xlu0 %1117 }
0x1220   :  { %v1141_v33 = vmul.f32 0.03125, %v1118_v32 }
0x1222   :  { %v1149_v34 = vsub.f32 %v1108_v23, %v1141_v33 }
0x1224   :  { %v1157_v35 = vmul.f32 %v1149_v34, %v1149_v34 }
0x1226   :  { %v1165_v36 = vsel %vm227_vm2, %v1157_v35, 0.0 }
0x1227   :  { %1166 = vadd.xlane.f32.xlu1 %v1165_v36 }
0x125a   :  { %v982_v38 = vpop.permute.xlu1 %981 }
0x125b   :  { %v6467_v39 = vadd.f32 %v982_v38, %v974_v37 }
0x125d   :  { %5940 = vtanh.f32 %v6467_v39 }
0x1267   :  { %v5941_v40 = vpop.eup %5940 }
0x1268   :  { %987 = vrot.lane.b32.xlu0 %v5941_v40, %s6204_s18 }
0x1299   :  { %v1121_v41 = vpop.xlane.xlu1 %1120 }
0x129a   :  { %v1142_v42 = vmul.f32 0.03125, %v1121_v41 }
0x129c   :  { %v1150_v43 = vsub.f32 %v1109_v62, %v1142_v42 }
0x129e   :  { %v1158_v44 = vmul.f32 %v1150_v43, %v1150_v43 }
0x12a0   :  { %v1168_v45 = vsel %vm227_vm2, %v1158_v44, 0.0 }
0x12a1   :  { %1169 = vadd.xlane.f32.xlu1 %v1168_v45 }
0x12b4   :  { %v1167_v46 = vpop.xlane.xlu1 %1166 }
0x12b5   :  { %v1189_v47 = vmul.f32 0.03125, %v1167_v46 }
0x12b7   :  { %v1197_v48 = vadd.f32 1e-05, %v1189_v47 }
0x12b9   :  { %5942 = vrsqrt.f32 %v1197_v48 }
0x12c3   :  { %v5943_v52 = vpop.eup %5942 }
0x12c4   :  { %v1213_v54 = vmul.f32 %v5943_v52, %v1149_v34 }
0x12c6   :  { %v1228_v60 = vmul.f32 %v6481_v53, %v1213_v54 }
0x12c8   :  { %v1243_v63 = vadd.f32 %v6492_v57, %v1228_v60  ;;  %v1122_v60 = vsel %vm227_vm2, %v1110_v58, 0.0 }
0x12ca   :  { %1251 = vst.msk [vmem:[#allocation2] sm:$0xff] %vm227_vm2, %v1243_v63 }
0x12d1   :  { %v1259_v2 = vld [vmem:[#allocation2] sm:$0xff] }
0x12d2   :  { %5076 = vmatprep.mubr.msk.f32.mxu0 %vm227_vm2, %v1259_v2 }
0x12da   :  { %v988_v3 = vpop.permute.xlu0 %987 }
0x12db   :  { %v990_v4 = vmul.f32 %v5939_v28, %v988_v3 }
0x12dd   :  { %992 = vrot.lane.b32.xlu1 %v990_v4, %s6200_s29 }
0x132e   :  { %v1170_v8 = vpop.xlane.xlu1 %1169 }
0x132f   :  { %v1190_v5 = vmul.f32 0.03125, %v1170_v8 }
0x1331   :  { %v1198_v6 = vadd.f32 1e-05, %v1190_v5  ;;  %v1111_v5 = vld [vmem:[#allocation2 + $0x18] sm:$0xff] }
0x1333   :  { %5944 = vrsqrt.f32 %v1198_v6  ;;  %v1125_v6 = vsel %vm227_vm2, %v1111_v5, 0.0 }
0x133d   :  { %v5945_v7 = vpop.eup %5944 }
0x133e   :  { %v1214_v9 = vmul.f32 %v5945_v7, %v1150_v43  ;;  %v1112_v7 = vld [vmem:[#allocation2 + $0x20] sm:$0xff] }
0x1340   :  { %v1229_v12 = vmul.f32 %v6481_v53, %v1214_v9  ;;  %v1128_v9 = vsel %vm227_vm2, %v1112_v7, 0.0 }
0x1342   :  { %v1244_v10 = vadd.f32 %v6492_v57, %v1229_v12  ;;  %v1113_v12 = vld [vmem:[#allocation2 + $0x28] sm:$0xff] }
0x1344   :  { %1252 = vst.msk [vmem:[#allocation2 + $0x8] sm:$0xff] %vm227_vm2, %v1244_v10  ;;  %v1131_v10 = vsel %vm227_vm2, %v1113_v12, 0.0 }
0x134b   :  { %v1260_v14 = vld [vmem:[#allocation2 + $0x8] sm:$0xff] }
0x134c   :  { %5077 = vmatmul.mubr.msk.f32.vlgmr.msra.gmra.mrb[14].mxu0 %vm227_vm2, %v1260_v14 }
0x134d   :  { %5250 = vmatpush3.bf16.msra.mxu0 %v6509_v15 }
0x134e   :  { %5251 = vmatprep.subr.bf16.mxu0 %v6201_v0 }
0x134f   :  { %v993_v18 = vpop.permute.xlu1 %992 }
0x1350   :  { %996 = vst.msk [vmem:[#allocation2 + $0x30] sm:$0xff] %vm227_vm2, %v993_v18  ;;  %5066 = vmatmul.mubr.msk.f32.vlgmr.msra.gmra.mrb[8].mxu1 %vm227_vm2, %v993_v18 }
0x1351   :  { %5238 = vmatpush3.bf16.msra.mxu1 %v6509_v15  ;;  %5096 = vmatprep.mubr.msk.f32.mxu1 %vm6202_vm0, %v6203_v1 }
0x1352   :  { %5239 = vmatprep.subr.bf16.mxu1 %v6201_v0  ;;  %5253 = vmatpush3.bf16.msra.mxu0 %v6522_v19 }
0x1353   :  { %5260 = vmatprep.subr.bf16.mxu0 %v6201_v0 }
0x1355   :  { %5241 = vmatpush3.bf16.msra.mxu1 %v6522_v19 }
0x1356   :  { %5242 = vmatprep.subr.bf16.mxu1 %v6201_v0 }
0x1357   :  { %v1114_v11 = vld [vmem:[#allocation2 + $0x30] sm:$0xff] }
0x1358   :  { %5097 = vmatmul.mubr.f32.vlgmr.msra.gmra.mrb[10].mxu1 %v6203_v1  ;;  %v1134_v59 = vsel %vm227_vm2, %v1114_v11, 0.0 }
0x1359   :  { %5244 = vmatpush3.bf16.msra.mxu1 %v6509_v15  ;;  %5107 = vmatprep.mubr.msk.f32.mxu1 %vm6202_vm0, %v6203_v1 }
0x135a   :  { %5245 = vmatprep.subr.bf16.mxu1 %v6201_v0 }
0x135d   :  { %5247 = vmatpush3.bf16.msra.mxu1 %v6522_v19 }
0x135e   :  { %5254 = vmatprep.subr.bf16.mxu1 %v6201_v0 }
0x141f   :  { %v6539_v20 = vpop.f32.mrb[14].mxu0 }
0x1420   :  { %v1368_v21 = vpop.f32.mrb[15].mxu0 }
0x1421   :  { %v1369_v27 = vadd.f32 %v6546_v26, %v1368_v21 }
0x1423   :  { %v1073_v23 = vpop.f32.mrb[8].mxu1 }
0x1424   :  { %v1077_v24 = vadd.f32 %v1073_v23, %v208_v22  ;;  %v5067_v25 = vpop.f32.mrb[9].mxu1 }
0x1426   :  { %v4779_v41 = vmul.f32 -1.442695, %v1077_v24 }
0x142b   :  { %v1486_v28 = vpop.f32.mrb[10].mxu1 }
0x142c   :  { %v1490_v29 = vadd.f32 %v1486_v28, %v1369_v27  ;;  %v5098_v30 = vpop.f32.mrb[11].mxu1 }
0x142e   :  { %5946 = vtanh.f32 %v1490_v29  ;;  %v4791_v31 = vmul.f32 -1.442695, %v1490_v29 }
0x1430   :  { %5948 = vpow2.f32 %v4791_v31 }
0x1438   :  { %v5947_v62 = vpop.eup %5946 }
0x1439   :  { %1500 = vrot.lane.b32.xlu0 %v5947_v62, %s6204_s18 }
0x143a   :  { %v5949_v13 = vpop.eup %5948 }
0x143b   :  { %v1494_v61 = vadd.f32 1.0, %v5949_v13 }
0x143d   :  { %5950 = vrcp.f32 %v1494_v61 }
0x1447   :  { %v5951_v32 = vpop.eup %5950 }
0x1448   :  { %v1498_v35 = vmul.f32 0.0, %v5951_v32 }
0x14ab   :  { %v1501_v33 = vpop.permute.xlu0 %1500 }
0x14ac   :  { %v1503_v34 = vmul.f32 %v5951_v32, %v1501_v33 }
0x14ae   :  { %1505 = vrot.lane.b32.xlu0 %v1503_v34, %s6200_s29 }
0x1520   :  { %v1506_v36 = vpop.permute.xlu0 %1505 }
0x1521   :  { %v6551_v37 = vadd.f32 %v1506_v36, %v1498_v35 }
0x1523   :  { %5952 = vtanh.f32 %v6551_v37 }
0x1524   :  { %5954 = vtanh.f32 %v1077_v24 }
0x1525   :  { %5956 = vpow2.f32 %v4779_v41 }
0x152d   :  { %v5953_v38 = vpop.eup %5952 }
0x152e   :  { %1511 = vrot.lane.b32.xlu0 %v5953_v38, %s6204_s18  ;;  %v5955_v40 = vpop.eup %5954 }
0x152f   :  { %v5957_v42 = vpop.eup %5956 }
0x1530   :  { %v1081_v43 = vadd.f32 1.0, %v5957_v42 }
0x1532   :  { %1087 = vrot.lane.b32.xlu0 %v5955_v40, %s6204_s18  ;;  %5958 = vrcp.f32 %v1081_v43 }
0x153c   :  { %v5959_v46 = vpop.eup %5958 }
0x153d   :  { %v1085_v50 = vmul.f32 %v5959_v46, %v6467_v39  ;;  %v1374_v39 = vadd.f32 %v6539_v20, %v6546_v26 }
0x15a0   :  { %v1512_v44 = vpop.permute.xlu0 %1511 }
0x15a1   :  { %v1514_v45 = vmul.f32 %v5951_v32, %v1512_v44 }
0x15a3   :  { %1516 = vrot.lane.b32.xlu1 %v1514_v45, %s6200_s29 }
0x15a4   :  { %v1088_v47 = vpop.permute.xlu0 %1087 }
0x15a5   :  { %v1090_v48 = vmul.f32 %v5959_v46, %v1088_v47 }
0x15a7   :  { %1092 = vrot.lane.b32.xlu1 %v1090_v48, %s6200_s29 }
0x1615   :  { %v1517_v49 = vpop.permute.xlu1 %1516 }
0x1616   :  { %1519 = vst.msk [vmem:[#allocation3] sm:$0xff] %vm227_vm2, %v1517_v49  ;;  %5108 = vmatmul.mubr.msk.f32.vlgmr.msra.gmra.mrb[12].mxu1 %vm227_vm2, %v1517_v49 }
0x1617   :  { %5256 = vmatpush3.bf16.msra.mxu1 %v6509_v15  ;;  %5129 = vmatprep.mubr.msk.f32.mxu1 %vm6202_vm0, %v6203_v1 }
0x1618   :  { %5257 = vmatprep.subr.bf16.mxu1 %v6201_v0 }
0x1619   :  { %v1093_v51 = vpop.permute.xlu1 %1092 }
0x161a   :  { %v1095_v52 = vadd.f32 %v1093_v51, %v1085_v50 }
0x161b   :  { %5259 = vmatpush3.bf16.msra.mxu1 %v6522_v19 }
0x161c   :  { %5960 = vtanh.f32 %v1095_v52  ;;  %5266 = vmatprep.subr.bf16.mxu1 %v6201_v0 }
0x1626   :  { %v5961_v54 = vpop.eup %5960 }
0x1627   :  { %1098 = vrot.lane.b32.xlu0 %v5961_v54, %s6204_s18 }
0x1699   :  { %v1099_v55 = vpop.permute.xlu0 %1098 }
0x169a   :  { %v1101_v56 = vmul.f32 %v5959_v46, %v1099_v55 }
0x169c   :  { %1103 = vrot.lane.b32.xlu1 %v1101_v56, %s6200_s29 }
0x16c0   :  { %1123 = vadd.xlane.f32.xlu1 %v1122_v60 }
0x16e9   :  { %v1593_v63 = vpop.f32.mrb[12].mxu1 }
0x16ea   :  { %v1597_v2 = vadd.f32 %v1593_v63, %v1374_v39  ;;  %v5109_v3 = vpop.f32.mrb[13].mxu1 }
0x16ec   :  { %5962 = vtanh.f32 %v1597_v2  ;;  %v4793_v17 = vmul.f32 -1.442695, %v1597_v2 }
0x16ee   :  { %5964 = vpow2.f32 %v4793_v17 }
0x16f6   :  { %v5963_v4 = vpop.eup %5962 }
0x16f7   :  { %1607 = vrot.lane.b32.xlu0 %v5963_v4, %s6204_s18 }
0x16f8   :  { %v5965_v18 = vpop.eup %5964 }
0x16f9   :  { %v1601_v20 = vadd.f32 1.0, %v5965_v18 }
0x16fb   :  { %5966 = vrcp.f32 %v1601_v20 }
0x1705   :  { %v6579_v21 = vpop.eup %5966 }
0x1706   :  { %v1605_v50 = vmul.f32 %v6579_v21, %v6551_v37 }
0x170e   :  { %v1104_v8 = vpop.permute.xlu1 %1103 }
0x170f   :  { %1107 = vst.msk [vmem:[#allocation2 + $0x38] sm:$0xff] %vm227_vm2, %v1104_v8 }
0x1716   :  { %1126 = vadd.xlane.f32.xlu0 %v1125_v6  ;;  %v1115_v14 = vld [vmem:[#allocation2 + $0x38] sm:$0xff] }
0x1717   :  { %v1137_v16 = vsel %vm227_vm2, %v1115_v14, 0.0 }
0x171a   :  { %1129 = vadd.xlane.f32.xlu0 %v1128_v9 }
0x171e   :  { %1132 = vadd.xlane.f32.xlu0 %v1131_v10 }
0x1722   :  { %1135 = vadd.xlane.f32.xlu0 %v1134_v59 }
0x1726   :  { %1138 = vadd.xlane.f32.xlu0 %v1137_v16 }
0x174d   :  { %v1124_v24 = vpop.xlane.xlu1 %1123 }
0x174e   :  { %v1143_v25 = vmul.f32 0.03125, %v1124_v24 }
0x1750   :  { %v1151_v27 = vsub.f32 %v1110_v58, %v1143_v25 }
0x1752   :  { %v1159_v28 = vmul.f32 %v1151_v27, %v1151_v27 }
0x1754   :  { %v1171_v29 = vsel %vm227_vm2, %v1159_v28, 0.0 }
0x1769   :  { %v1608_v22 = vpop.permute.xlu0 %1607 }
0x176a   :  { %v1610_v23 = vmul.f32 %v6579_v21, %v1608_v22 }
0x176c   :  { %1612 = vrot.lane.b32.xlu1 %v1610_v23, %s6200_s29 }
0x1790   :  { %1172 = vadd.xlane.f32.xlu1 %v1171_v29 }
0x17a3   :  { %v1127_v30 = vpop.xlane.xlu0 %1126 }
0x17a4   :  { %v1144_v55 = vmul.f32 0.03125, %v1127_v30 }
0x17a6   :  { %v1152_v56 = vsub.f32 %v1111_v5, %v1144_v55 }
0x17a7   :  { %v1130_v62 = vpop.xlane.xlu0 %1129 }
0x17a8   :  { %v1145_v31 = vmul.f32 0.03125, %v1130_v62  ;;  %v1160_v58 = vmul.f32 %v1152_v56, %v1152_v56 }
0x17aa   :  { %v1153_v13 = vsub.f32 %v1112_v7, %v1145_v31  ;;  %v1174_v60 = vsel %vm227_vm2, %v1160_v58, 0.0 }
0x17ab   :  { %v1133_v61 = vpop.xlane.xlu0 %1132 }
0x17ac   :  { %v1146_v32 = vmul.f32 0.03125, %v1133_v61  ;;  %v1161_v33 = vmul.f32 %v1153_v13, %v1153_v13 }
0x17ae   :  { %v1154_v34 = vsub.f32 %v1113_v12, %v1146_v32  ;;  %v1177_v35 = vsel %vm227_vm2, %v1161_v33, 0.0 }
0x17af   :  { %1178 = vadd.xlane.f32.xlu1 %v1177_v35  ;;  %v1136_v36 = vpop.xlane.xlu0 %1135 }
0x17b0   :  { %v1147_v38 = vmul.f32 0.03125, %v1136_v36  ;;  %v1162_v40 = vmul.f32 %v1154_v34, %v1154_v34 }
0x17b2   :  { %v1155_v41 = vsub.f32 %v1114_v11, %v1147_v38  ;;  %v1180_v42 = vsel %vm227_vm2, %v1162_v40, 0.0 }
0x17b3   :  { %1181 = vadd.xlane.f32.xlu1 %v1180_v42  ;;  %v1139_v43 = vpop.xlane.xlu0 %1138 }
0x17b4   :  { %v1148_v44 = vmul.f32 0.03125, %v1139_v43  ;;  %v1163_v45 = vmul.f32 %v1155_v41, %v1155_v41 }
0x17b6   :  { %v1156_v46 = vsub.f32 %v1115_v14, %v1148_v44  ;;  %v1183_v47 = vsel %vm227_vm2, %v1163_v45, 0.0 }
0x17b7   :  { %1184 = vadd.xlane.f32.xlu1 %v1183_v47 }
0x17b8   :  { %v1164_v48 = vmul.f32 %v1156_v46, %v1156_v46 }
0x17ba   :  { %v1186_v49 = vsel %vm227_vm2, %v1164_v48, 0.0 }
0x17bb   :  { %1187 = vadd.xlane.f32.xlu1 %v1186_v49 }
0x17de   :  { %v1613_v51 = vpop.permute.xlu1 %1612 }
0x17df   :  { %v6590_v52 = vadd.f32 %v1613_v51, %v1605_v50 }
0x17e1   :  { %5968 = vtanh.f32 %v6590_v52 }
0x17eb   :  { %v5969_v54 = vpop.eup %5968 }
0x17ec   :  { %1618 = vrot.lane.b32.xlu0 %v5969_v54, %s6204_s18 }
0x180b   :  { %1175 = vadd.xlane.f32.xlu0 %v1174_v60 }
0x181d   :  { %v1173_v39 = vpop.xlane.xlu1 %1172 }
0x181e   :  { %v1191_v63 = vmul.f32 0.03125, %v1173_v39 }
0x1820   :  { %v1199_v2 = vadd.f32 1e-05, %v1191_v63 }
0x1822   :  { %5970 = vrsqrt.f32 %v1199_v2 }
0x182c   :  { %v5971_v3 = vpop.eup %5970 }
0x182d   :  { %v1215_v37 = vmul.f32 %v5971_v3, %v1151_v27 }
0x182f   :  { %v1230_v4 = vmul.f32 %v6481_v53, %v1215_v37 }
0x1831   :  { %v1245_v8 = vadd.f32 %v6492_v57, %v1230_v4 }
0x1833   :  { %1253 = vst.msk [vmem:[#allocation2 + $0x10] sm:$0xff] %vm227_vm2, %v1245_v8 }
0x183a   :  { %v1261_v6 = vld [vmem:[#allocation2 + $0x10] sm:$0xff] }
0x183b   :  { %5079 = vmatprep.mubr.msk.f32.mxu0 %vm227_vm2, %v1261_v6 }
0x183c   :  { %v1179_v5 = vpop.xlane.xlu1 %1178 }
0x183d   :  { %v1193_v7 = vmul.f32 0.03125, %v1179_v5 }
0x183f   :  { %v1201_v9 = vadd.f32 1e-05, %v1193_v7 }
0x1840   :  { %v1182_v12 = vpop.xlane.xlu1 %1181 }
0x1841   :  { %5972 = vrsqrt.f32 %v1201_v9  ;;  %v1194_v10 = vmul.f32 0.03125, %v1182_v12 }
0x1843   :  { %v1202_v11 = vadd.f32 1e-05, %v1194_v10 }
0x1844   :  { %v1185_v59 = vpop.xlane.xlu1 %1184 }
0x1845   :  { %5974 = vrsqrt.f32 %v1202_v11  ;;  %v1195_v14 = vmul.f32 0.03125, %v1185_v59 }
0x1847   :  { %v1203_v16 = vadd.f32 1e-05, %v1195_v14 }
0x1848   :  { %v1188_v17 = vpop.xlane.xlu1 %1187 }
0x1849   :  { %5976 = vrsqrt.f32 %v1203_v16  ;;  %v1196_v18 = vmul.f32 0.03125, %v1188_v17 }
0x184b   :  { %v5973_v20 = vpop.eup %5972  ;;  %v1204_v22 = vadd.f32 1e-05, %v1196_v18 }
0x184c   :  { %v1217_v23 = vmul.f32 %v5973_v20, %v1153_v13 }
0x184d   :  { %5978 = vrsqrt.f32 %v1204_v22 }
0x184e   :  { %v1232_v24 = vmul.f32 %v6481_v53, %v1217_v23 }
0x184f   :  { %v5975_v25 = vpop.eup %5974 }
0x1850   :  { %v1247_v27 = vadd.f32 %v6492_v57, %v1232_v24  ;;  %v1218_v28 = vmul.f32 %v5975_v25, %v1154_v34 }
0x1852   :  { %1255 = vst.msk [vmem:[#allocation2 + $0x20] sm:$0xff] %vm227_vm2, %v1247_v27  ;;  %v1233_v29 = vmul.f32 %v6481_v53, %v1218_v28 }
0x1853   :  { %v5977_v30 = vpop.eup %5976 }
0x1854   :  { %v1248_v62 = vadd.f32 %v6492_v57, %v1233_v29  ;;  %v1219_v31 = vmul.f32 %v5977_v30, %v1155_v41 }
0x1856   :  { %1256 = vst.msk [vmem:[#allocation2 + $0x28] sm:$0xff] %vm227_vm2, %v1248_v62  ;;  %v1234_v61 = vmul.f32 %v6481_v53, %v1219_v31 }
0x1857   :  { %v5979_v13 = vpop.eup %5978 }
0x1858   :  { %v1249_v32 = vadd.f32 %v6492_v57, %v1234_v61  ;;  %v1220_v33 = vmul.f32 %v5979_v13, %v1156_v46 }
0x1859   :  { %v1263_v48 = vld [vmem:[#allocation2 + $0x20] sm:$0xff] }
0x185a   :  { %1257 = vst.msk [vmem:[#allocation2 + $0x30] sm:$0xff] %vm227_vm2, %v1249_v32  ;;  %v1235_v34 = vmul.f32 %v6481_v53, %v1220_v33 }
0x185c   :  { %v1250_v35 = vadd.f32 %v6492_v57, %v1235_v34 }
0x185e   :  { %1258 = vst.msk [vmem:[#allocation2 + $0x38] sm:$0xff] %vm227_vm2, %v1250_v35  ;;  %v1619_v36 = vpop.permute.xlu0 %1618 }
0x185f   :  { %v1621_v38 = vmul.f32 %v6579_v21, %v1619_v36  ;;  %v1264_v21 = vld [vmem:[#allocation2 + $0x28] sm:$0xff] }
0x1861   :  { %1623 = vrot.lane.b32.xlu0 %v1621_v38, %s6200_s29  ;;  %v1265_v49 = vld [vmem:[#allocation2 + $0x30] sm:$0xff] }
0x1865   :  { %v1266_v50 = vld [vmem:[#allocation2 + $0x38] sm:$0xff] }
0x1898   :  { %v1176_v40 = vpop.xlane.xlu0 %1175 }
0x1899   :  { %v1192_v41 = vmul.f32 0.03125, %v1176_v40 }
0x189b   :  { %v1200_v42 = vadd.f32 1e-05, %v1192_v41 }
0x189d   :  { %5980 = vrsqrt.f32 %v1200_v42 }
0x18a7   :  { %v5981_v43 = vpop.eup %5980 }
0x18a8   :  { %v1216_v44 = vmul.f32 %v5981_v43, %v1152_v56 }
0x18aa   :  { %v1231_v45 = vmul.f32 %v6481_v53, %v1216_v44 }
0x18ac   :  { %v1246_v46 = vadd.f32 %v6492_v57, %v1231_v45 }
0x18ae   :  { %1254 = vst.msk [vmem:[#allocation2 + $0x18] sm:$0xff] %vm227_vm2, %v1246_v46 }
0x18b5   :  { %v1262_v47 = vld [vmem:[#allocation2 + $0x18] sm:$0xff] }
0x18b6   :  { %5080 = vmatmul.mubr.msk.f32.gmra.mrb[16].mxu0 %vm227_vm2, %v1262_v47 }
0x18b7   :  { %5082 = vmatprep.mubr.msk.f32.mxu0 %vm227_vm2, %v1263_v48 }
0x18ba   :  { %5083 = vmatmul.mubr.msk.f32.gmra.mrb[18].mxu0 %vm227_vm2, %v1264_v21 }
0x18bb   :  { %5085 = vmatprep.mubr.msk.f32.mxu0 %vm227_vm2, %v1265_v49 }
0x18be   :  { %5086 = vmatmul.mubr.msk.f32.gmra.mrb[20].mxu0 %vm227_vm2, %v1266_v50 }
0x18bf   :  { %5118 = vmatprep.mubr.msk.f32.mxu0 %vm6202_vm0, %v6203_v1 }
0x18d3   :  { %v1624_v53 = vpop.permute.xlu0 %1623 }
0x18d4   :  { %1627 = vst.msk [vmem:[#allocation3 + $0x8] sm:$0xff] %vm227_vm2, %v1624_v53  ;;  %5119 = vmatmul.mubr.msk.f32.vlgmr.msra.gmra.mrb[22].mxu0 %vm227_vm2, %v1624_v53 }
0x18d5   :  { %5262 = vmatpush3.bf16.msra.mxu0 %v6509_v15  ;;  %5140 = vmatprep.mubr.msk.f32.mxu0 %vm6202_vm0, %v6203_v1 }
0x18d6   :  { %5263 = vmatprep.subr.bf16.mxu0 %v6201_v0 }
0x18d9   :  { %5265 = vmatpush3.bf16.msra.mxu0 %v6522_v19 }
0x18da   :  { %5272 = vmatprep.subr.bf16.mxu0 %v6201_v0 }
0x1989   :  { %v5081_v57 = vpop.f32.mrb[16].mxu0 }
0x198a   :  { %v1378_v51 = vpop.f32.mrb[17].mxu0 }
0x198b   :  { %v1379_v60 = vadd.f32 %v6546_v26, %v1378_v51 }
0x198d   :  { %v6631_v54 = vpop.f32.mrb[18].mxu0 }
0x198e   :  { %v6633_v55 = vpop.f32.mrb[19].mxu0  ;;  %v1394_v51 = vadd.f32 %v6631_v54, %v6546_v26 }
0x198f   :  { %v1389_v34 = vadd.f32 %v6546_v26, %v6633_v55 }
0x1991   :  { %v6635_v56 = vpop.f32.mrb[20].mxu0 }
0x1992   :  { %v6637_v58 = vpop.f32.mrb[21].mxu0 }
0x19a7   :  { %v1701_v39 = vpop.f32.mrb[22].mxu0 }
0x19a8   :  { %v1705_v63 = vadd.f32 %v1701_v39, %v1379_v60  ;;  %v5120_v2 = vpop.f32.mrb[23].mxu0 }
0x19aa   :  { %5982 = vtanh.f32 %v1705_v63  ;;  %v4795_v37 = vmul.f32 -1.442695, %v1705_v63 }
0x19ac   :  { %5984 = vpow2.f32 %v4795_v37 }
0x19b4   :  { %v5983_v3 = vpop.eup %5982 }
0x19b5   :  { %1715 = vrot.lane.b32.xlu1 %v5983_v3, %s6204_s18 }
0x19b6   :  { %v5985_v4 = vpop.eup %5984 }
0x19b7   :  { %v1709_v8 = vadd.f32 1.0, %v5985_v4 }
0x19b9   :  { %5986 = vrcp.f32 %v1709_v8 }
0x19c3   :  { %v5987_v6 = vpop.eup %5986 }
0x19c4   :  { %v1713_v9 = vmul.f32 %v5987_v6, %v6590_v52  ;;  %v1384_v52 = vadd.f32 %v5081_v57, %v6546_v26 }
0x1a27   :  { %v1716_v5 = vpop.permute.xlu1 %1715 }
0x1a28   :  { %v1718_v7 = vmul.f32 %v5987_v6, %v1716_v5 }
0x1a2a   :  { %1720 = vrot.lane.b32.xlu1 %v1718_v7, %s6200_s29 }
0x1a9c   :  { %v1721_v12 = vpop.permute.xlu1 %1720 }
0x1a9d   :  { %v1723_v10 = vadd.f32 %v1721_v12, %v1713_v9  ;;  %v1399_v12 = vadd.f32 %v6546_v26, %v6637_v58 }
0x1a9f   :  { %5988 = vtanh.f32 %v1723_v10 }
0x1aa9   :  { %v5989_v11 = vpop.eup %5988 }
0x1aaa   :  { %1726 = vrot.lane.b32.xlu0 %v5989_v11, %s6204_s18 }
0x1b1c   :  { %v1727_v59 = vpop.permute.xlu0 %1726 }
0x1b1d   :  { %v1729_v14 = vmul.f32 %v5987_v6, %v1727_v59 }
0x1b1f   :  { %1731 = vrot.lane.b32.xlu1 %v1729_v14, %s6200_s29 }
0x1b91   :  { %v1732_v16 = vpop.permute.xlu1 %1731 }
0x1b92   :  { %1735 = vst.msk [vmem:[#allocation3 + $0x10] sm:$0xff] %vm227_vm2, %v1732_v16  ;;  %5130 = vmatmul.mubr.msk.f32.vlgmr.msra.gmra.mrb[14].mxu1 %vm227_vm2, %v1732_v16 }
0x1b93   :  { %5268 = vmatpush3.bf16.msra.mxu1 %v6509_v15  ;;  %5151 = vmatprep.mubr.msk.f32.mxu1 %vm6202_vm0, %v6203_v1 }
0x1b94   :  { %5269 = vmatprep.subr.bf16.mxu1 %v6201_v0 }
0x1b97   :  { %5271 = vmatpush3.bf16.msra.mxu1 %v6522_v19 }
0x1b98   :  { %5278 = vmatprep.subr.bf16.mxu1 %v6201_v0 }
0x1c65   :  { %v1809_v17 = vpop.f32.mrb[14].mxu1 }
0x1c66   :  { %v1813_v18 = vadd.f32 %v1809_v17, %v1384_v52  ;;  %v5131_v20 = vpop.f32.mrb[15].mxu1 }
0x1c68   :  { %5990 = vtanh.f32 %v1813_v18  ;;  %v4797_v23 = vmul.f32 -1.442695, %v1813_v18 }
0x1c6a   :  { %5992 = vpow2.f32 %v4797_v23 }
0x1c72   :  { %v5991_v22 = vpop.eup %5990 }
0x1c73   :  { %1823 = vrot.lane.b32.xlu0 %v5991_v22, %s6204_s18 }
0x1c74   :  { %v5993_v24 = vpop.eup %5992 }
0x1c75   :  { %v1817_v25 = vadd.f32 1.0, %v5993_v24 }
0x1c77   :  { %5994 = vrcp.f32 %v1817_v25 }
0x1c81   :  { %v5995_v27 = vpop.eup %5994 }
0x1c82   :  { %v1821_v30 = vmul.f32 %v5995_v27, %v1723_v10 }
0x1ce5   :  { %v1824_v28 = vpop.permute.xlu0 %1823 }
0x1ce6   :  { %v1826_v29 = vmul.f32 %v5995_v27, %v1824_v28 }
0x1ce8   :  { %1828 = vrot.lane.b32.xlu1 %v1826_v29, %s6200_s29 }
0x1d5a   :  { %v1829_v62 = vpop.permute.xlu1 %1828 }
0x1d5b   :  { %v1831_v31 = vadd.f32 %v1829_v62, %v1821_v30  ;;  %v1404_v30 = vadd.f32 %v6635_v56, %v6546_v26 }
0x1d5d   :  { %5996 = vtanh.f32 %v1831_v31 }
0x1d67   :  { %v5997_v61 = vpop.eup %5996 }
0x1d68   :  { %1834 = vrot.lane.b32.xlu0 %v5997_v61, %s6204_s18 }
0x1dda   :  { %v1835_v13 = vpop.permute.xlu0 %1834 }
0x1ddb   :  { %v1837_v32 = vmul.f32 %v5995_v27, %v1835_v13 }
0x1ddd   :  { %1839 = vrot.lane.b32.xlu1 %v1837_v32, %s6200_s29 }
0x1e4f   :  { %v1840_v33 = vpop.permute.xlu1 %1839 }
0x1e50   :  { %1843 = vst.msk [vmem:[#allocation3 + $0x18] sm:$0xff] %vm227_vm2, %v1840_v33  ;;  %5141 = vmatmul.mubr.msk.f32.vlgmr.msra.gmra.mrb[24].mxu0 %vm227_vm2, %v1840_v33 }
0x1e51   :  { %5274 = vmatpush3.bf16.msra.mxu0 %v6509_v15  ;;  %5162 = vmatprep.mubr.msk.f32.mxu0 %vm6202_vm0, %v6203_v1 }
0x1e52   :  { %5275 = vmatprep.subr.bf16.mxu0 %v6201_v0 }
0x1e55   :  { %5277 = vmatpush3.bf16.msra.mxu0 %v6522_v19 }
0x1f23   :  { %v1917_v35 = vpop.f32.mrb[24].mxu0 }
0x1f24   :  { %v1921_v36 = vadd.f32 %v1917_v35, %v1389_v34  ;;  %v5142_v38 = vpop.f32.mrb[25].mxu0 }
0x1f26   :  { %5998 = vtanh.f32 %v1921_v36  ;;  %v4799_v41 = vmul.f32 -1.442695, %v1921_v36 }
0x1f28   :  { %6000 = vpow2.f32 %v4799_v41 }
0x1f30   :  { %v5999_v40 = vpop.eup %5998 }
0x1f31   :  { %1931 = vrot.lane.b32.xlu0 %v5999_v40, %s6204_s18 }
0x1f32   :  { %v6001_v42 = vpop.eup %6000 }
0x1f33   :  { %v1925_v43 = vadd.f32 1.0, %v6001_v42  ;;  %v2276_v42 = vld [vmem:[#allocation3] sm:$0xff] }
0x1f35   :  { %6002 = vrcp.f32 %v1925_v43  ;;  %v2284_v43 = vsel %vm227_vm2, %v2276_v42, 0.0 }
0x1f3f   :  { %v6003_v44 = vpop.eup %6002 }
0x1f40   :  { %v1929_v47 = vmul.f32 %v6003_v44, %v1831_v31 }
0x1fa3   :  { %v1932_v45 = vpop.permute.xlu0 %1931 }
0x1fa4   :  { %v1934_v46 = vmul.f32 %v6003_v44, %v1932_v45 }
0x1fa6   :  { %1936 = vrot.lane.b32.xlu1 %v1934_v46, %s6200_s29  ;;  %v6703_v46 = vld [vmem:[#allocation3 + $0x18] sm:$0xff] }
0x2018   :  { %v1937_v48 = vpop.permute.xlu1 %1936 }
0x2019   :  { %v1939_v21 = vadd.f32 %v1937_v48, %v1929_v47  ;;  %v2293_v47 = vsel %vm227_vm2, %v6703_v46, 0.0 }
0x201b   :  { %6004 = vtanh.f32 %v1939_v21 }
0x2025   :  { %v6005_v49 = vpop.eup %6004 }
0x2026   :  { %1942 = vrot.lane.b32.xlu0 %v6005_v49, %s6204_s18 }
0x2098   :  { %v1943_v50 = vpop.permute.xlu0 %1942 }
0x2099   :  { %v1945_v53 = vmul.f32 %v6003_v44, %v1943_v50  ;;  %v2278_v44 = vld [vmem:[#allocation3 + $0x10] sm:$0xff] }
0x209a   :  { %v2290_v45 = vsel %vm227_vm2, %v2278_v44, 0.0 }
0x209b   :  { %1947 = vrot.lane.b32.xlu1 %v1945_v53, %s6200_s29  ;;  %v6712_v53 = vld [vmem:[#allocation3 + $0x8] sm:$0xff] }
0x210d   :  { %v1948_v57 = vpop.permute.xlu1 %1947 }
0x210e   :  { %1951 = vst.msk [vmem:[#allocation3 + $0x20] sm:$0xff] %vm227_vm2, %v1948_v57  ;;  %5152 = vmatmul.mubr.msk.f32.vlgmr.msra.gmra.mrb[16].mxu1 %vm227_vm2, %v1948_v57  ;;  %v2287_v57 = vsel %vm227_vm2, %v6712_v53, 0.0 }
0x210f   :  { %5280 = vmatpush3.bf16.msra.mxu1 %v6509_v15  ;;  %5173 = vmatprep.mubr.msk.f32.mxu1 %vm6202_vm0, %v6203_v1 }
0x2110   :  { %5281 = vmatprep.subr.bf16.mxu1 %v6201_v0 }
0x2113   :  { %5283 = vmatpush3.bf16.msra.mxu1 %v6522_v19 }
0x21e1   :  { %v2025_v55 = vpop.f32.mrb[16].mxu1 }
0x21e2   :  { %v2029_v60 = vadd.f32 %v2025_v55, %v1394_v51  ;;  %v5153_v39 = vpop.f32.mrb[17].mxu1  ;;  %v6716_v51 = vld [vmem:[#allocation3 + $0x20] sm:$0xff] }
0x21e3   :  { %v2296_v55 = vsel %vm227_vm2, %v6716_v51, 0.0 }
0x21e4   :  { %6006 = vtanh.f32 %v2029_v60  ;;  %v4801_v2 = vmul.f32 -1.442695, %v2029_v60 }
0x21e6   :  { %6008 = vpow2.f32 %v4801_v2 }
0x21ee   :  { %v6007_v63 = vpop.eup %6006 }
0x21ef   :  { %2039 = vrot.lane.b32.xlu0 %v6007_v63, %s6204_s18 }
0x21f0   :  { %v6009_v15 = vpop.eup %6008 }
0x21f1   :  { %v2033_v3 = vadd.f32 1.0, %v6009_v15 }
0x21f3   :  { %6010 = vrcp.f32 %v2033_v3 }
0x21fd   :  { %v6011_v37 = vpop.eup %6010 }
0x21fe   :  { %v2037_v19 = vmul.f32 %v6011_v37, %v1939_v21 }
0x2261   :  { %v2040_v4 = vpop.permute.xlu0 %2039 }
0x2262   :  { %v2042_v0 = vmul.f32 %v6011_v37, %v2040_v4 }
0x2264   :  { %2044 = vrot.lane.b32.xlu1 %v2042_v0, %s6200_s29 }
0x22d6   :  { %v2045_v8 = vpop.permute.xlu1 %2044 }
0x22d7   :  { %v2047_v54 = vadd.f32 %v2045_v8, %v2037_v19 }
0x22d9   :  { %6012 = vtanh.f32 %v2047_v54 }
0x22e3   :  { %v6013_v6 = vpop.eup %6012 }
0x22e4   :  { %2050 = vrot.lane.b32.xlu0 %v6013_v6, %s6204_s18  ;;  %v2435_v6 = vld [vmem:[%s7422_s11 + $0x8] sm:$0xff] }
0x2356   :  { %v2051_v5 = vpop.permute.xlu0 %2050 }
0x2357   :  { %v2053_v7 = vmul.f32 %v6011_v37, %v2051_v5  ;;  %v2439_v5 = vld [vmem:[%s7422_s11 + $0x28] sm:$0xff] }
0x2359   :  { %2055 = vrot.lane.b32.xlu1 %v2053_v7, %s6200_s29  ;;  %v2437_v7 = vld [vmem:[%s7422_s11 + $0x18] sm:$0xff] }
0x23cb   :  { %v2056_v9 = vpop.permute.xlu1 %2055 }
0x23cc   :  { %2059 = vst.msk [vmem:[#allocation3 + $0x28] sm:$0xff] %vm227_vm2, %v2056_v9  ;;  %5163 = vmatmul.mubr.msk.f32.vlgmr.msra.gmra.mrb[26].mxu0 %vm227_vm2, %v2056_v9  ;;  %v5284_v9 = vpack.c.bf16 %v2439_v5, %v2435_v6  ;;  %v6823_v6 = vld [vmem:[%s7421_s10] ss:$0 sm:$0xff] }
0x23cd   :  { %2560 = vmatprep.mubr.f32.mxu0 %v6203_v1 }
0x23ce   :  { %5285 = vmatprep.subr.bf16.mxu0 %v5284_v9 }
0x23d3   :  { %v6707_v48 = vld [vmem:[#allocation3 + $0x28] sm:$0xff] }
0x23d4   :  { %v2299_v21 = vsel %vm227_vm2, %v6707_v48, 0.0 }
0x249f   :  { %v2133_v10 = vpop.f32.mrb[26].mxu0 }
0x24a0   :  { %v2137_v11 = vadd.f32 %v2133_v10, %v1399_v12  ;;  %v5164_v59 = vpop.f32.mrb[27].mxu0  ;;  %v2441_v12 = vld [vmem:[%s7422_s11 + $0x38] sm:$0xff]  ;;  %v2434_v10 = vld [vmem:[%s7422_s11] sm:$0xff] }
0x24a1   :  { %v5292_v59 = vpack.c.bf16 %v2441_v12, %v2437_v7 }
0x24a2   :  { %6014 = vtanh.f32 %v2137_v11  ;;  %v4803_v16 = vmul.f32 -1.442695, %v2137_v11  ;;  %v2438_v11 = vld [vmem:[%s7422_s11 + $0x20] sm:$0xff] }
0x24a3   :  { %5293 = vmatprep.subr.bf16.mxu1 %v5292_v59 }
0x24a4   :  { %6016 = vpow2.f32 %v4803_v16  ;;  %v2436_v16 = vld [vmem:[%s7422_s11 + $0x10] sm:$0xff] }
0x24ac   :  { %v6015_v14 = vpop.eup %6014 }
0x24ad   :  { %2147 = vrot.lane.b32.xlu0 %v6015_v14, %s6204_s18  ;;  %v5286_v14 = vpack.c.bf16 %v2438_v11, %v2434_v10 }
0x24ae   :  { %v6017_v52 = vpop.eup %6016 }
0x24af   :  { %v2141_v17 = vadd.f32 1.0, %v6017_v52  ;;  %v2440_v52 = vld [vmem:[%s7422_s11 + $0x30] sm:$0xff]  ;;  %5287 = vmatpush1.bf16.msra.mxu0 %v5286_v14 }
0x24b1   :  { %6018 = vrcp.f32 %v2141_v17  ;;  %v5294_v17 = vpack.c.bf16 %v2440_v52, %v2436_v16 }
0x24bb   :  { %v6019_v18 = vpop.eup %6018 }
0x24bc   :  { %v2145_v23 = vmul.f32 %v6019_v18, %v2047_v54 }
0x251f   :  { %v2148_v20 = vpop.permute.xlu0 %2147 }
0x2520   :  { %v2150_v22 = vmul.f32 %v6019_v18, %v2148_v20  ;;  %v2447_v20 = vld [vmem:[%s7422_s11 + $0x68] sm:$0xff] }
0x2522   :  { %2152 = vrot.lane.b32.xlu1 %v2150_v22, %s6200_s29  ;;  %v2445_v22 = vld [vmem:[%s7422_s11 + $0x58] sm:$0xff] }
0x2594   :  { %v2153_v24 = vpop.permute.xlu1 %2152 }
0x2595   :  { %v2155_v58 = vadd.f32 %v2153_v24, %v2145_v23  ;;  %v2449_v24 = vld [vmem:[%s7422_s11 + $0x78] sm:$0xff] }
0x2597   :  { %6020 = vtanh.f32 %v2155_v58 }
0x25a1   :  { %v6021_v25 = vpop.eup %6020 }
0x25a2   :  { %2158 = vrot.lane.b32.xlu0 %v6021_v25, %s6204_s18  ;;  %v2446_v25 = vld [vmem:[%s7422_s11 + $0x60] sm:$0xff] }
0x2614   :  { %v2159_v27 = vpop.permute.xlu0 %2158 }
0x2615   :  { %v2161_v28 = vmul.f32 %v6019_v18, %v2159_v27  ;;  %v2443_v18 = vld [vmem:[%s7422_s11 + $0x48] sm:$0xff]  ;;  %v5296_v27 = vpack.c.bf16 %v2449_v24, %v2445_v22  ;;  %v2762_v24 = vld [vmem:[#allocation5 + $0x20] sm:$0xff] }
0x2616   :  { %v5288_v23 = vpack.c.bf16 %v2447_v20, %v2443_v18  ;;  %v2763_v18 = vld [vmem:[#allocation5 + $0x28] sm:$0xff]  ;;  %v2761_v20 = vld [vmem:[#allocation5 + $0x18] sm:$0xff] }
0x2617   :  { %2163 = vrot.lane.b32.xlu1 %v2161_v28, %s6200_s29 }
0x2618   :  { %5289 = vmatprep.subr.bf16.mxu0 %v5288_v23  ;;  %v2758_v23 = vld [vmem:[#allocation5] sm:$0xff] }
0x2689   :  { %v2164_v29 = vpop.permute.xlu1 %2163 }
0x268a   :  { %2167 = vst.msk [vmem:[#allocation3 + $0x30] sm:$0xff] %vm227_vm2, %v2164_v29  ;;  %5174 = vmatmul.mubr.msk.f32.vlgmr.msra.gmra.mrb[18].mxu1 %vm227_vm2, %v2164_v29  ;;  %v2444_v29 = vld [vmem:[%s7422_s11 + $0x50] sm:$0xff] }
0x268b   :  { %2673 = vmatprep.mubr.f32.mxu1 %v6203_v1  ;;  %5295 = vmatpush1.bf16.msra.mxu1 %v5294_v17  ;;  %v2759_v17 = vld [vmem:[#allocation5 + $0x8] sm:$0xff] }
0x268c   :  { %5297 = vmatprep.subr.bf16.mxu1 %v5296_v27  ;;  %v6841_v22 = vpack.c.bf16 %v2763_v18, %v2759_v17 }
0x2691   :  { %v6720_v60 = vld [vmem:[#allocation3 + $0x30] sm:$0xff] }
0x2692   :  { %v2302_v39 = vsel %vm227_vm2, %v6720_v60, 0.0 }
0x275d   :  { %v2241_v62 = vpop.f32.mrb[18].mxu1 }
0x275e   :  { %v2245_v31 = vadd.f32 %v2241_v62, %v1404_v30  ;;  %v5175_v61 = vpop.f32.mrb[19].mxu1  ;;  %v2448_v30 = vld [vmem:[%s7422_s11 + $0x70] sm:$0xff] }
0x275f   :  { %v5298_v62 = vpack.c.bf16 %v2448_v30, %v2444_v29  ;;  %v2764_v29 = vld [vmem:[#allocation5 + $0x30] sm:$0xff] }
0x2760   :  { %6022 = vtanh.f32 %v2245_v31  ;;  %v4805_v32 = vmul.f32 -1.442695, %v2245_v31 }
0x2761   :  { %5299 = vmatpush1.bf16.msra.mxu1 %v5298_v62  ;;  %v2767_v62 = vld [vmem:[#allocation5 + $0x48] sm:$0xff] }
0x2762   :  { %6024 = vpow2.f32 %v4805_v32 }
0x276a   :  { %v6023_v13 = vpop.eup %6022 }
0x276b   :  { %2255 = vrot.lane.b32.xlu0 %v6023_v13, %s6204_s18 }
0x276c   :  { %v6025_v33 = vpop.eup %6024 }
0x276d   :  { %v2249_v34 = vadd.f32 1.0, %v6025_v33 }
0x276f   :  { %6026 = vrcp.f32 %v2249_v34 }
0x2779   :  { %v6027_v35 = vpop.eup %6026 }
0x277a   :  { %v2253_v40 = vmul.f32 %v6027_v35, %v2155_v58  ;;  %v2442_v58 = vld [vmem:[%s7422_s11 + $0x40] sm:$0xff] }
0x277b   :  { %v5290_v28 = vpack.c.bf16 %v2446_v25, %v2442_v58  ;;  %v2765_v58 = vld [vmem:[#allocation5 + $0x38] sm:$0xff]  ;;  %v6843_v25 = vpack.c.bf16 %v2762_v24, %v2758_v23  ;;  %v2796_v23 = vld [vmem:[#allocation5 + $0x130] sm:$0xff] }
0x277c   :  { %v6845_v27 = vpack.c.bf16 %v2765_v58, %v2761_v20  ;;  %v2792_v20 = vld [vmem:[#allocation5 + $0x110] sm:$0xff]  ;;  %v2799_v58 = vld [vmem:[#allocation5 + $0x148] sm:$0xff] }
0x277d   :  { %5291 = vmatpush1.bf16.msra.mxu0 %v5290_v28  ;;  %v2760_v28 = vld [vmem:[#allocation5 + $0x10] sm:$0xff]  ;;  %v6896_v24 = vpack.c.bf16 %v2796_v23, %v2792_v20 }
0x277e   :  { %5301 = vmatprep.subr.bf16.mxu0 %v6841_v22  ;;  %v6848_v30 = vpack.c.bf16 %v2764_v29, %v2760_v28  ;;  %5333 = vmatprep.subr.bf16.mxu1 %v6845_v27  ;;  %v2803_v28 = vld [vmem:[#allocation5 + $0x168] sm:$0xff]  ;;  %v2801_v29 = vld [vmem:[#allocation5 + $0x158] sm:$0xff]  ;;  %v2820_v23 = vld [vmem:[#allocation5 + $0x1f0] sm:$0xff] }
0x27dd   :  { %v2256_v36 = vpop.permute.xlu0 %2255 }
0x27de   :  { %v2258_v38 = vmul.f32 %v6027_v35, %v2256_v36 }
0x27e0   :  { %2260 = vrot.lane.b32.xlu1 %v2258_v38, %s6200_s29 }
0x2852   :  { %v2261_v41 = vpop.permute.xlu1 %2260 }
0x2853   :  { %v2263_v26 = vadd.f32 %v2261_v41, %v2253_v40 }
0x2855   :  { %6028 = vtanh.f32 %v2263_v26 }
0x285f   :  { %v6029_v56 = vpop.eup %6028 }
0x2860   :  { %2266 = vrot.lane.b32.xlu0 %v6029_v56, %s6204_s18 }
0x287f   :  { %2285 = vadd.xlane.f32.xlu0 %v2284_v43 }
0x2883   :  { %2291 = vadd.xlane.f32.xlu0 %v2290_v45 }
0x2887   :  { %2294 = vadd.xlane.f32.xlu0 %v2293_v47 }
0x288b   :  { %2300 = vadd.xlane.f32.xlu0 %v2299_v21 }
0x28d2   :  { %v2267_v49 = vpop.permute.xlu0 %2266 }
0x28d3   :  { %v2269_v50 = vmul.f32 %v6027_v35, %v2267_v49 }
0x28d5   :  { %2271 = vrot.lane.b32.xlu1 %v2269_v50, %s6200_s29 }
0x28f9   :  { %2288 = vadd.xlane.f32.xlu1 %v2287_v57 }
0x28fd   :  { %2297 = vadd.xlane.f32.xlu1 %v2296_v55 }
0x2901   :  { %2303 = vadd.xlane.f32.xlu1 %v2302_v39 }
0x290c   :  { %v2286_v63 = vpop.xlane.xlu0 %2285 }
0x290d   :  { %v2308_v2 = vmul.f32 0.03125, %v2286_v63 }
0x290f   :  { %v6724_v15 = vsub.f32 %v2276_v42, %v2308_v2 }
0x2910   :  { %v2292_v3 = vpop.xlane.xlu0 %2291 }
0x2911   :  { %v2310_v37 = vmul.f32 0.03125, %v2292_v3  ;;  %v2324_v4 = vmul.f32 %v6724_v15, %v6724_v15 }
0x2913   :  { %v6728_v0 = vsub.f32 %v2278_v44, %v2310_v37  ;;  %v2332_v19 = vsel %vm227_vm2, %v2324_v4, 0.0 }
0x2914   :  { %2333 = vadd.xlane.f32.xlu1 %v2332_v19  ;;  %v2295_v32 = vpop.xlane.xlu0 %2294 }
0x2915   :  { %v2326_v8 = vmul.f32 %v6728_v0, %v6728_v0  ;;  %v2311_v33 = vmul.f32 0.03125, %v2295_v32  ;;  %v2766_v32 = vld [vmem:[#allocation5 + $0x40] sm:$0xff] }
0x2917   :  { %v2338_v54 = vsel %vm227_vm2, %v2326_v8, 0.0  ;;  %v6785_v38 = vsub.f32 %v6703_v46, %v2311_v33  ;;  %v6817_v8 = vld [vmem:[%s7420_s9] ss:$0 sm:$0xff] }
0x2918   :  { %2339 = vadd.xlane.f32.xlu1 %v2338_v54  ;;  %v2301_v34 = vpop.xlane.xlu0 %2300  ;;  %v2770_v33 = vld [vmem:[#allocation5 + $0x60] sm:$0xff] }
0x2919   :  { %v2313_v40 = vmul.f32 0.03125, %v2301_v34  ;;  %v2327_v46 = vmul.f32 %v6785_v38, %v6785_v38  ;;  %v2773_v34 = vld [vmem:[#allocation5 + $0x78] sm:$0xff] }
0x291b   :  { %v6793_v43 = vsub.f32 %v6707_v48, %v2313_v40  ;;  %v2341_v48 = vsel %vm227_vm2, %v2327_v46, 0.0  ;;  %v2768_v40 = vld [vmem:[#allocation5 + $0x50] sm:$0xff]  ;;  %v2777_v46 = vld [vmem:[#allocation5 + $0x98] sm:$0xff] }
0x291d   :  { %v2329_v57 = vmul.f32 %v6793_v43, %v6793_v43 }
0x291f   :  { %v2347_v55 = vsel %vm227_vm2, %v2329_v57, 0.0 }
0x2947   :  { %v2272_v31 = vpop.permute.xlu1 %2271 }
0x2948   :  { %2275 = vst.msk [vmem:[#allocation3 + $0x38] sm:$0xff] %vm227_vm2, %v2272_v31  ;;  %v2771_v31 = vld [vmem:[#allocation5 + $0x68] sm:$0xff] }
0x294f   :  { %v2283_v61 = vld [vmem:[#allocation3 + $0x38] sm:$0xff] }
0x2950   :  { %v2305_v13 = vsel %vm227_vm2, %v2283_v61, 0.0 }
0x2951   :  { %2306 = vadd.xlane.f32.xlu0 %v2305_v13  ;;  %v6853_v13 = vpack.c.bf16 %v2771_v31, %v2767_v62  ;;  %v6901_v62 = vpack.c.bf16 %v2803_v28, %v2799_v58  ;;  %v2798_v31 = vld [vmem:[#allocation5 + $0x140] sm:$0xff] }
0x2952   :  { %v2992_v28 = vld [vmem:[%s7425_s14] sm:$0xff] }
0x2953   :  { %vm2993_vm3 = vcmp.ne.s32.totalorder %v2992_v28, 0 }
0x2986   :  { %v2289_v35 = vpop.xlane.xlu1 %2288 }
0x2987   :  { %v2309_v36 = vmul.f32 0.03125, %v2289_v35  ;;  %v6855_v35 = vpack.c.bf16 %v2770_v33, %v2766_v32  ;;  %v2805_v32 = vld [vmem:[#allocation5 + $0x178] sm:$0xff] }
0x2989   :  { %v6788_v41 = vsub.f32 %v6712_v53, %v2309_v36 }
0x298a   :  { %v2298_v26 = vpop.xlane.xlu1 %2297 }
0x298b   :  { %v2312_v56 = vmul.f32 0.03125, %v2298_v26  ;;  %v2325_v42 = vmul.f32 %v6788_v41, %v6788_v41  ;;  %v2772_v26 = vld [vmem:[#allocation5 + $0x70] sm:$0xff] }
0x298d   :  { %v6796_v44 = vsub.f32 %v6716_v51, %v2312_v56  ;;  %v2335_v45 = vsel %vm227_vm2, %v2325_v42, 0.0  ;;  %v6860_v56 = vpack.c.bf16 %v2772_v26, %v2768_v40  ;;  %v2775_v42 = vld [vmem:[#allocation5 + $0x88] sm:$0xff]  ;;  %v2800_v40 = vld [vmem:[#allocation5 + $0x150] sm:$0xff] }
0x298e   :  { %2336 = vadd.xlane.f32.xlu0 %v2335_v45  ;;  %v2304_v47 = vpop.xlane.xlu1 %2303  ;;  %v2779_v45 = vld [vmem:[#allocation5 + $0xa8] sm:$0xff]  ;;  %v2804_v26 = vld [vmem:[#allocation5 + $0x170] sm:$0xff] }
0x298f   :  { %v2314_v21 = vmul.f32 0.03125, %v2304_v47  ;;  %v2328_v49 = vmul.f32 %v6796_v44, %v6796_v44  ;;  %v6865_v47 = vpack.c.bf16 %v2779_v45, %v2775_v42  ;;  %v2807_v42 = vld [vmem:[#allocation5 + $0x188] sm:$0xff]  ;;  %v6908_v45 = vpack.c.bf16 %v2804_v26, %v2800_v40 }
0x2991   :  { %v6804_v50 = vsub.f32 %v6720_v60, %v2314_v21  ;;  %v2344_v53 = vsel %vm227_vm2, %v2328_v49, 0.0  ;;  %v2774_v21 = vld [vmem:[#allocation5 + $0x80] sm:$0xff] }
0x2992   :  { %2342 = vadd.xlane.f32.xlu0 %v2341_v48  ;;  %2345 = vadd.xlane.f32.xlu1 %v2344_v53  ;;  %v2778_v49 = vld [vmem:[#allocation5 + $0xa0] sm:$0xff]  ;;  %v2781_v48 = vld [vmem:[#allocation5 + $0xb8] sm:$0xff] }
0x2993   :  { %v2330_v51 = vmul.f32 %v6804_v50, %v6804_v50  ;;  %v6867_v53 = vpack.c.bf16 %v2778_v49, %v2774_v21  ;;  %v6869_v57 = vpack.c.bf16 %v2781_v48, %v2777_v46  ;;  %v2811_v46 = vld [vmem:[#allocation5 + $0x1a8] sm:$0xff]  ;;  %v2806_v21 = vld [vmem:[#allocation5 + $0x180] sm:$0xff] }
0x2994   :  { %v2810_v49 = vld [vmem:[#allocation5 + $0x1a0] sm:$0xff]  ;;  %v6912_v48 = vpack.c.bf16 %v2811_v46, %v2807_v42 }
0x2995   :  { %v2350_v39 = vsel %vm227_vm2, %v2330_v51, 0.0  ;;  %v2776_v51 = vld [vmem:[#allocation5 + $0x90] sm:$0xff] }
0x2996   :  { %2348 = vadd.xlane.f32.xlu0 %v2347_v55  ;;  %2351 = vadd.xlane.f32.xlu1 %v2350_v39  ;;  %v2780_v55 = vld [vmem:[#allocation5 + $0xb0] sm:$0xff] }
0x2997   :  { %v6872_v39 = vpack.c.bf16 %v2780_v55, %v2776_v51  ;;  %v6914_v51 = vpack.c.bf16 %v2810_v49, %v2806_v21  ;;  %v2809_v55 = vld [vmem:[#allocation5 + $0x198] sm:$0xff] }
0x29a1   :  { %v2334_v60 = vpop.xlane.xlu1 %2333 }
0x29a2   :  { %v2356_v63 = vmul.f32 0.03125, %v2334_v60  ;;  %v2783_v60 = vld [vmem:[#allocation5 + $0xc8] sm:$0xff] }
0x29a4   :  { %v2364_v2 = vadd.f32 1e-05, %v2356_v63  ;;  %v2787_v63 = vld [vmem:[#allocation5 + $0xe8] sm:$0xff] }
0x29a5   :  { %v2340_v3 = vpop.xlane.xlu1 %2339 }
0x29a6   :  { %6030 = vrsqrt.f32 %v2364_v2  ;;  %v2358_v37 = vmul.f32 0.03125, %v2340_v3  ;;  %v2785_v2 = vld [vmem:[#allocation5 + $0xd8] sm:$0xff]  ;;  %v6877_v3 = vpack.c.bf16 %v2787_v63, %v2783_v60  ;;  %v2808_v63 = vld [vmem:[#allocation5 + $0x190] sm:$0xff] }
0x29a7   :  { %v2813_v60 = vld [vmem:[#allocation5 + $0x1b8] sm:$0xff] }
0x29a8   :  { %v2366_v4 = vadd.f32 1e-05, %v2358_v37  ;;  %v2782_v37 = vld [vmem:[#allocation5 + $0xc0] sm:$0xff] }
0x29aa   :  { %6032 = vrsqrt.f32 %v2366_v4  ;;  %v2786_v4 = vld [vmem:[#allocation5 + $0xe0] sm:$0xff] }
0x29b0   :  { %v6031_v19 = vpop.eup %6030 }
0x29b1   :  { %v2380_v54 = vmul.f32 %v6031_v19, %v6724_v15  ;;  %v2789_v19 = vld [vmem:[#allocation5 + $0xf8] sm:$0xff] }
0x29b3   :  { %v2395_v5 = vmul.f32 %v6817_v8, %v2380_v54  ;;  %v6879_v54 = vpack.c.bf16 %v2786_v4, %v2782_v37  ;;  %v2812_v37 = vld [vmem:[#allocation5 + $0x1b0] sm:$0xff]  ;;  %v2815_v4 = vld [vmem:[#allocation5 + $0x1c8] sm:$0xff] }
0x29b4   :  { %v6033_v7 = vpop.eup %6032 }
0x29b5   :  { %v2410_v9 = vadd.f32 %v6823_v6, %v2395_v5  ;;  %v2382_v12 = vmul.f32 %v6033_v7, %v6728_v0  ;;  %v6881_v5 = vpack.c.bf16 %v2789_v19, %v2785_v2  ;;  %v2784_v7 = vld [vmem:[#allocation5 + $0xd0] sm:$0xff]  ;;  %v6917_v2 = vpack.c.bf16 %v2813_v60, %v2809_v55  ;;  %v2819_v19 = vld [vmem:[#allocation5 + $0x1e8] sm:$0xff] }
0x29b7   :  { %2418 = vst.msk [vmem:[#allocation3] sm:$0xff] %vm227_vm2, %v2410_v9  ;;  %v2397_v10 = vmul.f32 %v6817_v8, %v2382_v12  ;;  %v2788_v9 = vld [vmem:[#allocation5 + $0xf0] sm:$0xff] }
0x29b8   :  { %v6884_v12 = vpack.c.bf16 %v2788_v9, %v2784_v7  ;;  %v6920_v7 = vpack.c.bf16 %v2812_v37, %v2808_v63  ;;  %v6922_v9 = vpack.c.bf16 %v2819_v19, %v2815_v4 }
0x29b9   :  { %v2412_v11 = vadd.f32 %v6823_v6, %v2397_v10  ;;  %v2791_v10 = vld [vmem:[#allocation5 + $0x108] sm:$0xff] }
0x29bb   :  { %2420 = vst.msk [vmem:[#allocation3 + $0x10] sm:$0xff] %vm227_vm2, %v2412_v11  ;;  %v2795_v11 = vld [vmem:[#allocation5 + $0x128] sm:$0xff] }
0x29be   :  { %v2426_v15 = vld [vmem:[#allocation3] sm:$0xff] }
0x29bf   :  { %4808 = vmatmul.mubr.msk.f32.vlgmr.msra.gmra.mrb[28].mxu0 %vm227_vm2, %v2426_v15  ;;  %4816 = vmatmul.mubr.msk.f32.vlgmr.msra.gmra.mrb[20].mxu1 %vm227_vm2, %v2426_v15  ;;  %v2793_v15 = vld [vmem:[#allocation5 + $0x118] sm:$0xff] }
0x29c0   :  { %2566 = vmatprep.mubr.f32.mxu0 %v6203_v1  ;;  %2679 = vmatprep.mubr.f32.mxu1 %v6203_v1 }
0x29c1   :  { %5303 = vmatpush1.bf16.msra.mxu0 %v6843_v25  ;;  %5335 = vmatpush1.bf16.msra.mxu1 %v6848_v30 }
0x29c2   :  { %5305 = vmatprep.subr.bf16.mxu0 %v6853_v13 }
0x29c5   :  { %5307 = vmatpush1.bf16.msra.mxu0 %v6855_v35 }
0x29c6   :  { %5309 = vmatprep.subr.bf16.mxu0 %v6865_v47 }
0x29c9   :  { %5311 = vmatpush1.bf16.msra.mxu0 %v6867_v53 }
0x29ca   :  { %5313 = vmatprep.subr.bf16.mxu0 %v6877_v3 }
0x29cd   :  { %5315 = vmatpush1.bf16.msra.mxu0 %v6879_v54 }
0x29de   :  { %v2307_v59 = vpop.xlane.xlu0 %2306 }
0x29df   :  { %v2315_v14 = vmul.f32 0.03125, %v2307_v59  ;;  %v6889_v59 = vpack.c.bf16 %v2795_v11, %v2791_v10  ;;  %v2817_v10 = vld [vmem:[#allocation5 + $0x1d8] sm:$0xff] }
0x29e0   :  { %v2821_v11 = vld [vmem:[#allocation5 + $0x1f8] sm:$0xff] }
0x29e1   :  { %v6836_v0 = vsub.f32 %v2283_v61, %v2315_v14  ;;  %v2769_v61 = vld [vmem:[#allocation5 + $0x58] sm:$0xff]  ;;  %v2790_v14 = vld [vmem:[#allocation5 + $0x100] sm:$0xff]  ;;  %5317 = vmatprep.subr.bf16.mxu0 %v6889_v59 }
0x29e2   :  { %v6857_v36 = vpack.c.bf16 %v2773_v34, %v2769_v61  ;;  %v2802_v61 = vld [vmem:[#allocation5 + $0x160] sm:$0xff]  ;;  %v6905_v34 = vpack.c.bf16 %v2805_v32, %v2801_v29  ;;  %v6205_v29 = vmov 0  }
0x29e3   :  { %v2331_v16 = vmul.f32 %v6836_v0, %v6836_v0  ;;  %v6903_v33 = vpack.c.bf16 %v2802_v61, %v2798_v31  ;;  %5884 = vset.pattern.permute.xlu1 %v6205_v29  ;;  %5885 = vset.pattern.permute.xlu0 %v6205_v29  ;;  %v2994_v31 = vsel %vm2993_vm3, 1, %v6205_v29 }
0x29e4   :  { %5337 = vmatprep.subr.bf16.mxu1 %v6857_v36  ;;  %2996 = vperm.xlu1 %5884, %v2994_v31  }
0x29e5   :  { %v2353_v52 = vsel %vm227_vm2, %v2331_v16, 0.0  ;;  %5339 = vmatpush1.bf16.msra.mxu1 %v6860_v56  ;;  %v2794_v16 = vld [vmem:[#allocation5 + $0x120] sm:$0xff] }
0x29e6   :  { %2354 = vadd.xlane.f32.xlu0 %v2353_v52  ;;  %5341 = vmatprep.subr.bf16.mxu1 %v6869_v57  ;;  %v2797_v52 = vld [vmem:[#allocation5 + $0x138] sm:$0xff]  ;;  %v6891_v17 = vpack.c.bf16 %v2794_v16, %v2790_v14  ;;  %v2818_v14 = vld [vmem:[#allocation5 + $0x1e0] sm:$0xff]  ;;  %v6928_v16 = vpack.c.bf16 %v2821_v11, %v2817_v10 }
0x29e7   :  { %v6893_v18 = vpack.c.bf16 %v2797_v52, %v2793_v15  ;;  %v2814_v15 = vld [vmem:[#allocation5 + $0x1c0] sm:$0xff]  ;;  %v2816_v52 = vld [vmem:[#allocation5 + $0x1d0] sm:$0xff] }
0x29e8   :  { %5319 = vmatpush1.bf16.msra.mxu0 %v6891_v17  ;;  %v6930_v20 = vpack.c.bf16 %v2818_v14, %v2814_v15  ;;  %v6933_v58 = vpack.c.bf16 %v2820_v23, %v2816_v52 }
0x29e9   :  { %5343 = vmatpush1.bf16.msra.mxu1 %v6872_v39  ;;  %5321 = vmatprep.subr.bf16.mxu0 %v6901_v62 }
0x29ea   :  { %5345 = vmatprep.subr.bf16.mxu1 %v6881_v5 }
0x29ec   :  { %5323 = vmatpush1.bf16.msra.mxu0 %v6903_v33 }
0x29ed   :  { %5347 = vmatpush1.bf16.msra.mxu1 %v6884_v12  ;;  %5325 = vmatprep.subr.bf16.mxu0 %v6912_v48 }
0x29ee   :  { %5349 = vmatprep.subr.bf16.mxu1 %v6893_v18 }
0x29f0   :  { %5327 = vmatpush1.bf16.msra.mxu0 %v6914_v51 }
0x29f1   :  { %5351 = vmatpush1.bf16.msra.mxu1 %v6896_v24  ;;  %5329 = vmatprep.subr.bf16.mxu0 %v6922_v9 }
0x29f2   :  { %5353 = vmatprep.subr.bf16.mxu1 %v6905_v34 }
0x29f4   :  { %5331 = vmatpush1.bf16.msra.mxu0 %v6930_v20 }
0x29f5   :  { %5355 = vmatpush1.bf16.msra.mxu1 %v6908_v45  ;;  %5365 = vmatprep.subr.bf16.mxu0 %v6841_v22 }
0x29f6   :  { %5357 = vmatprep.subr.bf16.mxu1 %v6917_v2 }
0x29f9   :  { %5359 = vmatpush1.bf16.msra.mxu1 %v6920_v7 }
0x29fa   :  { %5361 = vmatprep.subr.bf16.mxu1 %v6928_v16 }
0x29fd   :  { %5363 = vmatpush1.bf16.msra.mxu1 %v6933_v58 }
0x29fe   :  { %5397 = vmatprep.subr.bf16.mxu1 %v6845_v27 }
0x2a1b   :  { %v2337_v61 = vpop.xlane.xlu0 %2336 }
0x2a1c   :  { %v2357_v32 = vmul.f32 0.03125, %v2337_v61 }
0x2a1e   :  { %v2365_v40 = vadd.f32 1e-05, %v2357_v32 }
0x2a1f   :  { %v2343_v26 = vpop.xlane.xlu0 %2342  ;;  %v2346_v42 = vpop.xlane.xlu1 %2345 }
0x2a20   :  { %6034 = vrsqrt.f32 %v2365_v40  ;;  %v2359_v46 = vmul.f32 0.03125, %v2343_v26  ;;  %v2360_v21 = vmul.f32 0.03125, %v2346_v42 }
0x2a22   :  { %v2367_v49 = vadd.f32 1e-05, %v2359_v46  ;;  %v2368_v55 = vadd.f32 1e-05, %v2360_v21 }
0x2a23   :  { %v2349_v60 = vpop.xlane.xlu0 %2348  ;;  %v2352_v63 = vpop.xlane.xlu1 %2351 }
0x2a24   :  { %6036 = vrsqrt.f32 %v2367_v49  ;;  %v2361_v37 = vmul.f32 0.03125, %v2349_v60  ;;  %v2362_v4 = vmul.f32 0.03125, %v2352_v63 }
0x2a25   :  { %6038 = vrsqrt.f32 %v2368_v55 }
0x2a26   :  { %v2369_v19 = vadd.f32 1e-05, %v2361_v37  ;;  %v2370_v10 = vadd.f32 1e-05, %v2362_v4 }
0x2a28   :  { %6040 = vrsqrt.f32 %v2369_v19 }
0x2a29   :  { %6042 = vrsqrt.f32 %v2370_v10 }
0x2a2a   :  { %v6035_v11 = vpop.eup %6034 }
0x2a2b   :  { %v2381_v15 = vmul.f32 %v6035_v11, %v6788_v41 }
0x2a2d   :  { %v2396_v14 = vmul.f32 %v6817_v8, %v2381_v15 }
0x2a2e   :  { %v6037_v52 = vpop.eup %6036 }
0x2a2f   :  { %v6039_v23 = vpop.eup %6038  ;;  %v2411_v28 = vadd.f32 %v6823_v6, %v2396_v14  ;;  %v2383_v31 = vmul.f32 %v6037_v52, %v6785_v38 }
0x2a30   :  { %v2384_v61 = vmul.f32 %v6039_v23, %v6796_v44 }
0x2a31   :  { %2419 = vst.msk [vmem:[#allocation3 + $0x8] sm:$0xff] %vm227_vm2, %v2411_v28  ;;  %v2398_v32 = vmul.f32 %v6817_v8, %v2383_v31 }
0x2a32   :  { %v6041_v40 = vpop.eup %6040  ;;  %v2399_v26 = vmul.f32 %v6817_v8, %v2384_v61 }
0x2a33   :  { %v6043_v42 = vpop.eup %6042  ;;  %v2413_v41 = vadd.f32 %v6823_v6, %v2398_v32  ;;  %v2385_v46 = vmul.f32 %v6041_v40, %v6793_v43  ;;  %v2428_v43 = vld [vmem:[#allocation3 + $0x10] sm:$0xff]  ;;  %v2450_v40 = vld [vmem:[%s7424_s13] sm:$0xf] }
0x2a34   :  { %v2414_v21 = vadd.f32 %v6823_v6, %v2399_v26  ;;  %v2386_v49 = vmul.f32 %v6043_v42, %v6804_v50 }
0x2a35   :  { %2421 = vst.msk [vmem:[#allocation3 + $0x18] sm:$0xff] %vm227_vm2, %v2413_v41  ;;  %v2400_v38 = vmul.f32 %v6817_v8, %v2385_v46 }
0x2a36   :  { %2422 = vst.msk [vmem:[#allocation3 + $0x20] sm:$0xff] %vm227_vm2, %v2414_v21  ;;  %v2401_v44 = vmul.f32 %v6817_v8, %v2386_v49 }
0x2a37   :  { %v2415_v55 = vadd.f32 %v6823_v6, %v2400_v38 }
0x2a38   :  { %v2416_v60 = vadd.f32 %v6823_v6, %v2401_v44  ;;  %v2427_v63 = vld [vmem:[#allocation3 + $0x8] sm:$0xff] }
0x2a39   :  { %2423 = vst.msk [vmem:[#allocation3 + $0x28] sm:$0xff] %vm227_vm2, %v2415_v55  ;;  %4809 = vmatmul.mubr.msk.f32.gmra.mrb[30].mxu0 %vm227_vm2, %v2427_v63  ;;  %4817 = vmatmul.mubr.msk.f32.gmra.mrb[22].mxu1 %vm227_vm2, %v2427_v63 }
0x2a3a   :  { %2424 = vst.msk [vmem:[#allocation3 + $0x30] sm:$0xff] %vm227_vm2, %v2416_v60  ;;  %2572 = vmatprep.mubr.f32.mxu0 %v6203_v1  ;;  %2685 = vmatprep.mubr.f32.mxu1 %v6203_v1 }
0x2a3c   :  { %v2429_v50 = vld [vmem:[#allocation3 + $0x18] sm:$0xff] }
0x2a3d   :  { %4810 = vmatmul.mubr.msk.f32.gmra.mrb[32].mxu0 %vm227_vm2, %v2428_v43  ;;  %4818 = vmatmul.mubr.msk.f32.gmra.mrb[24].mxu1 %vm227_vm2, %v2428_v43  ;;  %v2430_v37 = vld [vmem:[#allocation3 + $0x20] sm:$0xff] }
0x2a3e   :  { %2578 = vmatprep.mubr.f32.mxu0 %v6203_v1  ;;  %2691 = vmatprep.mubr.f32.mxu1 %v6203_v1 }
0x2a40   :  { %v2431_v4 = vld [vmem:[#allocation3 + $0x28] sm:$0xff] }
0x2a41   :  { %4811 = vmatmul.mubr.msk.f32.gmra.mrb[34].mxu0 %vm227_vm2, %v2429_v50  ;;  %4819 = vmatmul.mubr.msk.f32.gmra.mrb[26].mxu1 %vm227_vm2, %v2429_v50  ;;  %v2432_v19 = vld [vmem:[#allocation3 + $0x30] sm:$0xff] }
0x2a42   :  { %2584 = vmatprep.mubr.f32.mxu0 %v6203_v1  ;;  %2697 = vmatprep.mubr.f32.mxu1 %v6203_v1 }
0x2a45   :  { %4812 = vmatmul.mubr.msk.f32.gmra.mrb[36].mxu0 %vm227_vm2, %v2430_v37  ;;  %4820 = vmatmul.mubr.msk.f32.gmra.mrb[28].mxu1 %vm227_vm2, %v2430_v37 }
0x2a46   :  { %2590 = vmatprep.mubr.f32.mxu0 %v6203_v1  ;;  %2703 = vmatprep.mubr.f32.mxu1 %v6203_v1 }
0x2a49   :  { %4813 = vmatmul.mubr.msk.f32.gmra.mrb[38].mxu0 %vm227_vm2, %v2431_v4  ;;  %4821 = vmatmul.mubr.msk.f32.gmra.mrb[30].mxu1 %vm227_vm2, %v2431_v4 }
0x2a4a   :  { %2596 = vmatprep.mubr.f32.mxu0 %v6203_v1  ;;  %2709 = vmatprep.mubr.f32.mxu1 %v6203_v1 }
0x2a4d   :  { %4814 = vmatmul.mubr.msk.f32.gmra.mrb[40].mxu0 %vm227_vm2, %v2432_v19  ;;  %4822 = vmatmul.mubr.msk.f32.gmra.mrb[32].mxu1 %vm227_vm2, %v2432_v19 }
0x2a4e   :  { %2602 = vmatprep.mubr.f32.mxu0 %v6203_v1  ;;  %2715 = vmatprep.mubr.f32.mxu1 %v6203_v1 }
0x2a73   :  { %v2355_v10 = vpop.xlane.xlu0 %2354 }
0x2a74   :  { %v2363_v11 = vmul.f32 0.03125, %v2355_v10 }
0x2a76   :  { %v2371_v15 = vadd.f32 1e-05, %v2363_v11 }
0x2a78   :  { %6044 = vrsqrt.f32 %v2371_v15 }
0x2a82   :  { %v6045_v14 = vpop.eup %6044 }
0x2a83   :  { %v2387_v52 = vmul.f32 %v6045_v14, %v6836_v0  ;;  %v2452_v0 = vlaneseq }
0x2a85   :  { %v2402_v23 = vmul.f32 %v6817_v8, %v2387_v52  ;;  %v4830_v8 = vld [vmem:[%s7425_s14 + $0x8] sm:$0xff]  ;;  %v2453_v61 = vshrl.u32 %v2452_v0, 7 }
0x2a86   :  { %vm3241_vm4 = vcmp.ne.s32.totalorder %v4830_v8, 0 }
0x2a87   :  { %v2417_v28 = vadd.f32 %v6823_v6, %v2402_v23  ;;  %v3242_v6 = vsel %vm3241_vm4, 1, %v6205_v29  ;;  %v2454_v32 = vsub.s32 0, %v2453_v61  ;;  %v2458_v26 = vsub.s32 1, %v2453_v61 }
0x2a88   :  { %3244 = vperm.xlu0 %5885, %v3242_v6   ;;  %v2466_v49 = vsub.s32 3, %v2453_v61  ;;  %v2462_v37 = vsub.s32 2, %v2453_v61 }
0x2a89   :  { %2425 = vst.msk [vmem:[#allocation3 + $0x38] sm:$0xff] %vm227_vm2, %v2417_v28  ;;  %v7040_v42 = vrot.slane %v2450_v40, %v2454_v32  ;;  %v7042_v41 = vrot.slane %v2450_v40, %v2458_v26  ;;  %v2997_v26 = vpop.permute.xlu1 %2996 }
0x2a8a   :  { %v7046_v50 = vrot.slane %v2450_v40, %v2466_v49  ;;  %v7049_v19 = vrot.slane %v2450_v40, %v2462_v37  ;;  %vm2998_vm5 = vcmp.eq.s32.totalorder %v2997_v26, 1 }
0x2a90   :  { %v2433_v31 = vld [vmem:[#allocation3 + $0x38] sm:$0xff] }
0x2a91   :  { %4815 = vmatmul.mubr.msk.f32.gmra.mrb[42].mxu0 %vm227_vm2, %v2433_v31  ;;  %4823 = vmatmul.mubr.msk.f32.gmra.mrb[34].mxu1 %vm227_vm2, %v2433_v31 }
0x2a92   :  { %2886 = vmatprep.mubr.f32.mxu0 %v6203_v1  ;;  %2957 = vmatprep.mubr.f32.mxu1 %v6203_v1 }
0x2a95   :  { %2887 = vmatmul.mubr.f32.vlgmr.msra.gmra.mrb[28].mxu0 %v6203_v1  ;;  %2958 = vmatmul.mubr.f32.vlgmr.msra.gmra.mrb[20].mxu1 %v6203_v1 }
0x2a96   :  { %5367 = vmatpush1.bf16.msra.mxu0 %v6843_v25  ;;  %5399 = vmatpush1.bf16.msra.mxu1 %v6848_v30 }
0x2a97   :  { %5369 = vmatprep.subr.bf16.mxu0 %v6853_v13  ;;  %5401 = vmatprep.subr.bf16.mxu1 %v6857_v36 }
0x2a98   :  { %3133 = vmatprep.mubr.f32.mxu0 %v6203_v1  ;;  %3204 = vmatprep.mubr.f32.mxu1 %v6203_v1 }
0x2a9a   :  { %5371 = vmatpush1.bf16.msra.mxu0 %v6855_v35  ;;  %5403 = vmatpush1.bf16.msra.mxu1 %v6860_v56 }
0x2a9b   :  { %5373 = vmatprep.subr.bf16.mxu0 %v6865_v47  ;;  %5405 = vmatprep.subr.bf16.mxu1 %v6869_v57 }
0x2a9e   :  { %5375 = vmatpush1.bf16.msra.mxu0 %v6867_v53  ;;  %5407 = vmatpush1.bf16.msra.mxu1 %v6872_v39 }
0x2a9f   :  { %5377 = vmatprep.subr.bf16.mxu0 %v6877_v3  ;;  %5409 = vmatprep.subr.bf16.mxu1 %v6881_v5 }
0x2aa2   :  { %5379 = vmatpush1.bf16.msra.mxu0 %v6879_v54  ;;  %5411 = vmatpush1.bf16.msra.mxu1 %v6884_v12 }
0x2aa3   :  { %5381 = vmatprep.subr.bf16.mxu0 %v6889_v59  ;;  %5413 = vmatprep.subr.bf16.mxu1 %v6893_v18 }
0x2aa6   :  { %5383 = vmatpush1.bf16.msra.mxu0 %v6891_v17  ;;  %5415 = vmatpush1.bf16.msra.mxu1 %v6896_v24 }
0x2aa7   :  { %5385 = vmatprep.subr.bf16.mxu0 %v6901_v62  ;;  %5417 = vmatprep.subr.bf16.mxu1 %v6905_v34 }
0x2aaa   :  { %5387 = vmatpush1.bf16.msra.mxu0 %v6903_v33  ;;  %5419 = vmatpush1.bf16.msra.mxu1 %v6908_v45 }
0x2aab   :  { %5389 = vmatprep.subr.bf16.mxu0 %v6912_v48  ;;  %5421 = vmatprep.subr.bf16.mxu1 %v6917_v2 }
0x2aae   :  { %5391 = vmatpush1.bf16.msra.mxu0 %v6914_v51  ;;  %5423 = vmatpush1.bf16.msra.mxu1 %v6920_v7 }
0x2aaf   :  { %5393 = vmatprep.subr.bf16.mxu0 %v6922_v9  ;;  %5425 = vmatprep.subr.bf16.mxu1 %v6928_v16 }
0x2ab2   :  { %5395 = vmatpush1.bf16.msra.mxu0 %v6930_v20  ;;  %5427 = vmatpush1.bf16.msra.mxu1 %v6933_v58 }
0x2ab3   :  { %5429 = vmatprep.subr.bf16.mxu0 %v6841_v22  ;;  %5461 = vmatprep.subr.bf16.mxu1 %v6845_v27 }
0x2b68   :  { %v2888_v46 = vpop.f32.mrb[28].mxu0  ;;  %v2959_v21 = vpop.f32.mrb[20].mxu1 }
0x2b69   :  { %v5812_v38 = vadd.f32 %v2888_v46, %v7040_v42  ;;  %v2890_v44 = vpop.f32.mrb[29].mxu0  ;;  %v2961_v55 = vpop.f32.mrb[21].mxu1  ;;  %v5828_v11 = vadd.f32 %v2959_v21, %v7049_v19 }
0x2b6a   :  { %v5813_v60 = vadd.f32 %v2890_v44, %v7042_v41  ;;  %v5829_v4 = vadd.f32 %v2961_v55, %v7046_v50 }
0x2b6b   :  { %v4824_v63 = vmul.f32 -1.442695, %v5812_v38 }
0x2b6c   :  { %v4825_v43 = vmul.f32 -1.442695, %v5813_v60  ;;  %v4826_v10 = vmul.f32 -1.442695, %v5829_v4 }
0x2b6d   :  { %6046 = vpow2.f32 %v4824_v63 }
0x2b6e   :  { %6048 = vpow2.f32 %v4825_v43 }
0x2b6f   :  { %6050 = vpow2.f32 %v4826_v10 }
0x2b70   :  { %6052 = vtanh.f32 %v5828_v11 }
0x2b77   :  { %v6047_v15 = vpop.eup %6046 }
0x2b78   :  { %v6049_v14 = vpop.eup %6048  ;;  %v2971_v52 = vadd.f32 1.0, %v6047_v15 }
0x2b79   :  { %v2977_v23 = vadd.f32 1.0, %v6049_v14  ;;  %v6051_v28 = vpop.eup %6050 }
0x2b7a   :  { %6054 = vrcp.f32 %v2971_v52  ;;  %v6053_v31 = vpop.eup %6052  ;;  %v2984_v61 = vadd.f32 1.0, %v6051_v28 }
0x2b7b   :  { %6056 = vrcp.f32 %v2977_v23 }
0x2b7c   :  { %6058 = vrcp.f32 %v2984_v61 }
0x2b84   :  { %v6055_v8 = vpop.eup %6054 }
0x2b85   :  { %v6057_v6 = vpop.eup %6056  ;;  %v2988_v0 = vmul.f32 %v6055_v8, %v6053_v31 }
0x2b86   :  { %v2987_v32 = vmul.f32 0.0, %v6057_v6  ;;  %v6059_v46 = vpop.eup %6058  ;;  %v3245_v6 = vpop.permute.xlu0 %3244 }
0x2b87   :  { %vm3246_vm7 = vcmp.eq.s32.totalorder %v3245_v6, 1  ;;  %v3755_v6 = vld [vmem:[#allocation5 + $0x18] sm:$0xff] }
0x2b88   :  { %v7052_v40 = vadd.f32 %v2988_v0, %v2987_v32 }
0x2b8a   :  { %6060 = vtanh.f32 %v7052_v40 }
0x2b94   :  { %v6061_v21 = vpop.eup %6060 }
0x2b95   :  { %v2991_v49 = vmul.f32 %v6061_v21, %v6059_v46  ;;  %v3555_v46 = vld [vmem:[#allocation5 + $0x1a0] sm:$0xff] }
0x2b97   :  { %v2999_v38 = vsel %vm2998_vm5, %v2991_v49, -inf  ;;  %3134 = vmatmul.mubr.f32.vlgmr.msra.gmra.mrb[30].mxu0 %v2991_v49  ;;  %3205 = vmatmul.mubr.f32.vlgmr.msra.gmra.mrb[22].mxu1 %v2991_v49 }
0x2b98   :  { %3000 = vst [vmem:[%s7426_s15] sm:$0xff] %v2999_v38  ;;  %5431 = vmatpush1.bf16.msra.mxu0 %v6843_v25  ;;  %5463 = vmatpush1.bf16.msra.mxu1 %v6848_v30  ;;  %v4835_v25 = vld [vmem:[%s7425_s14 + $0x10] sm:$0xff] }
0x2b99   :  { %5433 = vmatprep.subr.bf16.mxu0 %v6853_v13  ;;  %5465 = vmatprep.subr.bf16.mxu1 %v6857_v36  ;;  %vm3490_vm6 = vcmp.ne.s32.totalorder %v4835_v25, 0 }
0x2b9a   :  { %3382 = vmatprep.mubr.f32.mxu0 %v6203_v1  ;;  %3453 = vmatprep.mubr.f32.mxu1 %v6203_v1 }
0x2b9c   :  { %5435 = vmatpush1.bf16.msra.mxu0 %v6855_v35  ;;  %5467 = vmatpush1.bf16.msra.mxu1 %v6860_v56  ;;  %v3491_v35 = vsel %vm3490_vm6, 1, %v6205_v29 }
0x2b9d   :  { %5437 = vmatprep.subr.bf16.mxu0 %v6865_v47  ;;  %5469 = vmatprep.subr.bf16.mxu1 %v6869_v57 }
0x2b9e   :  { %3493 = vperm.xlu1 %5884, %v3491_v35  }
0x2ba0   :  { %5439 = vmatpush1.bf16.msra.mxu0 %v6867_v53  ;;  %5471 = vmatpush1.bf16.msra.mxu1 %v6872_v39 }
0x2ba1   :  { %5441 = vmatprep.subr.bf16.mxu0 %v6877_v3  ;;  %5473 = vmatprep.subr.bf16.mxu1 %v6881_v5 }
0x2ba4   :  { %5443 = vmatpush1.bf16.msra.mxu0 %v6879_v54  ;;  %5475 = vmatpush1.bf16.msra.mxu1 %v6884_v12 }
0x2ba5   :  { %5445 = vmatprep.subr.bf16.mxu0 %v6889_v59  ;;  %5477 = vmatprep.subr.bf16.mxu1 %v6893_v18 }
0x2ba8   :  { %5447 = vmatpush1.bf16.msra.mxu0 %v6891_v17  ;;  %5479 = vmatpush1.bf16.msra.mxu1 %v6896_v24 }
0x2ba9   :  { %5449 = vmatprep.subr.bf16.mxu0 %v6901_v62  ;;  %5481 = vmatprep.subr.bf16.mxu1 %v6905_v34 }
0x2bac   :  { %5451 = vmatpush1.bf16.msra.mxu0 %v6903_v33  ;;  %5483 = vmatpush1.bf16.msra.mxu1 %v6908_v45 }
0x2bad   :  { %5453 = vmatprep.subr.bf16.mxu0 %v6912_v48  ;;  %5485 = vmatprep.subr.bf16.mxu1 %v6917_v2 }
0x2bb0   :  { %5455 = vmatpush1.bf16.msra.mxu0 %v6914_v51  ;;  %5487 = vmatpush1.bf16.msra.mxu1 %v6920_v7 }
0x2bb1   :  { %5457 = vmatprep.subr.bf16.mxu0 %v6922_v9  ;;  %5489 = vmatprep.subr.bf16.mxu1 %v6928_v16 }
0x2bb4   :  { %5459 = vmatpush1.bf16.msra.mxu0 %v6930_v20  ;;  %5491 = vmatpush1.bf16.msra.mxu1 %v6933_v58 }
0x2bb5   :  { %5493 = vmatprep.subr.bf16.mxu0 %v6841_v22  ;;  %5525 = vmatprep.subr.bf16.mxu1 %v6845_v27 }
0x2c6a   :  { %v3135_v53 = vpop.f32.mrb[30].mxu0  ;;  %v3206_v54 = vpop.f32.mrb[22].mxu1 }
0x2c6b   :  { %v5814_v17 = vadd.f32 %v3135_v53, %v7040_v42  ;;  %v3137_v33 = vpop.f32.mrb[31].mxu0  ;;  %v3208_v51 = vpop.f32.mrb[23].mxu1  ;;  %v5830_v63 = vadd.f32 %v3206_v54, %v7049_v19 }
0x2c6c   :  { %v5815_v44 = vadd.f32 %v3137_v33, %v7042_v41  ;;  %v5831_v27 = vadd.f32 %v3208_v51, %v7046_v50 }
0x2c6d   :  { %v4827_v55 = vmul.f32 -1.442695, %v5814_v17 }
0x2c6e   :  { %v4828_v22 = vmul.f32 -1.442695, %v5815_v44  ;;  %v4829_v60 = vmul.f32 -1.442695, %v5831_v27 }
0x2c6f   :  { %6062 = vpow2.f32 %v4827_v55 }
0x2c70   :  { %6064 = vpow2.f32 %v4828_v22 }
0x2c71   :  { %6066 = vpow2.f32 %v4829_v60 }
0x2c72   :  { %6068 = vtanh.f32 %v5830_v63 }
0x2c79   :  { %v6063_v43 = vpop.eup %6062 }
0x2c7a   :  { %v6065_v37 = vpop.eup %6064  ;;  %v3218_v4 = vadd.f32 1.0, %v6063_v43 }
0x2c7b   :  { %v3224_v10 = vadd.f32 1.0, %v6065_v37  ;;  %v6067_v11 = vpop.eup %6066 }
0x2c7c   :  { %6070 = vrcp.f32 %v3218_v4  ;;  %v6069_v15 = vpop.eup %6068  ;;  %v3231_v28 = vadd.f32 1.0, %v6067_v11 }
0x2c7d   :  { %6072 = vrcp.f32 %v3224_v10 }
0x2c7e   :  { %6074 = vrcp.f32 %v3231_v28 }
0x2c86   :  { %v6071_v14 = vpop.eup %6070 }
0x2c87   :  { %v6073_v52 = vpop.eup %6072  ;;  %v3235_v23 = vmul.f32 %v6071_v14, %v6069_v15  ;;  %v3494_v15 = vpop.permute.xlu1 %3493 }
0x2c88   :  { %v3234_v31 = vmul.f32 %v6073_v52, %v7052_v40  ;;  %v6075_v0 = vpop.eup %6074  ;;  %vm3495_vm9 = vcmp.eq.s32.totalorder %v3494_v15, 1  ;;  %v3793_v15 = vld [vmem:[#allocation5 + $0x148] sm:$0xff] }
0x2c8a   :  { %v7101_v8 = vadd.f32 %v3235_v23, %v3234_v31  ;;  %v3753_v31 = vld [vmem:[#allocation5 + $0x8] sm:$0xff] }
0x2c8c   :  { %6076 = vtanh.f32 %v7101_v8 }
0x2c96   :  { %v6077_v61 = vpop.eup %6076 }
0x2c97   :  { %v3238_v32 = vmul.f32 %v6077_v61, %v6075_v0  ;;  %v3759_v61 = vld [vmem:[#allocation5 + $0x38] sm:$0xff] }
0x2c99   :  { %v3247_v26 = vsel %vm3246_vm7, %v3238_v32, -inf  ;;  %3383 = vmatmul.mubr.f32.vlgmr.msra.gmra.mrb[32].mxu0 %v3238_v32  ;;  %3454 = vmatmul.mubr.f32.vlgmr.msra.gmra.mrb[24].mxu1 %v3238_v32  ;;  %v3754_v32 = vld [vmem:[#allocation5 + $0x10] sm:$0xff] }
0x2c9a   :  { %4831 = vst [vmem:[%s7426_s15 + $0x8] sm:$0xff] %v3247_v26  ;;  %5527 = vmatpush1.bf16.msra.mxu1 %v6848_v30  ;;  %3631 = vmatprep.mubr.f32.mxu0 %v6203_v1  ;;  %v3503_v30 = vld [vmem:[#allocation5] sm:$0xff]  ;;  %v3758_v26 = vld [vmem:[#allocation5 + $0x30] sm:$0xff] }
0x2c9b   :  { %5529 = vmatprep.subr.bf16.mxu1 %v6857_v36  ;;  %3702 = vmatprep.mubr.f32.mxu1 %v6203_v1  ;;  %v3507_v36 = vld [vmem:[#allocation5 + $0x20] sm:$0xff] }
0x2c9e   :  { %5531 = vmatpush1.bf16.msra.mxu1 %v6860_v56  ;;  %v7124_v56 = vpack.c.bf16 %v3507_v36, %v3503_v30  ;;  %v7172_v30 = vpack.c.bf16 %v3759_v61, %v3755_v6  ;;  %v7174_v36 = vpack.c.bf16 %v3758_v26, %v3754_v32  ;;  %v3801_v32 = vld [vmem:[#allocation5 + $0x188] sm:$0xff] }
0x2c9f   :  { %5533 = vmatprep.subr.bf16.mxu1 %v6869_v57  ;;  %v3511_v57 = vld [vmem:[#allocation5 + $0x40] sm:$0xff]  ;;  %v3805_v26 = vld [vmem:[#allocation5 + $0x1a8] sm:$0xff] }
0x2ca0   :  { %5495 = vmatpush1.bf16.msra.mxu0 %v7124_v56 }
0x2ca1   :  { %5497 = vmatprep.subr.bf16.mxu0 %v6853_v13  ;;  %v3535_v13 = vld [vmem:[#allocation5 + $0x100] sm:$0xff] }
0x2ca2   :  { %5535 = vmatpush1.bf16.msra.mxu1 %v6872_v39  ;;  %v3515_v39 = vld [vmem:[#allocation5 + $0x60] sm:$0xff] }
0x2ca3   :  { %5537 = vmatprep.subr.bf16.mxu1 %v6881_v5  ;;  %v7128_v5 = vpack.c.bf16 %v3515_v39, %v3511_v57  ;;  %v3761_v57 = vld [vmem:[#allocation5 + $0x48] sm:$0xff] }
0x2ca4   :  { %v3765_v39 = vld [vmem:[#allocation5 + $0x68] sm:$0xff] }
0x2ca5   :  { %5499 = vmatpush1.bf16.msra.mxu0 %v7128_v5 }
0x2ca6   :  { %5539 = vmatpush1.bf16.msra.mxu1 %v6884_v12  ;;  %5501 = vmatprep.subr.bf16.mxu0 %v6865_v47  ;;  %v3519_v12 = vld [vmem:[#allocation5 + $0x80] sm:$0xff] }
0x2ca7   :  { %5541 = vmatprep.subr.bf16.mxu1 %v6893_v18  ;;  %v3523_v18 = vld [vmem:[#allocation5 + $0xa0] sm:$0xff] }
0x2ca8   :  { %v3543_v47 = vld [vmem:[#allocation5 + $0x140] sm:$0xff] }
0x2caa   :  { %5543 = vmatpush1.bf16.msra.mxu1 %v6896_v24  ;;  %v7132_v24 = vpack.c.bf16 %v3523_v18, %v3519_v12  ;;  %v3763_v12 = vld [vmem:[#allocation5 + $0x58] sm:$0xff]  ;;  %v7180_v18 = vpack.c.bf16 %v3765_v39, %v3761_v57  ;;  %v7227_v39 = vpack.c.bf16 %v3805_v26, %v3801_v32 }
0x2cab   :  { %5545 = vmatprep.subr.bf16.mxu1 %v6905_v34  ;;  %v3527_v34 = vld [vmem:[#allocation5 + $0xc0] sm:$0xff]  ;;  %v3803_v57 = vld [vmem:[#allocation5 + $0x198] sm:$0xff] }
0x2cac   :  { %5503 = vmatpush1.bf16.msra.mxu0 %v7132_v24 }
0x2cad   :  { %5505 = vmatprep.subr.bf16.mxu0 %v6877_v3  ;;  %v3551_v3 = vld [vmem:[#allocation5 + $0x180] sm:$0xff] }
0x2cae   :  { %5547 = vmatpush1.bf16.msra.mxu1 %v6908_v45  ;;  %v3531_v45 = vld [vmem:[#allocation5 + $0xe0] sm:$0xff]  ;;  %v7147_v21 = vpack.c.bf16 %v3555_v46, %v3551_v3  ;;  %v3773_v3 = vld [vmem:[#allocation5 + $0xa8] sm:$0xff]  ;;  %v3771_v46 = vld [vmem:[#allocation5 + $0x98] sm:$0xff] }
0x2caf   :  { %5549 = vmatprep.subr.bf16.mxu1 %v6917_v2  ;;  %v7136_v2 = vpack.c.bf16 %v3531_v45, %v3527_v34  ;;  %v3767_v34 = vld [vmem:[#allocation5 + $0x78] sm:$0xff]  ;;  %v3762_v45 = vld [vmem:[#allocation5 + $0x50] sm:$0xff] }
0x2cb1   :  { %5507 = vmatpush1.bf16.msra.mxu0 %v7136_v2 }
0x2cb2   :  { %5551 = vmatpush1.bf16.msra.mxu1 %v6920_v7  ;;  %5509 = vmatprep.subr.bf16.mxu0 %v6889_v59  ;;  %v3539_v7 = vld [vmem:[#allocation5 + $0x120] sm:$0xff]  ;;  %v4840_v59 = vld [vmem:[%s7425_s14 + $0x18] sm:$0xff] }
0x2cb3   :  { %5553 = vmatprep.subr.bf16.mxu1 %v6928_v16  ;;  %v7140_v16 = vpack.c.bf16 %v3539_v7, %v3535_v13  ;;  %vm3739_vm8 = vcmp.ne.s32.totalorder %v4840_v59, 0  ;;  %v3766_v13 = vld [vmem:[#allocation5 + $0x70] sm:$0xff]  ;;  %v7182_v7 = vpack.c.bf16 %v3767_v34, %v3763_v12  ;;  %v3807_v12 = vld [vmem:[#allocation5 + $0x1b8] sm:$0xff] }
0x2cb4   :  { %v3802_v34 = vld [vmem:[#allocation5 + $0x190] sm:$0xff] }
0x2cb5   :  { %5511 = vmatpush1.bf16.msra.mxu0 %v7140_v16 }
0x2cb6   :  { %5555 = vmatpush1.bf16.msra.mxu1 %v6933_v58  ;;  %v3547_v58 = vld [vmem:[#allocation5 + $0x160] sm:$0xff]  ;;  %5513 = vmatprep.subr.bf16.mxu0 %v6901_v62  ;;  %v3740_v62 = vsel %vm3739_vm8, 1, %v6205_v29 }
0x2cb7   :  { %v7143_v40 = vpack.c.bf16 %v3547_v58, %v3543_v47  ;;  %3742 = vperm.xlu1 %5884, %v3740_v62   ;;  %5589 = vmatprep.subr.bf16.mxu1 %v7172_v30  ;;  %v7184_v47 = vpack.c.bf16 %v3766_v13, %v3762_v45  ;;  %v3769_v58 = vld [vmem:[#allocation5 + $0x88] sm:$0xff]  ;;  %v3775_v62 = vld [vmem:[#allocation5 + $0xb8] sm:$0xff]  ;;  %v3806_v45 = vld [vmem:[#allocation5 + $0x1b0] sm:$0xff]  ;;  %v7230_v13 = vpack.c.bf16 %v3807_v12, %v3803_v57 }
0x2cb8   :  { %v7190_v59 = vpack.c.bf16 %v3773_v3, %v3769_v58  ;;  %v3809_v58 = vld [vmem:[#allocation5 + $0x1c8] sm:$0xff] }
0x2cb9   :  { %5515 = vmatpush1.bf16.msra.mxu0 %v7143_v40  ;;  %v3813_v3 = vld [vmem:[#allocation5 + $0x1e8] sm:$0xff] }
0x2cba   :  { %5517 = vmatprep.subr.bf16.mxu0 %v6912_v48 }
0x2cbd   :  { %5519 = vmatpush1.bf16.msra.mxu0 %v7147_v21 }
0x2cbe   :  { %5521 = vmatprep.subr.bf16.mxu0 %v6922_v9 }
0x2cc1   :  { %5523 = vmatpush1.bf16.msra.mxu0 %v6930_v20 }
0x2d6c   :  { %v3384_v49 = vpop.f32.mrb[32].mxu0  ;;  %v3455_v38 = vpop.f32.mrb[24].mxu1 }
0x2d6d   :  { %v5816_v25 = vadd.f32 %v3384_v49, %v7040_v42  ;;  %v3386_v35 = vpop.f32.mrb[33].mxu0  ;;  %v3457_v48 = vpop.f32.mrb[25].mxu1  ;;  %v5832_v33 = vadd.f32 %v3455_v38, %v7049_v19  ;;  %v3770_v49 = vld [vmem:[#allocation5 + $0x90] sm:$0xff] }
0x2d6e   :  { %v5817_v53 = vadd.f32 %v3386_v35, %v7042_v41  ;;  %v5833_v20 = vadd.f32 %v3457_v48, %v7046_v50  ;;  %v3774_v38 = vld [vmem:[#allocation5 + $0xb0] sm:$0xff]  ;;  %v3777_v48 = vld [vmem:[#allocation5 + $0xc8] sm:$0xff] }
0x2d6f   :  { %v4832_v54 = vmul.f32 -1.442695, %v5816_v25  ;;  %v7192_v25 = vpack.c.bf16 %v3775_v62, %v3771_v46  ;;  %v7194_v35 = vpack.c.bf16 %v3774_v38, %v3770_v49  ;;  %v3811_v46 = vld [vmem:[#allocation5 + $0x1d8] sm:$0xff]  ;;  %v7235_v49 = vpack.c.bf16 %v3806_v45, %v3802_v34 }
0x2d70   :  { %v4833_v9 = vmul.f32 -1.442695, %v5817_v53  ;;  %v4834_v17 = vmul.f32 -1.442695, %v5833_v20  ;;  %v3781_v53 = vld [vmem:[#allocation5 + $0xe8] sm:$0xff]  ;;  %v3783_v20 = vld [vmem:[#allocation5 + $0xf8] sm:$0xff]  ;;  %v7237_v38 = vpack.c.bf16 %v3813_v3, %v3809_v58 }
0x2d71   :  { %6078 = vpow2.f32 %v4832_v54  ;;  %v3779_v54 = vld [vmem:[#allocation5 + $0xd8] sm:$0xff] }
0x2d72   :  { %6080 = vpow2.f32 %v4833_v9  ;;  %v7200_v9 = vpack.c.bf16 %v3781_v53, %v3777_v48  ;;  %v3815_v62 = vld [vmem:[#allocation5 + $0x1f8] sm:$0xff]  ;;  %v3808_v48 = vld [vmem:[#allocation5 + $0x1c0] sm:$0xff] }
0x2d73   :  { %6082 = vpow2.f32 %v4834_v17  ;;  %v3778_v17 = vld [vmem:[#allocation5 + $0xd0] sm:$0xff]  ;;  %v3812_v53 = vld [vmem:[#allocation5 + $0x1e0] sm:$0xff] }
0x2d74   :  { %6084 = vtanh.f32 %v5832_v33  ;;  %v3782_v33 = vld [vmem:[#allocation5 + $0xf0] sm:$0xff] }
0x2d7b   :  { %v6079_v51 = vpop.eup %6078 }
0x2d7c   :  { %v6081_v44 = vpop.eup %6080  ;;  %v3467_v55 = vadd.f32 1.0, %v6079_v51  ;;  %v7202_v51 = vpack.c.bf16 %v3783_v20, %v3779_v54  ;;  %v7240_v54 = vpack.c.bf16 %v3815_v62, %v3811_v46  ;;  %v3810_v20 = vld [vmem:[#allocation5 + $0x1d0] sm:$0xff] }
0x2d7d   :  { %v3473_v22 = vadd.f32 1.0, %v6081_v44  ;;  %v6083_v27 = vpop.eup %6082  ;;  %v7204_v44 = vpack.c.bf16 %v3782_v33, %v3778_v17  ;;  %v3814_v17 = vld [vmem:[#allocation5 + $0x1f0] sm:$0xff]  ;;  %v7243_v33 = vpack.c.bf16 %v3812_v53, %v3808_v48 }
0x2d7e   :  { %6086 = vrcp.f32 %v3467_v55  ;;  %v6085_v60 = vpop.eup %6084  ;;  %v3480_v4 = vadd.f32 1.0, %v6083_v27  ;;  %v3785_v55 = vld [vmem:[#allocation5 + $0x108] sm:$0xff]  ;;  %v3787_v27 = vld [vmem:[#allocation5 + $0x118] sm:$0xff] }
0x2d7f   :  { %6088 = vrcp.f32 %v3473_v22  ;;  %v3789_v22 = vld [vmem:[#allocation5 + $0x128] sm:$0xff] }
0x2d80   :  { %6090 = vrcp.f32 %v3480_v4 }
0x2d88   :  { %v6087_v63 = vpop.eup %6086 }
0x2d89   :  { %v6089_v43 = vpop.eup %6088  ;;  %v3484_v37 = vmul.f32 %v6087_v63, %v6085_v60  ;;  %v7210_v60 = vpack.c.bf16 %v3789_v22, %v3785_v55  ;;  %v3791_v63 = vld [vmem:[#allocation5 + $0x138] sm:$0xff]  ;;  %v7247_v55 = vpack.c.bf16 %v3814_v17, %v3810_v20  ;;  %v4845_v22 = vld [vmem:[%s7425_s14 + $0x20] sm:$0xff] }
0x2d8a   :  { %v3483_v10 = vmul.f32 %v6089_v43, %v7101_v8  ;;  %v6091_v14 = vpop.eup %6090  ;;  %v3757_v8 = vld [vmem:[#allocation5 + $0x28] sm:$0xff]  ;;  %v3786_v43 = vld [vmem:[#allocation5 + $0x110] sm:$0xff]  ;;  %v7212_v4 = vpack.c.bf16 %v3791_v63, %v3787_v27  ;;  %vm3988_vm10 = vcmp.ne.s32.totalorder %v4845_v22, 0  ;;  %v3743_v22 = vpop.permute.xlu1 %3742 }
0x2d8b   :  { %v7170_v0 = vpack.c.bf16 %v3757_v8, %v3753_v31  ;;  %v3794_v31 = vld [vmem:[#allocation5 + $0x150] sm:$0xff]  ;;  %v3989_v27 = vsel %vm3988_vm10, 1, %v6205_v29  ;;  %vm3744_vm11 = vcmp.eq.s32.totalorder %v3743_v22, 1 }
0x2d8c   :  { %v7162_v11 = vadd.f32 %v3484_v37, %v3483_v10  ;;  %v3790_v37 = vld [vmem:[#allocation5 + $0x130] sm:$0xff]  ;;  %3991 = vperm.xlu1 %5884, %v3989_v27  }
0x2d8d   :  { %5557 = vmatprep.subr.bf16.mxu0 %v7170_v0  ;;  %v7214_v10 = vpack.c.bf16 %v3790_v37, %v3786_v43  ;;  %v3798_v8 = vld [vmem:[#allocation5 + $0x170] sm:$0xff] }
0x2d8e   :  { %6092 = vtanh.f32 %v7162_v11  ;;  %v7224_v61 = vpack.c.bf16 %v3798_v8, %v3794_v31 }
0x2d98   :  { %v6093_v52 = vpop.eup %6092 }
0x2d99   :  { %v3487_v23 = vmul.f32 %v6093_v52, %v6091_v14  ;;  %v3797_v14 = vld [vmem:[#allocation5 + $0x168] sm:$0xff]  ;;  %v3795_v52 = vld [vmem:[#allocation5 + $0x158] sm:$0xff] }
0x2d9b   :  { %v3496_v28 = vsel %vm3495_vm9, %v3487_v23, -inf  ;;  %3632 = vmatmul.mubr.f32.vlgmr.msra.gmra.mrb[34].mxu0 %v3487_v23  ;;  %3703 = vmatmul.mubr.f32.vlgmr.msra.gmra.mrb[26].mxu1 %v3487_v23  ;;  %v7219_v23 = vpack.c.bf16 %v3797_v14, %v3793_v15 }
0x2d9c   :  { %4836 = vst [vmem:[%s7426_s15 + $0x10] sm:$0xff] %v3496_v28  ;;  %3880 = vmatprep.mubr.f32.mxu0 %v6203_v1  ;;  %3951 = vmatprep.mubr.f32.mxu1 %v6203_v1  ;;  %v3799_v28 = vld [vmem:[#allocation5 + $0x178] sm:$0xff] }
0x2d9d   :  { %5559 = vmatpush1.bf16.msra.mxu0 %v7124_v56  ;;  %5591 = vmatpush1.bf16.msra.mxu1 %v7174_v36  ;;  %v7222_v6 = vpack.c.bf16 %v3799_v28, %v3795_v52 }
0x2d9e   :  { %5561 = vmatprep.subr.bf16.mxu0 %v7180_v18  ;;  %5593 = vmatprep.subr.bf16.mxu1 %v7182_v7 }
0x2da1   :  { %5563 = vmatpush1.bf16.msra.mxu0 %v7128_v5  ;;  %5595 = vmatpush1.bf16.msra.mxu1 %v7184_v47 }
0x2da2   :  { %5565 = vmatprep.subr.bf16.mxu0 %v7190_v59  ;;  %5597 = vmatprep.subr.bf16.mxu1 %v7192_v25 }
0x2da5   :  { %5567 = vmatpush1.bf16.msra.mxu0 %v7132_v24  ;;  %5599 = vmatpush1.bf16.msra.mxu1 %v7194_v35 }
0x2da6   :  { %5569 = vmatprep.subr.bf16.mxu0 %v7200_v9  ;;  %5601 = vmatprep.subr.bf16.mxu1 %v7202_v51 }
0x2da9   :  { %5571 = vmatpush1.bf16.msra.mxu0 %v7136_v2  ;;  %5603 = vmatpush1.bf16.msra.mxu1 %v7204_v44 }
0x2daa   :  { %5573 = vmatprep.subr.bf16.mxu0 %v7210_v60  ;;  %5605 = vmatprep.subr.bf16.mxu1 %v7212_v4 }
0x2dad   :  { %5575 = vmatpush1.bf16.msra.mxu0 %v7140_v16  ;;  %5607 = vmatpush1.bf16.msra.mxu1 %v7214_v10 }
0x2dae   :  { %5577 = vmatprep.subr.bf16.mxu0 %v7219_v23  ;;  %5609 = vmatprep.subr.bf16.mxu1 %v7222_v6 }
0x2db1   :  { %5579 = vmatpush1.bf16.msra.mxu0 %v7143_v40  ;;  %5611 = vmatpush1.bf16.msra.mxu1 %v7224_v61 }
0x2db2   :  { %5581 = vmatprep.subr.bf16.mxu0 %v7227_v39  ;;  %5613 = vmatprep.subr.bf16.mxu1 %v7230_v13 }
0x2db5   :  { %5583 = vmatpush1.bf16.msra.mxu0 %v7147_v21  ;;  %5615 = vmatpush1.bf16.msra.mxu1 %v7235_v49 }
0x2db6   :  { %5585 = vmatprep.subr.bf16.mxu0 %v7237_v38  ;;  %5617 = vmatprep.subr.bf16.mxu1 %v7240_v54 }
0x2db9   :  { %5587 = vmatpush1.bf16.msra.mxu0 %v7243_v33  ;;  %5619 = vmatpush1.bf16.msra.mxu1 %v7247_v55 }
0x2dba   :  { %5621 = vmatprep.subr.bf16.mxu0 %v7170_v0  ;;  %5653 = vmatprep.subr.bf16.mxu1 %v7172_v30 }
0x2e6e   :  { %v3633_v63 = vpop.f32.mrb[34].mxu0  ;;  %v3704_v43 = vpop.f32.mrb[26].mxu1 }
0x2e6f   :  { %v5818_v37 = vadd.f32 %v3633_v63, %v7040_v42  ;;  %v3635_v15 = vpop.f32.mrb[35].mxu0  ;;  %v3706_v14 = vpop.f32.mrb[27].mxu1  ;;  %v5834_v26 = vadd.f32 %v3704_v43, %v7049_v19 }
0x2e70   :  { %v5819_v52 = vadd.f32 %v3635_v15, %v7042_v41  ;;  %v5835_v8 = vadd.f32 %v3706_v14, %v7046_v50 }
0x2e71   :  { %v4837_v28 = vmul.f32 -1.442695, %v5818_v37 }
0x2e72   :  { %v4838_v31 = vmul.f32 -1.442695, %v5819_v52  ;;  %v4839_v32 = vmul.f32 -1.442695, %v5835_v8 }
0x2e73   :  { %6094 = vpow2.f32 %v4837_v28 }
0x2e74   :  { %6096 = vpow2.f32 %v4838_v31 }
0x2e75   :  { %6098 = vpow2.f32 %v4839_v32 }
0x2e76   :  { %6100 = vtanh.f32 %v5834_v26 }
0x2e7d   :  { %v6095_v57 = vpop.eup %6094 }
0x2e7e   :  { %v6097_v12 = vpop.eup %6096  ;;  %v3716_v34 = vadd.f32 1.0, %v6095_v57 }
0x2e7f   :  { %v3722_v45 = vadd.f32 1.0, %v6097_v12  ;;  %v6099_v58 = vpop.eup %6098 }
0x2e80   :  { %6102 = vrcp.f32 %v3716_v34  ;;  %v6101_v3 = vpop.eup %6100  ;;  %v3729_v53 = vadd.f32 1.0, %v6099_v58 }
0x2e81   :  { %6104 = vrcp.f32 %v3722_v45 }
0x2e82   :  { %6106 = vrcp.f32 %v3729_v53 }
0x2e8a   :  { %v6103_v46 = vpop.eup %6102 }
0x2e8b   :  { %v6105_v62 = vpop.eup %6104  ;;  %v3733_v48 = vmul.f32 %v6103_v46, %v6101_v3 }
0x2e8c   :  { %v3732_v20 = vmul.f32 %v6105_v62, %v7162_v11  ;;  %v6107_v27 = vpop.eup %6106  ;;  %v4850_v11 = vld [vmem:[%s7425_s14 + $0x28] sm:$0xff] }
0x2e8d   :  { %vm4237_vm12 = vcmp.ne.s32.totalorder %v4850_v11, 0  ;;  %v3992_v11 = vpop.permute.xlu1 %3991 }
0x2e8e   :  { %v7263_v17 = vadd.f32 %v3733_v48, %v3732_v20  ;;  %v4238_v15 = vsel %vm4237_vm12, 1, %v6205_v29  ;;  %vm3993_vm13 = vcmp.eq.s32.totalorder %v3992_v11, 1 }
0x2e8f   :  { %4240 = vperm.xlu1 %5884, %v4238_v15  }
0x2e90   :  { %6108 = vtanh.f32 %v7263_v17 }
0x2e9a   :  { %v6109_v63 = vpop.eup %6108 }
0x2e9b   :  { %v3736_v43 = vmul.f32 %v6109_v63, %v6107_v27 }
0x2e9d   :  { %v3745_v37 = vsel %vm3744_vm11, %v3736_v43, -inf  ;;  %3881 = vmatmul.mubr.f32.vlgmr.msra.gmra.mrb[36].mxu0 %v3736_v43  ;;  %3952 = vmatmul.mubr.f32.vlgmr.msra.gmra.mrb[28].mxu1 %v3736_v43 }
0x2e9e   :  { %4841 = vst [vmem:[%s7426_s15 + $0x18] sm:$0xff] %v3745_v37  ;;  %5623 = vmatpush1.bf16.msra.mxu0 %v7124_v56  ;;  %5655 = vmatpush1.bf16.msra.mxu1 %v7174_v36 }
0x2e9f   :  { %5625 = vmatprep.subr.bf16.mxu0 %v7180_v18  ;;  %5657 = vmatprep.subr.bf16.mxu1 %v7182_v7 }
0x2ea0   :  { %4129 = vmatprep.mubr.f32.mxu0 %v6203_v1  ;;  %4200 = vmatprep.mubr.f32.mxu1 %v6203_v1 }
0x2ea2   :  { %5627 = vmatpush1.bf16.msra.mxu0 %v7128_v5  ;;  %5659 = vmatpush1.bf16.msra.mxu1 %v7184_v47 }
0x2ea3   :  { %5629 = vmatprep.subr.bf16.mxu0 %v7190_v59  ;;  %5661 = vmatprep.subr.bf16.mxu1 %v7192_v25 }
0x2ea6   :  { %5631 = vmatpush1.bf16.msra.mxu0 %v7132_v24  ;;  %5663 = vmatpush1.bf16.msra.mxu1 %v7194_v35 }
0x2ea7   :  { %5633 = vmatprep.subr.bf16.mxu0 %v7200_v9  ;;  %5665 = vmatprep.subr.bf16.mxu1 %v7202_v51 }
0x2eaa   :  { %5635 = vmatpush1.bf16.msra.mxu0 %v7136_v2  ;;  %5667 = vmatpush1.bf16.msra.mxu1 %v7204_v44 }
0x2eab   :  { %5637 = vmatprep.subr.bf16.mxu0 %v7210_v60  ;;  %5669 = vmatprep.subr.bf16.mxu1 %v7212_v4 }
0x2eae   :  { %5639 = vmatpush1.bf16.msra.mxu0 %v7140_v16  ;;  %5671 = vmatpush1.bf16.msra.mxu1 %v7214_v10 }
0x2eaf   :  { %5641 = vmatprep.subr.bf16.mxu0 %v7219_v23  ;;  %5673 = vmatprep.subr.bf16.mxu1 %v7222_v6 }
0x2eb2   :  { %5643 = vmatpush1.bf16.msra.mxu0 %v7143_v40  ;;  %5675 = vmatpush1.bf16.msra.mxu1 %v7224_v61 }
0x2eb3   :  { %5645 = vmatprep.subr.bf16.mxu0 %v7227_v39  ;;  %5677 = vmatprep.subr.bf16.mxu1 %v7230_v13 }
0x2eb6   :  { %5647 = vmatpush1.bf16.msra.mxu0 %v7147_v21  ;;  %5679 = vmatpush1.bf16.msra.mxu1 %v7235_v49 }
0x2eb7   :  { %5649 = vmatprep.subr.bf16.mxu0 %v7237_v38  ;;  %5681 = vmatprep.subr.bf16.mxu1 %v7240_v54 }
0x2eba   :  { %5651 = vmatpush1.bf16.msra.mxu0 %v7243_v33  ;;  %5683 = vmatpush1.bf16.msra.mxu1 %v7247_v55 }
0x2ebb   :  { %5685 = vmatprep.subr.bf16.mxu0 %v7170_v0  ;;  %5717 = vmatprep.subr.bf16.mxu1 %v7172_v30 }
0x2f70   :  { %v3882_v14 = vpop.f32.mrb[36].mxu0  ;;  %v3953_v52 = vpop.f32.mrb[28].mxu1 }
0x2f71   :  { %v5820_v28 = vadd.f32 %v3882_v14, %v7040_v42  ;;  %v3884_v31 = vpop.f32.mrb[37].mxu0  ;;  %v3955_v8 = vpop.f32.mrb[29].mxu1  ;;  %v5836_v45 = vadd.f32 %v3953_v52, %v7049_v19 }
0x2f72   :  { %v5821_v32 = vadd.f32 %v3884_v31, %v7042_v41  ;;  %v5837_v12 = vadd.f32 %v3955_v8, %v7046_v50 }
0x2f73   :  { %v4842_v26 = vmul.f32 -1.442695, %v5820_v28 }
0x2f74   :  { %v4843_v57 = vmul.f32 -1.442695, %v5821_v32  ;;  %v4844_v34 = vmul.f32 -1.442695, %v5837_v12 }
0x2f75   :  { %6110 = vpow2.f32 %v4842_v26 }
0x2f76   :  { %6112 = vpow2.f32 %v4843_v57 }
0x2f77   :  { %6114 = vpow2.f32 %v4844_v34 }
0x2f78   :  { %6116 = vtanh.f32 %v5836_v45 }
0x2f7f   :  { %v6111_v58 = vpop.eup %6110 }
0x2f80   :  { %v6113_v3 = vpop.eup %6112  ;;  %v3965_v46 = vadd.f32 1.0, %v6111_v58 }
0x2f81   :  { %v3971_v62 = vadd.f32 1.0, %v6113_v3  ;;  %v6115_v48 = vpop.eup %6114 }
0x2f82   :  { %6118 = vrcp.f32 %v3965_v46  ;;  %v6117_v53 = vpop.eup %6116  ;;  %v3978_v63 = vadd.f32 1.0, %v6115_v48 }
0x2f83   :  { %6120 = vrcp.f32 %v3971_v62 }
0x2f84   :  { %6122 = vrcp.f32 %v3978_v63 }
0x2f8c   :  { %v6119_v20 = vpop.eup %6118 }
0x2f8d   :  { %v6121_v22 = vpop.eup %6120  ;;  %v3982_v27 = vmul.f32 %v6119_v20, %v6117_v53 }
0x2f8e   :  { %v3981_v43 = vmul.f32 %v6121_v22, %v7263_v17  ;;  %v6123_v15 = vpop.eup %6122  ;;  %v4241_v22 = vpop.permute.xlu1 %4240 }
0x2f8f   :  { %vm4242_vm15 = vcmp.eq.s32.totalorder %v4241_v22, 1 }
0x2f90   :  { %v7312_v37 = vadd.f32 %v3982_v27, %v3981_v43 }
0x2f92   :  { %6124 = vtanh.f32 %v7312_v37 }
0x2f9c   :  { %v6125_v14 = vpop.eup %6124 }
0x2f9d   :  { %v3985_v52 = vmul.f32 %v6125_v14, %v6123_v15  ;;  %v4551_v15 = vld [vmem:[#allocation5 + $0x1a0] sm:$0xff] }
0x2f9f   :  { %v3994_v28 = vsel %vm3993_vm13, %v3985_v52, -inf  ;;  %4130 = vmatmul.mubr.f32.vlgmr.msra.gmra.mrb[38].mxu0 %v3985_v52  ;;  %4201 = vmatmul.mubr.f32.vlgmr.msra.gmra.mrb[30].mxu1 %v3985_v52 }
0x2fa0   :  { %4846 = vst [vmem:[%s7426_s15 + $0x20] sm:$0xff] %v3994_v28  ;;  %5687 = vmatpush1.bf16.msra.mxu0 %v7124_v56  ;;  %5719 = vmatpush1.bf16.msra.mxu1 %v7174_v36  ;;  %v4855_v56 = vld [vmem:[%s7425_s14 + $0x30] sm:$0xff] }
0x2fa1   :  { %5689 = vmatprep.subr.bf16.mxu0 %v7180_v18  ;;  %5721 = vmatprep.subr.bf16.mxu1 %v7182_v7  ;;  %vm4486_vm14 = vcmp.ne.s32.totalorder %v4855_v56, 0 }
0x2fa2   :  { %4378 = vmatprep.mubr.f32.mxu0 %v6203_v1  ;;  %4449 = vmatprep.mubr.f32.mxu1 %v6203_v1 }
0x2fa4   :  { %5691 = vmatpush1.bf16.msra.mxu0 %v7128_v5  ;;  %5723 = vmatpush1.bf16.msra.mxu1 %v7184_v47  ;;  %v4487_v5 = vsel %vm4486_vm14, 1, %v6205_v29 }
0x2fa5   :  { %5693 = vmatprep.subr.bf16.mxu0 %v7190_v59  ;;  %5725 = vmatprep.subr.bf16.mxu1 %v7192_v25 }
0x2fa6   :  { %4489 = vperm.xlu1 %5884, %v4487_v5  }
0x2fa8   :  { %5695 = vmatpush1.bf16.msra.mxu0 %v7132_v24  ;;  %5727 = vmatpush1.bf16.msra.mxu1 %v7194_v35 }
0x2fa9   :  { %5697 = vmatprep.subr.bf16.mxu0 %v7200_v9  ;;  %5729 = vmatprep.subr.bf16.mxu1 %v7202_v51 }
0x2fac   :  { %5699 = vmatpush1.bf16.msra.mxu0 %v7136_v2  ;;  %5731 = vmatpush1.bf16.msra.mxu1 %v7204_v44 }
0x2fad   :  { %5701 = vmatprep.subr.bf16.mxu0 %v7210_v60  ;;  %5733 = vmatprep.subr.bf16.mxu1 %v7212_v4 }
0x2fb0   :  { %5703 = vmatpush1.bf16.msra.mxu0 %v7140_v16  ;;  %5735 = vmatpush1.bf16.msra.mxu1 %v7214_v10 }
0x2fb1   :  { %5705 = vmatprep.subr.bf16.mxu0 %v7219_v23  ;;  %5737 = vmatprep.subr.bf16.mxu1 %v7222_v6 }
0x2fb4   :  { %5707 = vmatpush1.bf16.msra.mxu0 %v7143_v40  ;;  %5739 = vmatpush1.bf16.msra.mxu1 %v7224_v61 }
0x2fb5   :  { %5709 = vmatprep.subr.bf16.mxu0 %v7227_v39  ;;  %5741 = vmatprep.subr.bf16.mxu1 %v7230_v13 }
0x2fb8   :  { %5711 = vmatpush1.bf16.msra.mxu0 %v7147_v21  ;;  %5743 = vmatpush1.bf16.msra.mxu1 %v7235_v49 }
0x2fb9   :  { %5713 = vmatprep.subr.bf16.mxu0 %v7237_v38  ;;  %5745 = vmatprep.subr.bf16.mxu1 %v7240_v54 }
0x2fbc   :  { %5715 = vmatpush1.bf16.msra.mxu0 %v7243_v33  ;;  %5747 = vmatpush1.bf16.msra.mxu1 %v7247_v55 }
0x2fbd   :  { %5749 = vmatprep.subr.bf16.mxu0 %v7170_v0  ;;  %5781 = vmatprep.subr.bf16.mxu1 %v7172_v30 }
0x3072   :  { %v4131_v24 = vpop.f32.mrb[38].mxu0  ;;  %v4202_v2 = vpop.f32.mrb[30].mxu1 }
0x3073   :  { %v5822_v16 = vadd.f32 %v4131_v24, %v7040_v42  ;;  %v4133_v40 = vpop.f32.mrb[39].mxu0  ;;  %v4204_v21 = vpop.f32.mrb[31].mxu1  ;;  %v5838_v32 = vadd.f32 %v4202_v2, %v7049_v19 }
0x3074   :  { %v5823_v17 = vadd.f32 %v4133_v40, %v7042_v41  ;;  %v5839_v30 = vadd.f32 %v4204_v21, %v7046_v50 }
0x3075   :  { %v4847_v31 = vmul.f32 -1.442695, %v5822_v16 }
0x3076   :  { %v4848_v0 = vmul.f32 -1.442695, %v5823_v17  ;;  %v4849_v8 = vmul.f32 -1.442695, %v5839_v30 }
0x3077   :  { %6126 = vpow2.f32 %v4847_v31 }
0x3078   :  { %6128 = vpow2.f32 %v4848_v0 }
0x3079   :  { %6130 = vpow2.f32 %v4849_v8 }
0x307a   :  { %6132 = vtanh.f32 %v5838_v32 }
0x3081   :  { %v6127_v26 = vpop.eup %6126 }
0x3082   :  { %v6129_v57 = vpop.eup %6128  ;;  %v4214_v12 = vadd.f32 1.0, %v6127_v26 }
0x3083   :  { %v4220_v34 = vadd.f32 1.0, %v6129_v57  ;;  %v6131_v45 = vpop.eup %6130 }
0x3084   :  { %6134 = vrcp.f32 %v4214_v12  ;;  %v6133_v58 = vpop.eup %6132  ;;  %v4227_v48 = vadd.f32 1.0, %v6131_v45 }
0x3085   :  { %6136 = vrcp.f32 %v4220_v34  ;;  %v4490_v34 = vpop.permute.xlu1 %4489 }
0x3086   :  { %6138 = vrcp.f32 %v4227_v48  ;;  %vm4491_vm1 = vcmp.eq.s32.totalorder %v4490_v34, 1 }
0x308e   :  { %v6135_v3 = vpop.eup %6134 }
0x308f   :  { %v6137_v46 = vpop.eup %6136  ;;  %v4231_v62 = vmul.f32 %v6135_v3, %v6133_v58 }
0x3090   :  { %v4230_v53 = vmul.f32 %v6137_v46, %v7312_v37  ;;  %v6139_v27 = vpop.eup %6138 }
0x3092   :  { %v7361_v20 = vadd.f32 %v4231_v62, %v4230_v53 }
0x3094   :  { %6140 = vtanh.f32 %v7361_v20 }
0x309e   :  { %v6141_v63 = vpop.eup %6140 }
0x309f   :  { %v4234_v43 = vmul.f32 %v6141_v63, %v6139_v27 }
0x30a1   :  { %v4243_v11 = vsel %vm4242_vm15, %v4234_v43, -inf  ;;  %4379 = vmatmul.mubr.f32.vlgmr.msra.gmra.mrb[40].mxu0 %v4234_v43  ;;  %4450 = vmatmul.mubr.f32.vlgmr.msra.gmra.mrb[32].mxu1 %v4234_v43 }
0x30a2   :  { %4851 = vst [vmem:[%s7426_s15 + $0x28] sm:$0xff] %v4243_v11  ;;  %5783 = vmatpush1.bf16.msra.mxu1 %v7174_v36  ;;  %4627 = vmatprep.mubr.f32.mxu0 %v6203_v1  ;;  %v4503_v36 = vld [vmem:[#allocation5 + $0x20] sm:$0xff] }
0x30a3   :  { %5785 = vmatprep.subr.bf16.mxu1 %v7182_v7  ;;  %4698 = vmatprep.mubr.f32.mxu1 %v6203_v1  ;;  %v4499_v1 = vld [vmem:[#allocation5] sm:$0xff] }
0x30a4   :  { %v5750_v7 = vpack.c.bf16 %v4503_v36, %v4499_v1 }
0x30a6   :  { %5787 = vmatpush1.bf16.msra.mxu1 %v7184_v47  ;;  %5751 = vmatpush1.bf16.msra.mxu0 %v5750_v7  ;;  %v4507_v47 = vld [vmem:[#allocation5 + $0x40] sm:$0xff] }
0x30a7   :  { %5789 = vmatprep.subr.bf16.mxu1 %v7192_v25  ;;  %5753 = vmatprep.subr.bf16.mxu0 %v7180_v18  ;;  %v4511_v25 = vld [vmem:[#allocation5 + $0x60] sm:$0xff] }
0x30a8   :  { %v4535_v18 = vld [vmem:[#allocation5 + $0x120] sm:$0xff] }
0x30aa   :  { %5791 = vmatpush1.bf16.msra.mxu1 %v7194_v35  ;;  %v5754_v35 = vpack.c.bf16 %v4511_v25, %v4507_v47 }
0x30ab   :  { %5793 = vmatprep.subr.bf16.mxu1 %v7202_v51  ;;  %v4515_v51 = vld [vmem:[#allocation5 + $0x80] sm:$0xff] }
0x30ac   :  { %5755 = vmatpush1.bf16.msra.mxu0 %v5754_v35 }
0x30ad   :  { %5757 = vmatprep.subr.bf16.mxu0 %v7190_v59  ;;  %v4547_v59 = vld [vmem:[#allocation5 + $0x180] sm:$0xff] }
0x30ae   :  { %5795 = vmatpush1.bf16.msra.mxu1 %v7204_v44  ;;  %v4519_v44 = vld [vmem:[#allocation5 + $0xa0] sm:$0xff]  ;;  %v5774_v14 = vpack.c.bf16 %v4551_v15, %v4547_v59 }
0x30af   :  { %5797 = vmatprep.subr.bf16.mxu1 %v7212_v4  ;;  %v5758_v4 = vpack.c.bf16 %v4519_v44, %v4515_v51 }
0x30b1   :  { %5759 = vmatpush1.bf16.msra.mxu0 %v5758_v4 }
0x30b2   :  { %5799 = vmatpush1.bf16.msra.mxu1 %v7214_v10  ;;  %5761 = vmatprep.subr.bf16.mxu0 %v7200_v9  ;;  %v4523_v10 = vld [vmem:[#allocation5 + $0xc0] sm:$0xff]  ;;  %v4860_v9 = vld [vmem:[%s7425_s14 + $0x38] sm:$0xff] }
0x30b3   :  { %5801 = vmatprep.subr.bf16.mxu1 %v7222_v6  ;;  %v4527_v6 = vld [vmem:[#allocation5 + $0xe0] sm:$0xff]  ;;  %vm4735_vm0 = vcmp.ne.s32.totalorder %v4860_v9, 0 }
0x30b6   :  { %5803 = vmatpush1.bf16.msra.mxu1 %v7224_v61  ;;  %v5762_v61 = vpack.c.bf16 %v4527_v6, %v4523_v10 }
0x30b7   :  { %5805 = vmatprep.subr.bf16.mxu1 %v7230_v13  ;;  %v4531_v13 = vld [vmem:[#allocation5 + $0x100] sm:$0xff] }
0x30b8   :  { %5763 = vmatpush1.bf16.msra.mxu0 %v5762_v61 }
0x30b9   :  { %5765 = vmatprep.subr.bf16.mxu0 %v7210_v60  ;;  %v4736_v60 = vsel %vm4735_vm0, 1, %v6205_v29 }
0x30ba   :  { %5807 = vmatpush1.bf16.msra.mxu1 %v7235_v49  ;;  %v5766_v49 = vpack.c.bf16 %v4535_v18, %v4531_v13  ;;  %4738 = vperm.xlu1 %5884, %v4736_v60  }
0x30bb   :  { %5809 = vmatprep.subr.bf16.mxu1 %v7240_v54  ;;  %v4539_v54 = vld [vmem:[#allocation5 + $0x140] sm:$0xff] }
0x30bc   :  { %5767 = vmatpush1.bf16.msra.mxu0 %v5766_v49 }
0x30bd   :  { %5769 = vmatprep.subr.bf16.mxu0 %v7219_v23 }
0x30be   :  { %5811 = vmatpush1.bf16.msra.mxu1 %v7247_v55  ;;  %v4543_v55 = vld [vmem:[#allocation5 + $0x160] sm:$0xff] }
0x30bf   :  { %v5770_v37 = vpack.c.bf16 %v4543_v55, %v4539_v54 }
0x30c1   :  { %5771 = vmatpush1.bf16.msra.mxu0 %v5770_v37 }
0x30c2   :  { %5773 = vmatprep.subr.bf16.mxu0 %v7227_v39 }
0x30c5   :  { %5775 = vmatpush1.bf16.msra.mxu0 %v5774_v14 }
0x30c6   :  { %5777 = vmatprep.subr.bf16.mxu0 %v7237_v38 }
0x30c9   :  { %5779 = vmatpush1.bf16.msra.mxu0 %v7243_v33 }
0x3174   :  { %v4380_v23 = vpop.f32.mrb[40].mxu0  ;;  %v4451_v52 = vpop.f32.mrb[32].mxu1 }
0x3175   :  { %v5824_v28 = vadd.f32 %v4380_v23, %v7040_v42  ;;  %v4382_v56 = vpop.f32.mrb[41].mxu0  ;;  %v4453_v5 = vpop.f32.mrb[33].mxu1  ;;  %v5840_v16 = vadd.f32 %v4451_v52, %v7049_v19 }
0x3176   :  { %v5825_v39 = vadd.f32 %v4382_v56, %v7042_v41  ;;  %v5841_v33 = vadd.f32 %v4453_v5, %v7046_v50 }
0x3177   :  { %v4852_v24 = vmul.f32 -1.442695, %v5824_v28 }
0x3178   :  { %v4853_v38 = vmul.f32 -1.442695, %v5825_v39  ;;  %v4854_v2 = vmul.f32 -1.442695, %v5841_v33 }
0x3179   :  { %6142 = vpow2.f32 %v4852_v24 }
0x317a   :  { %6144 = vpow2.f32 %v4853_v38 }
0x317b   :  { %6146 = vpow2.f32 %v4854_v2 }
0x317c   :  { %6148 = vtanh.f32 %v5840_v16 }
0x3183   :  { %v6143_v40 = vpop.eup %6142 }
0x3184   :  { %v6145_v29 = vpop.eup %6144  ;;  %v4463_v21 = vadd.f32 1.0, %v6143_v40 }
0x3185   :  { %v4469_v17 = vadd.f32 1.0, %v6145_v29  ;;  %v6147_v31 = vpop.eup %6146 }
0x3186   :  { %6150 = vrcp.f32 %v4463_v21  ;;  %v6149_v0 = vpop.eup %6148  ;;  %v4476_v26 = vadd.f32 1.0, %v6147_v31 }
0x3187   :  { %6152 = vrcp.f32 %v4469_v17 }
0x3188   :  { %6154 = vrcp.f32 %v4476_v26 }
0x3190   :  { %v6151_v30 = vpop.eup %6150 }
0x3191   :  { %v6153_v8 = vpop.eup %6152  ;;  %v4480_v32 = vmul.f32 %v6151_v30, %v6149_v0 }
0x3192   :  { %v4479_v57 = vmul.f32 %v6153_v8, %v7361_v20  ;;  %v6155_v45 = vpop.eup %6154 }
0x3194   :  { %v4481_v12 = vadd.f32 %v4480_v32, %v4479_v57 }
0x3196   :  { %6156 = vtanh.f32 %v4481_v12 }
0x31a0   :  { %v6157_v58 = vpop.eup %6156 }
0x31a1   :  { %v4483_v3 = vmul.f32 %v6157_v58, %v6155_v45 }
0x31a3   :  { %v4492_v46 = vsel %vm4491_vm1, %v4483_v3, -inf  ;;  %4628 = vmatmul.mubr.f32.vlgmr.msra.gmra.mrb[42].mxu0 %v4483_v3  ;;  %4699 = vmatmul.mubr.f32.vlgmr.msra.gmra.mrb[34].mxu1 %v4483_v3 }
0x31a4   :  { %4856 = vst [vmem:[%s7426_s15 + $0x30] sm:$0xff] %v4492_v46 }
0x3276   :  { %v4629_v62 = vpop.f32.mrb[42].mxu0  ;;  %v4700_v48 = vpop.f32.mrb[34].mxu1 }
0x3277   :  { %v5826_v53 = vadd.f32 %v4629_v62, %v7040_v42  ;;  %v4631_v20 = vpop.f32.mrb[43].mxu0  ;;  %v4702_v22 = vpop.f32.mrb[35].mxu1  ;;  %v5842_v36 = vadd.f32 %v4700_v48, %v7049_v19 }
0x3278   :  { %v5827_v27 = vadd.f32 %v4631_v20, %v7042_v41  ;;  %v5843_v11 = vadd.f32 %v4702_v22, %v7046_v50  ;;  %v4739_v19 = vpop.permute.xlu1 %4738 }
0x3279   :  { %v4857_v63 = vmul.f32 -1.442695, %v5826_v53  ;;  %vm4740_vm2 = vcmp.eq.s32.totalorder %v4739_v19, 1 }
0x327a   :  { %v4858_v43 = vmul.f32 -1.442695, %v5827_v27  ;;  %v4859_v1 = vmul.f32 -1.442695, %v5843_v11 }
0x327b   :  { %6158 = vpow2.f32 %v4857_v63 }
0x327c   :  { %6160 = vpow2.f32 %v4858_v43 }
0x327d   :  { %6162 = vpow2.f32 %v4859_v1 }
0x327e   :  { %6164 = vtanh.f32 %v5842_v36 }
0x3285   :  { %v6159_v7 = vpop.eup %6158 }
0x3286   :  { %v6161_v47 = vpop.eup %6160  ;;  %v4712_v25 = vadd.f32 1.0, %v6159_v7 }
0x3287   :  { %v4718_v35 = vadd.f32 1.0, %v6161_v47  ;;  %v6163_v42 = vpop.eup %6162 }
0x3288   :  { %6166 = vrcp.f32 %v4712_v25  ;;  %v6165_v51 = vpop.eup %6164  ;;  %v4725_v10 = vadd.f32 1.0, %v6163_v42 }
0x3289   :  { %6168 = vrcp.f32 %v4718_v35 }
0x328a   :  { %6170 = vrcp.f32 %v4725_v10 }
0x3292   :  { %v6167_v41 = vpop.eup %6166 }
0x3293   :  { %v6169_v44 = vpop.eup %6168  ;;  %v4729_v4 = vmul.f32 %v6167_v41, %v6165_v51 }
0x3294   :  { %v4728_v6 = vmul.f32 %v6169_v44, %v4481_v12  ;;  %v6171_v50 = vpop.eup %6170 }
0x3296   :  { %v4730_v61 = vadd.f32 %v4729_v4, %v4728_v6 }
0x3298   :  { %6172 = vtanh.f32 %v4730_v61 }
0x32a2   :  { %v6173_v13 = vpop.eup %6172 }
0x32a3   :  { %v4732_v18 = vmul.f32 %v6173_v13, %v6171_v50 }
0x32a5   :  { %v4741_v49 = vsel %vm4740_vm2, %v4732_v18, -inf }
0x32a6   :  { %4861 = vst [vmem:[%s7426_s15 + $0x38] sm:$0xff] %v4741_v49 }
0x32a7   :  { %4748 = vsyncpa [#allocation6], 1 }

</bundles_post_ra>
